<compile_context>
chip_gen: v5e
topology: v5e:2x2
jax: 0.10.0
libtpu: 0.0.40
codegen_flags: <defaults>
</compile_context>

<pallas_src>
import functools

import jax
import jax.numpy as jnp
from jax import lax
from jax.experimental import pallas as pl
from jax.experimental.pallas import tpu as pltpu

_EPS = 1e-5


# ----------------------------------------------------------------------------
# Small helpers
# ----------------------------------------------------------------------------
def _pick_row_block(ho):
    """In-kernel row-block size (must divide ho): batches rows so each MXU dot
    has M = TR * W instead of M = W."""
    for t in (16, 8, 4, 2, 1):
        if ho % t == 0:
            return t
    return 1


def _epilogue_row_tile(ho, row_bytes, budget=4 << 20):
    """Epilogue H tile: full extent when it fits comfortably (fewest ~0.35us grid
    steps); otherwise the largest multiple-of-8 divisor under the VMEM budget."""
    t = ho
    while t * row_bytes > budget and t % 2 == 0 and (t // 2) % 8 == 0:
        t //= 2
    return t


def _cparams(n_parallel, est_bytes=0):
    """Derive vmem_limit_bytes from the actual resident block/scratch bytes
    (32 MiB floor, ~100 MiB cap; v5e/v6e have 128 MiB physical VMEM)."""
    limit = int(min(100 << 20, max(32 << 20, est_bytes + (8 << 20))))
    return pltpu.CompilerParams(
        dimension_semantics=("parallel",) * n_parallel,
        vmem_limit_bytes=limit,
    )


def _loop(n_iters, body):
    """body(i) for i in [0, n_iters): static unroll for small trip counts,
    lax.fori_loop otherwise so code size stays bounded."""
    if n_iters <= 8:
        for i in range(n_iters):
            body(i)
    else:
        def _b(i, carry):
            body(i)
            return carry
        lax.fori_loop(0, n_iters, _b, 0)


# ----------------------------------------------------------------------------
# Kernel 1: conv1 (3x3) [+ fused 1x1 downsample conv], wide-K im2col dot per
#           row block, fused per-batch BN partial statistics (from f32 acc).
# ----------------------------------------------------------------------------
def _conv1_ds_kernel(x_ref, w1_ref, *rest, K, stride, TR, has_ds):
    if has_ds:
        wd_ref, y1_ref, yd_ref, st1_ref, std_ref, col_ref = rest
    else:
        y1_ref, st1_ref, col_ref = rest
        wd_ref = yd_ref = std_ref = None

    cin = x_ref.shape[-1]
    ho, wo, cout = y1_ref.shape[1], y1_ref.shape[2], y1_ref.shape[3]
    cdt = col_ref.dtype
    nblk = ho // TR

    # BN partial-stat accumulators (accumulated per row block below).
    st1_ref[...] = jnp.zeros(st1_ref.shape, st1_ref.dtype)
    if has_ds:
        std_ref[...] = jnp.zeros(std_ref.shape, std_ref.dtype)

    def tap_patch(r0, kh, kw):
        if stride == 1:
            # x_ref: (1, hp, wp, cin), zero-padded input.
            return x_ref[0, pl.ds(r0 + kh, TR), pl.ds(kw, wo), :]
        # stride == 2: x_ref holds 4 parity planes (rp, cp) of the padded input,
        # x_ref[rp*2+cp, i, j, :] == xp[2i+rp, 2j+cp, :].  Tap (kh, kw) of output
        # (r, j) reads xp[2r+kh, 2j+kw] -> plane (kh%2, kw%2) at (r+kh//2, j+kw//2):
        # contiguous loads, no strided sublane gathers.
        plane = (kh % 2) * 2 + (kw % 2)
        return x_ref[plane, pl.ds(r0 + kh // 2, TR), pl.ds(kw // 2, wo), :]

    def block(blk):
        r0 = blk * TR
        # im2col slab (TR, wo, K*K*cin) -> one wide-contraction MXU dot.
        for kh in range(K):
            for kw in range(K):
                tap = kh * K + kw
                col_ref[:, :, pl.ds(tap * cin, cin)] = (
                    tap_patch(r0, kh, kw).astype(cdt))
        acc = jnp.dot(col_ref[...].reshape(TR * wo, K * K * cin), w1_ref[...],
                      preferred_element_type=jnp.float32)
        # BN stats from the f32 accumulator, before the (possibly bf16) downcast.
        st1_ref[0, pl.ds(0, 1), :] += jnp.sum(acc, axis=0, keepdims=True)
        st1_ref[0, pl.ds(1, 1), :] += jnp.sum(acc * acc, axis=0, keepdims=True)
        y1_ref[0, pl.ds(r0, TR)] = acc.reshape(TR, wo, cout).astype(y1_ref.dtype)

        if has_ds:
            if stride == 1:
                p = x_ref[0, pl.ds(r0 + 1, TR), pl.ds(1, wo), :]   # unpadded x
            else:
                p = x_ref[3, pl.ds(r0, TR), pl.ds(0, wo), :]       # xp[2r+1,2j+1]=x[2r,2j]
            accd = jnp.dot(p.astype(wd_ref.dtype).reshape(TR * wo, cin), wd_ref[...],
                           preferred_element_type=jnp.float32)
            std_ref[0, pl.ds(0, 1), :] += jnp.sum(accd, axis=0, keepdims=True)
            std_ref[0, pl.ds(1, 1), :] += jnp.sum(accd * accd, axis=0, keepdims=True)
            yd_ref[0, pl.ds(r0, TR)] = accd.reshape(TR, wo, cout).astype(yd_ref.dtype)

    _loop(nblk, block)


# ----------------------------------------------------------------------------
# Kernel 2: conv2 (3x3, stride 1) with BN1-affine + ReLU fused on the input and
#           BN2 partial statistics fused on the f32 accumulator.
# ----------------------------------------------------------------------------
def _conv2_kernel(y1_ref, w2_ref, sc_ref, bi_ref, y2_ref, st_ref, pad_ref, col_ref,
                  *, K, TR):
    ho, wo, cm = y1_ref.shape[1], y1_ref.shape[2], y1_ref.shape[3]
    cout = y2_ref.shape[3]
    cdt = pad_ref.dtype
    nblk = ho // TR

    # Zero only the 1-pixel halo border; the interior is fully overwritten below.
    zrow = jnp.zeros((1, wo + 2, cm), cdt)
    zcol = jnp.zeros((ho + 2, 1, cm), cdt)
    pad_ref[pl.ds(0, 1), :, :] = zrow
    pad_ref[pl.ds(ho + 1, 1), :, :] = zrow
    pad_ref[:, pl.ds(0, 1), :] = zcol
    pad_ref[:, pl.ds(wo + 1, 1), :] = zcol

    # BN1 (batch-stat affine) + ReLU applied on the fly; padding happens AFTER
    # BN+ReLU, so the conv halo stays exact zeros.
    a = jnp.maximum(y1_ref[0].astype(jnp.float32) * sc_ref[...] + bi_ref[...], 0.0)
    pad_ref[pl.ds(1, ho), pl.ds(1, wo), :] = a.astype(cdt)

    st_ref[...] = jnp.zeros(st_ref.shape, st_ref.dtype)

    def block(blk):
        r0 = blk * TR
        for kh in range(K):
            for kw in range(K):
                tap = kh * K + kw
                col_ref[:, :, pl.ds(tap * cm, cm)] = (
                    pad_ref[pl.ds(r0 + kh, TR), pl.ds(kw, wo), :])
        acc = jnp.dot(col_ref[...].reshape(TR * wo, K * K * cm), w2_ref[...],
                      preferred_element_type=jnp.float32)
        st_ref[0, pl.ds(0, 1), :] += jnp.sum(acc, axis=0, keepdims=True)
        st_ref[0, pl.ds(1, 1), :] += jnp.sum(acc * acc, axis=0, keepdims=True)
        y2_ref[0, pl.ds(r0, TR)] = acc.reshape(TR, wo, cout).astype(y2_ref.dtype)

    _loop(nblk, block)


# ----------------------------------------------------------------------------
# Kernel 3: fused BN2 + shortcut-BN + residual add + final ReLU
#           (lane-dense (W*C) flattened layout).
# ----------------------------------------------------------------------------
def _bn_add_relu_kernel(r_ref, s_ref, scr_ref, bir_ref, scs_ref, bis_ref, o_ref):
    r = r_ref[0].astype(jnp.float32) * scr_ref[...] + bir_ref[...]
    s = s_ref[0].astype(jnp.float32) * scs_ref[...] + bis_ref[...]
    o_ref[0] = jnp.maximum(r + s, 0.0).astype(o_ref.dtype)


# ----------------------------------------------------------------------------
# BN batch-statistics -> per-channel affine (scale, bias)
# ----------------------------------------------------------------------------
def _bn_affine(stats, gamma, beta, count, eps=_EPS):
    # TODO(synk): at very large N*H*W, E[x^2]-E[x]^2 in f32 can cancel; a shifted /
    # Welford-style accumulation of the per-block partials would be more robust.
    total = jnp.sum(stats, axis=0)            # (2, C): [sum, sum of squares]
    mean = total[0] / count
    var = jnp.maximum(total[1] / count - mean * mean, 0.0)   # biased variance
    scale = gamma * lax.rsqrt(var + eps)
    bias = beta - mean * scale
    return scale, bias


# ----------------------------------------------------------------------------
# BasicBlock: parameters + forward (Pallas) + plain-JAX reference.
# ----------------------------------------------------------------------------
def init_basic_block_params(key, in_chan, out_chan, stride):
    k1, k2, k3 = jax.random.split(key, 3)
    params = {
        "conv1_w": 0.1 * jax.random.normal(k1, (3, 3, in_chan, out_chan), jnp.float32),
        "bn1_gamma": jnp.ones((out_chan,), jnp.float32),
        "bn1_beta": jnp.zeros((out_chan,), jnp.float32),
        "conv2_w": 0.1 * jax.random.normal(k2, (3, 3, out_chan, out_chan), jnp.float32),
        "bn2_gamma": jnp.ones((out_chan,), jnp.float32),
        "bn2_beta": jnp.zeros((out_chan,), jnp.float32),
    }
    if in_chan != out_chan or stride != 1:
        params["ds_conv_w"] = 0.1 * jax.random.normal(
            k3, (1, 1, in_chan, out_chan), jnp.float32)
        params["ds_bn_gamma"] = jnp.ones((out_chan,), jnp.float32)
        params["ds_bn_beta"] = jnp.zeros((out_chan,), jnp.float32)
    return params


def basic_block_forward(x_nchw, params, *, stride=1, use_bf16=True):
    assert stride in (1, 2), "ResNet BasicBlock only uses stride 1 or 2"
    K, pad = 3, 1
    cdt = jnp.bfloat16 if use_bf16 else jnp.float32
    itemsize = jnp.dtype(cdt).itemsize

    x = jnp.transpose(x_nchw, (0, 2, 3, 1)).astype(jnp.float32)   # NCHW -> NHWC
    n, h, w, cin = x.shape
    cout = params["conv1_w"].shape[3]
    has_ds = "ds_conv_w" in params

    ho = (h + 2 * pad - K) // stride + 1
    wo = (w + 2 * pad - K) // stride + 1
    TR = _pick_row_block(ho)

    # --- arrange the conv1 input (one-time XLA relayout; no in-kernel strided loads) ---
    xp = jnp.pad(x, ((0, 0), (pad, pad), (pad, pad), (0, 0)))
    hp, wp = h + 2 * pad, w + 2 * pad
    if stride == 1:
        xin = xp
        x_spec = pl.BlockSpec((1, hp, wp, cin), lambda b: (b, 0, 0, 0))
    else:
        hp2, wp2 = hp + (hp % 2), wp + (wp % 2)
        xq = jnp.pad(xp, ((0, 0), (0, hp2 - hp), (0, wp2 - wp), (0, 0)))
        hq, wq = hp2 // 2, wp2 // 2
        # (row-parity, col-parity) planes: xin[b*4 + rp*2 + cp, i, j] = xp[b, 2i+rp, 2j+cp].
        xin = (xq.reshape(n, hq, 2, wq, 2, cin)
                 .transpose(0, 2, 4, 1, 3, 5)
                 .reshape(n * 4, hq, wq, cin))
        x_spec = pl.BlockSpec((4, hq, wq, cin), lambda b: (b, 0, 0, 0))

    # TODO(synk): on v7x (64 MiB VMEM) the whole-image per-batch blocks of calls 1/2
    # should additionally be tiled over H with a 2-row halo (pl.ANY + manual DMA).

    # --- call 1: conv1 (+ optional 1x1 downsample) + BN partial stats ---
    w1 = params["conv1_w"].reshape(K * K * cin, cout).astype(cdt)
    y_sd = jax.ShapeDtypeStruct((n, ho, wo, cout), cdt)
    st_sd = jax.ShapeDtypeStruct((n, 2, cout), jnp.float32)
    y_spec = pl.BlockSpec((1, ho, wo, cout), lambda b: (b, 0, 0, 0))
    st_spec = pl.BlockSpec((1, 2, cout), lambda b: (b, 0, 0))

    inputs = [xin, w1]
    in_specs = [x_spec, pl.BlockSpec(w1.shape, lambda b: (0, 0))]
    wd_bytes = 0
    if has_ds:
        wd = params["ds_conv_w"].reshape(cin, cout).astype(cdt)
        wd_bytes = wd.nbytes
        inputs.append(wd)
        in_specs.append(pl.BlockSpec(wd.shape, lambda b: (0, 0)))
        out_shape = (y_sd, y_sd, st_sd, st_sd)
        out_specs = (y_spec, y_spec, st_spec, st_spec)
    else:
        out_shape = (y_sd, st_sd)
        out_specs = (y_spec, st_spec)

    y_blk_bytes = ho * wo * cout * itemsize
    est1 = (2 * ((xin.nbytes // n) + (1 + int(has_ds)) * y_blk_bytes)
            + w1.nbytes + wd_bytes + TR * wo * K * K * cin * itemsize)

    outs = pl.pallas_call(
        functools.partial(_conv1_ds_kernel, K=K, stride=stride, TR=TR, has_ds=has_ds),
        out_shape=out_shape,
        grid=(n,),
        in_specs=in_specs,
        out_specs=out_specs,
        scratch_shapes=[pltpu.VMEM((TR, wo, K * K * cin), cdt)],
        compiler_params=_cparams(1, est1),
    )(*inputs)
    if has_ds:
        y1, yd, st1, std = outs
    else:
        y1, st1 = outs
        yd = std = None

    cnt = float(n * ho * wo)
    scale1, bias1 = _bn_affine(st1, params["bn1_gamma"], params["bn1_beta"], cnt)

    # --- call 2: conv2 with fused BN1-normalize+ReLU input and BN2 stats ---
    w2 = params["conv2_w"].reshape(K * K * cout, cout).astype(cdt)
    est2 = (2 * (2 * y_blk_bytes) + w2.nbytes
            + (ho + 2) * (wo + 2) * cout * itemsize
            + TR * wo * K * K * cout * itemsize)
    y2, st2 = pl.pallas_call(
        functools.partial(_conv2_kernel, K=K, TR=TR),
        out_shape=(y_sd, st_sd),
        grid=(n,),
        in_specs=[
            y_spec,
            pl.BlockSpec(w2.shape, lambda b: (0, 0)),
            pl.BlockSpec((1, cout), lambda b: (0, 0)),
            pl.BlockSpec((1, cout), lambda b: (0, 0)),
        ],
        out_specs=(y_spec, st_spec),
        scratch_shapes=[pltpu.VMEM((ho + 2, wo + 2, cout), cdt),
                        pltpu.VMEM((TR, wo, K * K * cout), cdt)],
        compiler_params=_cparams(1, est2),
    )(y1, w2, scale1.reshape(1, cout), bias1.reshape(1, cout))

    scale2, bias2 = _bn_affine(st2, params["bn2_gamma"], params["bn2_beta"], cnt)
    if has_ds:
        scale_s, bias_s = _bn_affine(std, params["ds_bn_gamma"],
                                     params["ds_bn_beta"], cnt)
        shortcut = yd
    else:
        scale_s = jnp.ones((cout,), jnp.float32)
        bias_s = jnp.zeros((cout,), jnp.float32)
        shortcut = x

    # --- call 3: fused BN2 + shortcut-BN + add + ReLU (lane-dense W*C layout) ---
    wc = wo * cout
    r_flat = y2.reshape(n, ho, wc)
    s_flat = shortcut.reshape(n, ho, wc)
    scr = jnp.tile(scale2, wo).reshape(1, wc)
    bir = jnp.tile(bias2, wo).reshape(1, wc)
    scs = jnp.tile(scale_s, wo).reshape(1, wc)
    bis = jnp.tile(bias_s, wo).reshape(1, wc)

    tre = _epilogue_row_tile(ho, wc * 4)
    est3 = 2 * 3 * tre * wc * 4 + 4 * wc * 4
    out_flat = pl.pallas_call(
        _bn_add_relu_kernel,
        out_shape=jax.ShapeDtypeStruct((n, ho, wc), jnp.float32),
        grid=(n, ho // tre),
        in_specs=[
            pl.BlockSpec((1, tre, wc), lambda b, r: (b, r, 0)),
            pl.BlockSpec((1, tre, wc), lambda b, r: (b, r, 0)),
            pl.BlockSpec((1, wc), lambda b, r: (0, 0)),
            pl.BlockSpec((1, wc), lambda b, r: (0, 0)),
            pl.BlockSpec((1, wc), lambda b, r: (0, 0)),
            pl.BlockSpec((1, wc), lambda b, r: (0, 0)),
        ],
        out_specs=pl.BlockSpec((1, tre, wc), lambda b, r: (b, r, 0)),
        compiler_params=_cparams(2, est3),
    )(r_flat, s_flat, scr, bir, scs, bis)

    out = out_flat.reshape(n, ho, wo, cout)
    return jnp.transpose(out, (0, 3, 1, 2))   # NHWC -> NCHW


# ----------------------------------------------------------------------------
# Plain-JAX reference
# ----------------------------------------------------------------------------
def _ref_conv(x, w, stride, padding):
    return lax.conv_general_dilated(
        x, w, (stride, stride), [(padding, padding), (padding, padding)],
        dimension_numbers=("NHWC", "HWIO", "NHWC"))


def _ref_bn(x, gamma, beta, eps=_EPS):
    mean = jnp.mean(x, axis=(0, 1, 2), keepdims=True)
    var = jnp.mean((x - mean) ** 2, axis=(0, 1, 2), keepdims=True)
    return (x - mean) * lax.rsqrt(var + eps) * gamma.reshape(1, 1, 1, -1) \
        + beta.reshape(1, 1, 1, -1)


def basic_block_reference(x_nchw, params, *, stride=1):
    x = jnp.transpose(x_nchw, (0, 2, 3, 1))
    r = jax.nn.relu(_ref_bn(_ref_conv(x, params["conv1_w"], stride, 1),
                            params["bn1_gamma"], params["bn1_beta"]))
    r = _ref_bn(_ref_conv(r, params["conv2_w"], 1, 1),
                params["bn2_gamma"], params["bn2_beta"])
    if "ds_conv_w" in params:
        s = _ref_bn(_ref_conv(x, params["ds_conv_w"], stride, 0),
                    params["ds_bn_gamma"], params["ds_bn_beta"])
    else:
        s = x
    return jnp.transpose(jax.nn.relu(s + r), (0, 3, 1, 2))


if __name__ == "__main__":
    key = jax.random.PRNGKey(0)
    kx, kp1, kp2, kx2 = jax.random.split(key, 4)

    fwd = jax.jit(basic_block_forward, static_argnames=("stride", "use_bf16"))

    # Case 1: downsample path (in_chan != out_chan, stride 2).
    in_chan, out_chan, stride = 4, 8, 2
    x = jax.random.normal(kx, (2, in_chan, 16, 16), jnp.float32)
    params = init_basic_block_params(kp1, in_chan, out_chan, stride)
    ref = basic_block_reference(x, params, stride=stride)

    out = jax.block_until_ready(fwd(x, params, stride=stride))        # bf16 MXU path
    assert out.shape == (2, out_chan, 8, 8)
    err = float(jnp.max(jnp.abs(out - ref)))
    assert err < 8e-2, err
    out32 = jax.block_until_ready(fwd(x, params, stride=stride, use_bf16=False))
    err32 = float(jnp.max(jnp.abs(out32 - ref)))
    assert err32 < 2e-3, err32

    # Case 2: identity shortcut (in_chan == out_chan, stride 1).
    params2 = init_basic_block_params(kp2, 8, 8, 1)
    x2 = jax.random.normal(kx2, (2, 8, 16, 16), jnp.float32)
    ref2 = basic_block_reference(x2, params2, stride=1)

    out2 = jax.block_until_ready(fwd(x2, params2, stride=1))          # bf16 MXU path
    assert out2.shape == (2, 8, 16, 16)
    err2 = float(jnp.max(jnp.abs(out2 - ref2)))
    assert err2 < 8e-2, err2
    out2_32 = jax.block_until_ready(fwd(x2, params2, stride=1, use_bf16=False))
    err2_32 = float(jnp.max(jnp.abs(out2_32 - ref2)))
    assert err2_32 < 2e-3, err2_32

    print("KERNEL_OK")
</pallas_src>

<mosaic_0001>
module attributes {stable_mosaic.version = 11 : i64} {
  func.func @_conv1_ds_kernel(%arg0: i32, %arg1: memref<4x9x9x4xf32, #tpu.memory_space<vmem>>, %arg2: memref<36x8xbf16, #tpu.memory_space<vmem>>, %arg3: memref<4x8xbf16, #tpu.memory_space<vmem>>, %arg4: memref<1x8x8x8xbf16, #tpu.memory_space<vmem>>, %arg5: memref<1x8x8x8xbf16, #tpu.memory_space<vmem>>, %arg6: memref<1x2x8xf32, #tpu.memory_space<vmem>>, %arg7: memref<1x2x8xf32, #tpu.memory_space<vmem>>, %arg8: memref<8x8x36xbf16, #tpu.memory_space<vmem>>) attributes {dimension_semantics = [#tpu.dimension_semantics<parallel>], iteration_bounds = array<i64: 2>, scalar_prefetch = 0 : i64, scratch_operands = 1 : i64, tpu.core_type = #tpu.core_type<tc>, window_params = [{transform_indices = @transform_0, window_bounds = array<i64: 4, 9, 9, 4>}, {pipeline_mode = #tpu.pipeline_mode<synchronous>, transform_indices = @transform_1, window_bounds = array<i64: 36, 8>}, {pipeline_mode = #tpu.pipeline_mode<synchronous>, transform_indices = @transform_2, window_bounds = array<i64: 4, 8>}, {transform_indices = @transform_3, window_bounds = array<i64: 1, 8, 8, 8>}, {transform_indices = @transform_4, window_bounds = array<i64: 1, 8, 8, 8>}, {transform_indices = @transform_5, window_bounds = array<i64: 1, 2, 8>}, {transform_indices = @transform_6, window_bounds = array<i64: 1, 2, 8>}]} {
    %cst = arith.constant 0.000000e+00 : f32
    %0 = vector.broadcast %cst : f32 to vector<1x2x8xf32>
    %c0 = arith.constant 0 : index
    %c0_0 = arith.constant 0 : index
    %c0_1 = arith.constant 0 : index
    %1 = vector.load %arg6[%c0, %c0_0, %c0_1] : memref<1x2x8xf32, #tpu.memory_space<vmem>>, vector<1x2x8xf32>
    tpu.vector_store %arg6[%c0, %c0_0, %c0_1], %0 {strides = array<i32>} : memref<1x2x8xf32, #tpu.memory_space<vmem>>, vector<1x2x8xf32>,
    %cst_2 = arith.constant 0.000000e+00 : f32
    %2 = vector.broadcast %cst_2 : f32 to vector<1x2x8xf32>
    %c0_3 = arith.constant 0 : index
    %c0_4 = arith.constant 0 : index
    %c0_5 = arith.constant 0 : index
    %3 = vector.load %arg7[%c0_3, %c0_4, %c0_5] : memref<1x2x8xf32, #tpu.memory_space<vmem>>, vector<1x2x8xf32>
    tpu.vector_store %arg7[%c0_3, %c0_4, %c0_5], %2 {strides = array<i32>} : memref<1x2x8xf32, #tpu.memory_space<vmem>>, vector<1x2x8xf32>,
    %c0_6 = arith.constant 0 : index
    %c0_7 = arith.constant 0 : index
    %c0_8 = arith.constant 0 : index
    %c0_9 = arith.constant 0 : index
    %4 = vector.load %arg1[%c0_6, %c0_7, %c0_8, %c0_9] : memref<4x9x9x4xf32, #tpu.memory_space<vmem>>, vector<1x8x8x4xf32>
    %5 = vector.shape_cast %4 : vector<1x8x8x4xf32> to vector<8x8x4xf32>
    %6 = arith.truncf %5 : vector<8x8x4xf32> to vector<8x8x4xbf16>
    %c0_10 = arith.constant 0 : index
    %c0_11 = arith.constant 0 : index
    %c0_12 = arith.constant 0 : index
    %7 = vector.load %arg8[%c0_10, %c0_11, %c0_12] : memref<8x8x36xbf16, #tpu.memory_space<vmem>>, vector<8x8x4xbf16>
    tpu.vector_store %arg8[%c0_10, %c0_11, %c0_12], %6 {strides = array<i32>} : memref<8x8x36xbf16, #tpu.memory_space<vmem>>, vector<8x8x4xbf16>,
    %c1 = arith.constant 1 : index
    %c0_13 = arith.constant 0 : index
    %c0_14 = arith.constant 0 : index
    %c0_15 = arith.constant 0 : index
    %8 = vector.load %arg1[%c1, %c0_13, %c0_14, %c0_15] : memref<4x9x9x4xf32, #tpu.memory_space<vmem>>, vector<1x8x8x4xf32>
    %9 = vector.shape_cast %8 : vector<1x8x8x4xf32> to vector<8x8x4xf32>
    %10 = arith.truncf %9 : vector<8x8x4xf32> to vector<8x8x4xbf16>
    %c0_16 = arith.constant 0 : index
    %c0_17 = arith.constant 0 : index
    %c4 = arith.constant 4 : index
    %11 = vector.load %arg8[%c0_16, %c0_17, %c4] : memref<8x8x36xbf16, #tpu.memory_space<vmem>>, vector<8x8x4xbf16>
    tpu.vector_store %arg8[%c0_16, %c0_17, %c4], %10 {strides = array<i32>} : memref<8x8x36xbf16, #tpu.memory_space<vmem>>, vector<8x8x4xbf16>,
    %c0_18 = arith.constant 0 : index
    %c0_19 = arith.constant 0 : index
    %c1_20 = arith.constant 1 : index
    %c0_21 = arith.constant 0 : index
    %12 = vector.load %arg1[%c0_18, %c0_19, %c1_20, %c0_21] : memref<4x9x9x4xf32, #tpu.memory_space<vmem>>, vector<1x8x8x4xf32>
    %13 = vector.shape_cast %12 : vector<1x8x8x4xf32> to vector<8x8x4xf32>
    %14 = arith.truncf %13 : vector<8x8x4xf32> to vector<8x8x4xbf16>
    %c0_22 = arith.constant 0 : index
    %c0_23 = arith.constant 0 : index
    %c8 = arith.constant 8 : index
    %15 = vector.load %arg8[%c0_22, %c0_23, %c8] : memref<8x8x36xbf16, #tpu.memory_space<vmem>>, vector<8x8x4xbf16>
    tpu.vector_store %arg8[%c0_22, %c0_23, %c8], %14 {strides = array<i32>} : memref<8x8x36xbf16, #tpu.memory_space<vmem>>, vector<8x8x4xbf16>,
    %c2 = arith.constant 2 : index
    %c0_24 = arith.constant 0 : index
    %c0_25 = arith.constant 0 : index
    %c0_26 = arith.constant 0 : index
    %16 = vector.load %arg1[%c2, %c0_24, %c0_25, %c0_26] : memref<4x9x9x4xf32, #tpu.memory_space<vmem>>, vector<1x8x8x4xf32>
    %17 = vector.shape_cast %16 : vector<1x8x8x4xf32> to vector<8x8x4xf32>
    %18 = arith.truncf %17 : vector<8x8x4xf32> to vector<8x8x4xbf16>
    %c0_27 = arith.constant 0 : index
    %c0_28 = arith.constant 0 : index
    %c12 = arith.constant 12 : index
    %19 = vector.load %arg8[%c0_27, %c0_28, %c12] : memref<8x8x36xbf16, #tpu.memory_space<vmem>>, vector<8x8x4xbf16>
    tpu.vector_store %arg8[%c0_27, %c0_28, %c12], %18 {strides = array<i32>} : memref<8x8x36xbf16, #tpu.memory_space<vmem>>, vector<8x8x4xbf16>,
    %c3 = arith.constant 3 : index
    %c0_29 = arith.constant 0 : index
    %c0_30 = arith.constant 0 : index
    %c0_31 = arith.constant 0 : index
    %20 = vector.load %arg1[%c3, %c0_29, %c0_30, %c0_31] : memref<4x9x9x4xf32, #tpu.memory_space<vmem>>, vector<1x8x8x4xf32>
    %21 = vector.shape_cast %20 : vector<1x8x8x4xf32> to vector<8x8x4xf32>
    %22 = arith.truncf %21 : vector<8x8x4xf32> to vector<8x8x4xbf16>
    %c0_32 = arith.constant 0 : index
    %c0_33 = arith.constant 0 : index
    %c16 = arith.constant 16 : index
    %23 = vector.load %arg8[%c0_32, %c0_33, %c16] : memref<8x8x36xbf16, #tpu.memory_space<vmem>>, vector<8x8x4xbf16>
    tpu.vector_store %arg8[%c0_32, %c0_33, %c16], %22 {strides = array<i32>} : memref<8x8x36xbf16, #tpu.memory_space<vmem>>, vector<8x8x4xbf16>,
    %c2_34 = arith.constant 2 : index
    %c0_35 = arith.constant 0 : index
    %c1_36 = arith.constant 1 : index
    %c0_37 = arith.constant 0 : index
    %24 = vector.load %arg1[%c2_34, %c0_35, %c1_36, %c0_37] : memref<4x9x9x4xf32, #tpu.memory_space<vmem>>, vector<1x8x8x4xf32>
    %25 = vector.shape_cast %24 : vector<1x8x8x4xf32> to vector<8x8x4xf32>
    %26 = arith.truncf %25 : vector<8x8x4xf32> to vector<8x8x4xbf16>
    %c0_38 = arith.constant 0 : index
    %c0_39 = arith.constant 0 : index
    %c20 = arith.constant 20 : index
    %27 = vector.load %arg8[%c0_38, %c0_39, %c20] : memref<8x8x36xbf16, #tpu.memory_space<vmem>>, vector<8x8x4xbf16>
    tpu.vector_store %arg8[%c0_38, %c0_39, %c20], %26 {strides = array<i32>} : memref<8x8x36xbf16, #tpu.memory_space<vmem>>, vector<8x8x4xbf16>,
    %c0_40 = arith.constant 0 : index
    %c1_41 = arith.constant 1 : index
    %c0_42 = arith.constant 0 : index
    %c0_43 = arith.constant 0 : index
    %28 = vector.load %arg1[%c0_40, %c1_41, %c0_42, %c0_43] : memref<4x9x9x4xf32, #tpu.memory_space<vmem>>, vector<1x8x8x4xf32>
    %29 = vector.shape_cast %28 : vector<1x8x8x4xf32> to vector<8x8x4xf32>
    %30 = arith.truncf %29 : vector<8x8x4xf32> to vector<8x8x4xbf16>
    %c0_44 = arith.constant 0 : index
    %c0_45 = arith.constant 0 : index
    %c24 = arith.constant 24 : index
    %31 = vector.load %arg8[%c0_44, %c0_45, %c24] : memref<8x8x36xbf16, #tpu.memory_space<vmem>>, vector<8x8x4xbf16>
    tpu.vector_store %arg8[%c0_44, %c0_45, %c24], %30 {strides = array<i32>} : memref<8x8x36xbf16, #tpu.memory_space<vmem>>, vector<8x8x4xbf16>,
    %c1_46 = arith.constant 1 : index
    %c1_47 = arith.constant 1 : index
    %c0_48 = arith.constant 0 : index
    %c0_49 = arith.constant 0 : index
    %32 = vector.load %arg1[%c1_46, %c1_47, %c0_48, %c0_49] : memref<4x9x9x4xf32, #tpu.memory_space<vmem>>, vector<1x8x8x4xf32>
    %33 = vector.shape_cast %32 : vector<1x8x8x4xf32> to vector<8x8x4xf32>
    %34 = arith.truncf %33 : vector<8x8x4xf32> to vector<8x8x4xbf16>
    %c0_50 = arith.constant 0 : index
    %c0_51 = arith.constant 0 : index
    %c28 = arith.constant 28 : index
    %35 = vector.load %arg8[%c0_50, %c0_51, %c28] : memref<8x8x36xbf16, #tpu.memory_space<vmem>>, vector<8x8x4xbf16>
    tpu.vector_store %arg8[%c0_50, %c0_51, %c28], %34 {strides = array<i32>} : memref<8x8x36xbf16, #tpu.memory_space<vmem>>, vector<8x8x4xbf16>,
    %c0_52 = arith.constant 0 : index
    %c1_53 = arith.constant 1 : index
    %c1_54 = arith.constant 1 : index
    %c0_55 = arith.constant 0 : index
    %36 = vector.load %arg1[%c0_52, %c1_53, %c1_54, %c0_55] : memref<4x9x9x4xf32, #tpu.memory_space<vmem>>, vector<1x8x8x4xf32>
    %37 = vector.shape_cast %36 : vector<1x8x8x4xf32> to vector<8x8x4xf32>
    %38 = arith.truncf %37 : vector<8x8x4xf32> to vector<8x8x4xbf16>
    %c0_56 = arith.constant 0 : index
    %c0_57 = arith.constant 0 : index
    %c32 = arith.constant 32 : index
    %39 = vector.load %arg8[%c0_56, %c0_57, %c32] : memref<8x8x36xbf16, #tpu.memory_space<vmem>>, vector<8x8x4xbf16>
    tpu.vector_store %arg8[%c0_56, %c0_57, %c32], %38 {strides = array<i32>} : memref<8x8x36xbf16, #tpu.memory_space<vmem>>, vector<8x8x4xbf16>,
    %c0_58 = arith.constant 0 : index
    %c0_59 = arith.constant 0 : index
    %c0_60 = arith.constant 0 : index
    %40 = vector.load %arg8[%c0_58, %c0_59, %c0_60] : memref<8x8x36xbf16, #tpu.memory_space<vmem>>, vector<8x8x36xbf16>
    %41 = vector.shape_cast %40 : vector<8x8x36xbf16> to vector<64x36xbf16>
    %c0_61 = arith.constant 0 : index
    %c0_62 = arith.constant 0 : index
    %42 = vector.load %arg2[%c0_61, %c0_62] : memref<36x8xbf16, #tpu.memory_space<vmem>>, vector<36x8xbf16>
    %cst_63 = arith.constant dense<0.000000e+00> : vector<64x8xf32>
    %43 = tpu.matmul %41, %42, %cst_63 {dimension_numbers = #tpu.dot_dimension_numbers<[1], [0], [0], [1], [0, 0, 1, 1], [], []>} : vector<64x36xbf16>, vector<36x8xbf16>, vector<64x8xf32> -> vector<64x8xf32>
    %c0_64 = arith.constant 0 : index
    %c0_65 = arith.constant 0 : index
    %c0_66 = arith.constant 0 : index
    %44 = vector.load %arg6[%c0_64, %c0_65, %c0_66] : memref<1x2x8xf32, #tpu.memory_space<vmem>>, vector<1x1x8xf32>
    %45 = vector.shape_cast %44 : vector<1x1x8xf32> to vector<1x8xf32>
    %cst_67 = arith.constant dense<0.000000e+00> : vector<8xf32>
    %46 = vector.multi_reduction <add>, %43, %cst_67 [0] : vector<64x8xf32> to vector<8xf32>
    %47 = vector.shape_cast %46 : vector<8xf32> to vector<1x8xf32>
    %48 = arith.addf %45, %47 : vector<1x8xf32>
    %c0_68 = arith.constant 0 : index
    %c0_69 = arith.constant 0 : index
    %c0_70 = arith.constant 0 : index
    %49 = vector.load %arg6[%c0_68, %c0_69, %c0_70] : memref<1x2x8xf32, #tpu.memory_space<vmem>>, vector<1x1x8xf32>
    %50 = vector.shape_cast %49 : vector<1x1x8xf32> to vector<1x8xf32>
    %51 = vector.shape_cast %48 : vector<1x8xf32> to vector<1x1x8xf32>
    tpu.vector_store %arg6[%c0_68, %c0_69, %c0_70], %51 {strides = array<i32>} : memref<1x2x8xf32, #tpu.memory_space<vmem>>, vector<1x1x8xf32>,
    %c0_71 = arith.constant 0 : index
    %c1_72 = arith.constant 1 : index
    %c0_73 = arith.constant 0 : index
    %52 = vector.load %arg6[%c0_71, %c1_72, %c0_73] : memref<1x2x8xf32, #tpu.memory_space<vmem>>, vector<1x1x8xf32>
    %53 = vector.shape_cast %52 : vector<1x1x8xf32> to vector<1x8xf32>
    %54 = arith.mulf %43, %43 : vector<64x8xf32>
    %cst_74 = arith.constant dense<0.000000e+00> : vector<8xf32>
    %55 = vector.multi_reduction <add>, %54, %cst_74 [0] : vector<64x8xf32> to vector<8xf32>
    %56 = vector.shape_cast %55 : vector<8xf32> to vector<1x8xf32>
    %57 = arith.addf %53, %56 : vector<1x8xf32>
    %c0_75 = arith.constant 0 : index
    %c1_76 = arith.constant 1 : index
    %c0_77 = arith.constant 0 : index
    %58 = vector.load %arg6[%c0_75, %c1_76, %c0_77] : memref<1x2x8xf32, #tpu.memory_space<vmem>>, vector<1x1x8xf32>
    %59 = vector.shape_cast %58 : vector<1x1x8xf32> to vector<1x8xf32>
    %60 = vector.shape_cast %57 : vector<1x8xf32> to vector<1x1x8xf32>
    tpu.vector_store %arg6[%c0_75, %c1_76, %c0_77], %60 {strides = array<i32>} : memref<1x2x8xf32, #tpu.memory_space<vmem>>, vector<1x1x8xf32>,
    %61 = vector.shape_cast %43 : vector<64x8xf32> to vector<8x8x8xf32>
    %62 = arith.truncf %61 : vector<8x8x8xf32> to vector<8x8x8xbf16>
    %c0_78 = arith.constant 0 : index
    %c0_79 = arith.constant 0 : index
    %c0_80 = arith.constant 0 : index
    %c0_81 = arith.constant 0 : index
    %63 = vector.load %arg4[%c0_78, %c0_79, %c0_80, %c0_81] : memref<1x8x8x8xbf16, #tpu.memory_space<vmem>>, vector<1x8x8x8xbf16>
    %64 = vector.shape_cast %63 : vector<1x8x8x8xbf16> to vector<8x8x8xbf16>
    %65 = vector.shape_cast %62 : vector<8x8x8xbf16> to vector<1x8x8x8xbf16>
    tpu.vector_store %arg4[%c0_78, %c0_79, %c0_80, %c0_81], %65 {strides = array<i32>} : memref<1x8x8x8xbf16, #tpu.memory_space<vmem>>, vector<1x8x8x8xbf16>,
    %c3_82 = arith.constant 3 : index
    %c0_83 = arith.constant 0 : index
    %c0_84 = arith.constant 0 : index
    %c0_85 = arith.constant 0 : index
    %66 = vector.load %arg1[%c3_82, %c0_83, %c0_84, %c0_85] : memref<4x9x9x4xf32, #tpu.memory_space<vmem>>, vector<1x8x8x4xf32>
    %67 = vector.shape_cast %66 : vector<1x8x8x4xf32> to vector<8x8x4xf32>
    %68 = arith.truncf %67 : vector<8x8x4xf32> to vector<8x8x4xbf16>
    %69 = vector.shape_cast %68 : vector<8x8x4xbf16> to vector<64x4xbf16>
    %c0_86 = arith.constant 0 : index
    %c0_87 = arith.constant 0 : index
    %70 = vector.load %arg3[%c0_86, %c0_87] : memref<4x8xbf16, #tpu.memory_space<vmem>>, vector<4x8xbf16>
    %cst_88 = arith.constant dense<0.000000e+00> : vector<64x8xf32>
    %71 = tpu.matmul %69, %70, %cst_88 {dimension_numbers = #tpu.dot_dimension_numbers<[1], [0], [0], [1], [0, 0, 1, 1], [], []>} : vector<64x4xbf16>, vector<4x8xbf16>, vector<64x8xf32> -> vector<64x8xf32>
    %c0_89 = arith.constant 0 : index
    %c0_90 = arith.constant 0 : index
    %c0_91 = arith.constant 0 : index
    %72 = vector.load %arg7[%c0_89, %c0_90, %c0_91] : memref<1x2x8xf32, #tpu.memory_space<vmem>>, vector<1x1x8xf32>
    %73 = vector.shape_cast %72 : vector<1x1x8xf32> to vector<1x8xf32>
    %cst_92 = arith.constant dense<0.000000e+00> : vector<8xf32>
    %74 = vector.multi_reduction <add>, %71, %cst_92 [0] : vector<64x8xf32> to vector<8xf32>
    %75 = vector.shape_cast %74 : vector<8xf32> to vector<1x8xf32>
    %76 = arith.addf %73, %75 : vector<1x8xf32>
    %c0_93 = arith.constant 0 : index
    %c0_94 = arith.constant 0 : index
    %c0_95 = arith.constant 0 : index
    %77 = vector.load %arg7[%c0_93, %c0_94, %c0_95] : memref<1x2x8xf32, #tpu.memory_space<vmem>>, vector<1x1x8xf32>
    %78 = vector.shape_cast %77 : vector<1x1x8xf32> to vector<1x8xf32>
    %79 = vector.shape_cast %76 : vector<1x8xf32> to vector<1x1x8xf32>
    tpu.vector_store %arg7[%c0_93, %c0_94, %c0_95], %79 {strides = array<i32>} : memref<1x2x8xf32, #tpu.memory_space<vmem>>, vector<1x1x8xf32>,
    %c0_96 = arith.constant 0 : index
    %c1_97 = arith.constant 1 : index
    %c0_98 = arith.constant 0 : index
    %80 = vector.load %arg7[%c0_96, %c1_97, %c0_98] : memref<1x2x8xf32, #tpu.memory_space<vmem>>, vector<1x1x8xf32>
    %81 = vector.shape_cast %80 : vector<1x1x8xf32> to vector<1x8xf32>
    %82 = arith.mulf %71, %71 : vector<64x8xf32>
    %cst_99 = arith.constant dense<0.000000e+00> : vector<8xf32>
    %83 = vector.multi_reduction <add>, %82, %cst_99 [0] : vector<64x8xf32> to vector<8xf32>
    %84 = vector.shape_cast %83 : vector<8xf32> to vector<1x8xf32>
    %85 = arith.addf %81, %84 : vector<1x8xf32>
    %c0_100 = arith.constant 0 : index
    %c1_101 = arith.constant 1 : index
    %c0_102 = arith.constant 0 : index
    %86 = vector.load %arg7[%c0_100, %c1_101, %c0_102] : memref<1x2x8xf32, #tpu.memory_space<vmem>>, vector<1x1x8xf32>
    %87 = vector.shape_cast %86 : vector<1x1x8xf32> to vector<1x8xf32>
    %88 = vector.shape_cast %85 : vector<1x8xf32> to vector<1x1x8xf32>
    tpu.vector_store %arg7[%c0_100, %c1_101, %c0_102], %88 {strides = array<i32>} : memref<1x2x8xf32, #tpu.memory_space<vmem>>, vector<1x1x8xf32>,
    %89 = vector.shape_cast %71 : vector<64x8xf32> to vector<8x8x8xf32>
    %90 = arith.truncf %89 : vector<8x8x8xf32> to vector<8x8x8xbf16>
    %c0_103 = arith.constant 0 : index
    %c0_104 = arith.constant 0 : index
    %c0_105 = arith.constant 0 : index
    %c0_106 = arith.constant 0 : index
    %91 = vector.load %arg5[%c0_103, %c0_104, %c0_105, %c0_106] : memref<1x8x8x8xbf16, #tpu.memory_space<vmem>>, vector<1x8x8x8xbf16>
    %92 = vector.shape_cast %91 : vector<1x8x8x8xbf16> to vector<8x8x8xbf16>
    %93 = vector.shape_cast %90 : vector<8x8x8xbf16> to vector<1x8x8x8xbf16>
    tpu.vector_store %arg5[%c0_103, %c0_104, %c0_105, %c0_106], %93 {strides = array<i32>} : memref<1x8x8x8xbf16, #tpu.memory_space<vmem>>, vector<1x8x8x8xbf16>,
    return
  }
  func.func @transform_0(%arg0: i32) -> (i32, i32, i32, i32) {
    %c0_i32 = arith.constant 0 : i32
    %c0_i32_0 = arith.constant 0 : i32
    %c0_i32_1 = arith.constant 0 : i32
    %c0_i32_2 = arith.constant 0 : i32
    return %arg0, %c0_i32, %c0_i32_0, %c0_i32_1 : i32, i32, i32, i32
  }
  func.func @transform_1(%arg0: i32) -> (i32, i32) {
    %c0_i32 = arith.constant 0 : i32
    %c0_i32_0 = arith.constant 0 : i32
    %c0_i32_1 = arith.constant 0 : i32
    return %c0_i32, %c0_i32_0 : i32, i32
  }
  func.func @transform_2(%arg0: i32) -> (i32, i32) {
    %c0_i32 = arith.constant 0 : i32
    %c0_i32_0 = arith.constant 0 : i32
    %c0_i32_1 = arith.constant 0 : i32
    return %c0_i32, %c0_i32_0 : i32, i32
  }
  func.func @transform_3(%arg0: i32) -> (i32, i32, i32, i32) {
    %c0_i32 = arith.constant 0 : i32
    %c0_i32_0 = arith.constant 0 : i32
    %c0_i32_1 = arith.constant 0 : i32
    %c0_i32_2 = arith.constant 0 : i32
    return %arg0, %c0_i32, %c0_i32_0, %c0_i32_1 : i32, i32, i32, i32
  }
  func.func @transform_4(%arg0: i32) -> (i32, i32, i32, i32) {
    %c0_i32 = arith.constant 0 : i32
    %c0_i32_0 = arith.constant 0 : i32
    %c0_i32_1 = arith.constant 0 : i32
    %c0_i32_2 = arith.constant 0 : i32
    return %arg0, %c0_i32, %c0_i32_0, %c0_i32_1 : i32, i32, i32, i32
  }
  func.func @transform_5(%arg0: i32) -> (i32, i32, i32) {
    %c0_i32 = arith.constant 0 : i32
    %c0_i32_0 = arith.constant 0 : i32
    %c0_i32_1 = arith.constant 0 : i32
    return %arg0, %c0_i32, %c0_i32_0 : i32, i32, i32
  }
  func.func @transform_6(%arg0: i32) -> (i32, i32, i32) {
    %c0_i32 = arith.constant 0 : i32
    %c0_i32_0 = arith.constant 0 : i32
    %c0_i32_1 = arith.constant 0 : i32
    return %arg0, %c0_i32, %c0_i32_0 : i32, i32, i32
  }
}

module attributes {stable_mosaic.version = 11 : i64} {
  func.func @_conv2_kernel(%arg0: i32, %arg1: memref<1x8x8x8xbf16, #tpu.memory_space<vmem>>, %arg2: memref<72x8xbf16, #tpu.memory_space<vmem>>, %arg3: memref<1x8xf32, #tpu.memory_space<vmem>>, %arg4: memref<1x8xf32, #tpu.memory_space<vmem>>, %arg5: memref<1x8x8x8xbf16, #tpu.memory_space<vmem>>, %arg6: memref<1x2x8xf32, #tpu.memory_space<vmem>>, %arg7: memref<10x10x8xbf16, #tpu.memory_space<vmem>>, %arg8: memref<8x8x72xbf16, #tpu.memory_space<vmem>>) attributes {dimension_semantics = [#tpu.dimension_semantics<parallel>], iteration_bounds = array<i64: 2>, scalar_prefetch = 0 : i64, scratch_operands = 2 : i64, tpu.core_type = #tpu.core_type<tc>, window_params = [{transform_indices = @transform_0, window_bounds = array<i64: 1, 8, 8, 8>}, {pipeline_mode = #tpu.pipeline_mode<synchronous>, transform_indices = @transform_1, window_bounds = array<i64: 72, 8>}, {pipeline_mode = #tpu.pipeline_mode<synchronous>, transform_indices = @transform_2, window_bounds = array<i64: 1, 8>}, {pipeline_mode = #tpu.pipeline_mode<synchronous>, transform_indices = @transform_3, window_bounds = array<i64: 1, 8>}, {transform_indices = @transform_4, window_bounds = array<i64: 1, 8, 8, 8>}, {transform_indices = @transform_5, window_bounds = array<i64: 1, 2, 8>}]} {
    %cst = arith.constant 0.000000e+00 : bf16
    %0 = vector.broadcast %cst : bf16 to vector<1x10x8xbf16>
    %cst_0 = arith.constant 0.000000e+00 : bf16
    %1 = vector.broadcast %cst_0 : bf16 to vector<10x1x8xbf16>
    %c0 = arith.constant 0 : index
    %c0_1 = arith.constant 0 : index
    %c0_2 = arith.constant 0 : index
    %2 = vector.load %arg7[%c0, %c0_1, %c0_2] : memref<10x10x8xbf16, #tpu.memory_space<vmem>>, vector<1x10x8xbf16>
    tpu.vector_store %arg7[%c0, %c0_1, %c0_2], %0 {strides = array<i32>} : memref<10x10x8xbf16, #tpu.memory_space<vmem>>, vector<1x10x8xbf16>,
    %c9 = arith.constant 9 : index
    %c0_3 = arith.constant 0 : index
    %c0_4 = arith.constant 0 : index
    %3 = vector.load %arg7[%c9, %c0_3, %c0_4] : memref<10x10x8xbf16, #tpu.memory_space<vmem>>, vector<1x10x8xbf16>
    tpu.vector_store %arg7[%c9, %c0_3, %c0_4], %0 {strides = array<i32>} : memref<10x10x8xbf16, #tpu.memory_space<vmem>>, vector<1x10x8xbf16>,
    %c0_5 = arith.constant 0 : index
    %c0_6 = arith.constant 0 : index
    %c0_7 = arith.constant 0 : index
    %4 = vector.load %arg7[%c0_5, %c0_6, %c0_7] : memref<10x10x8xbf16, #tpu.memory_space<vmem>>, vector<10x1x8xbf16>
    tpu.vector_store %arg7[%c0_5, %c0_6, %c0_7], %1 {strides = array<i32>} : memref<10x10x8xbf16, #tpu.memory_space<vmem>>, vector<10x1x8xbf16>,
    %c0_8 = arith.constant 0 : index
    %c9_9 = arith.constant 9 : index
    %c0_10 = arith.constant 0 : index
    %5 = vector.load %arg7[%c0_8, %c9_9, %c0_10] : memref<10x10x8xbf16, #tpu.memory_space<vmem>>, vector<10x1x8xbf16>
    tpu.vector_store %arg7[%c0_8, %c9_9, %c0_10], %1 {strides = array<i32>} : memref<10x10x8xbf16, #tpu.memory_space<vmem>>, vector<10x1x8xbf16>,
    %c0_11 = arith.constant 0 : index
    %c0_12 = arith.constant 0 : index
    %c0_13 = arith.constant 0 : index
    %c0_14 = arith.constant 0 : index
    %6 = vector.load %arg1[%c0_11, %c0_12, %c0_13, %c0_14] : memref<1x8x8x8xbf16, #tpu.memory_space<vmem>>, vector<1x8x8x8xbf16>
    %7 = vector.shape_cast %6 : vector<1x8x8x8xbf16> to vector<8x8x8xbf16>
    %8 = arith.extf %7 : vector<8x8x8xbf16> to vector<8x8x8xf32>
    %c0_15 = arith.constant 0 : index
    %c0_16 = arith.constant 0 : index
    %9 = vector.load %arg3[%c0_15, %c0_16] : memref<1x8xf32, #tpu.memory_space<vmem>>, vector<1x8xf32>
    %10 = vector.shape_cast %9 : vector<1x8xf32> to vector<1x1x8xf32>
    %11 = vector.broadcast %10 : vector<1x1x8xf32> to vector<8x8x8xf32>
    %12 = arith.mulf %8, %11 : vector<8x8x8xf32>
    %c0_17 = arith.constant 0 : index
    %c0_18 = arith.constant 0 : index
    %13 = vector.load %arg4[%c0_17, %c0_18] : memref<1x8xf32, #tpu.memory_space<vmem>>, vector<1x8xf32>
    %14 = vector.shape_cast %13 : vector<1x8xf32> to vector<1x1x8xf32>
    %15 = vector.broadcast %14 : vector<1x1x8xf32> to vector<8x8x8xf32>
    %16 = arith.addf %12, %15 : vector<8x8x8xf32>
    %cst_19 = arith.constant 0.000000e+00 : f32
    %17 = vector.broadcast %cst_19 : f32 to vector<8x8x8xf32>
    %18 = arith.maximumf %16, %17 : vector<8x8x8xf32>
    %19 = arith.truncf %18 : vector<8x8x8xf32> to vector<8x8x8xbf16>
    %c1 = arith.constant 1 : index
    %c1_20 = arith.constant 1 : index
    %c0_21 = arith.constant 0 : index
    %20 = vector.load %arg7[%c1, %c1_20, %c0_21] : memref<10x10x8xbf16, #tpu.memory_space<vmem>>, vector<8x8x8xbf16>
    tpu.vector_store %arg7[%c1, %c1_20, %c0_21], %19 {strides = array<i32>} : memref<10x10x8xbf16, #tpu.memory_space<vmem>>, vector<8x8x8xbf16>,
    %cst_22 = arith.constant 0.000000e+00 : f32
    %21 = vector.broadcast %cst_22 : f32 to vector<1x2x8xf32>
    %c0_23 = arith.constant 0 : index
    %c0_24 = arith.constant 0 : index
    %c0_25 = arith.constant 0 : index
    %22 = vector.load %arg6[%c0_23, %c0_24, %c0_25] : memref<1x2x8xf32, #tpu.memory_space<vmem>>, vector<1x2x8xf32>
    tpu.vector_store %arg6[%c0_23, %c0_24, %c0_25], %21 {strides = array<i32>} : memref<1x2x8xf32, #tpu.memory_space<vmem>>, vector<1x2x8xf32>,
    %c0_26 = arith.constant 0 : index
    %c0_27 = arith.constant 0 : index
    %c0_28 = arith.constant 0 : index
    %23 = vector.load %arg7[%c0_26, %c0_27, %c0_28] : memref<10x10x8xbf16, #tpu.memory_space<vmem>>, vector<8x8x8xbf16>
    %c0_29 = arith.constant 0 : index
    %c0_30 = arith.constant 0 : index
    %c0_31 = arith.constant 0 : index
    %24 = vector.load %arg8[%c0_29, %c0_30, %c0_31] : memref<8x8x72xbf16, #tpu.memory_space<vmem>>, vector<8x8x8xbf16>
    tpu.vector_store %arg8[%c0_29, %c0_30, %c0_31], %23 {strides = array<i32>} : memref<8x8x72xbf16, #tpu.memory_space<vmem>>, vector<8x8x8xbf16>,
    %c0_32 = arith.constant 0 : index
    %c1_33 = arith.constant 1 : index
    %c0_34 = arith.constant 0 : index
    %25 = vector.load %arg7[%c0_32, %c1_33, %c0_34] : memref<10x10x8xbf16, #tpu.memory_space<vmem>>, vector<8x8x8xbf16>
    %c0_35 = arith.constant 0 : index
    %c0_36 = arith.constant 0 : index
    %c8 = arith.constant 8 : index
    %26 = vector.load %arg8[%c0_35, %c0_36, %c8] : memref<8x8x72xbf16, #tpu.memory_space<vmem>>, vector<8x8x8xbf16>
    tpu.vector_store %arg8[%c0_35, %c0_36, %c8], %25 {strides = array<i32>} : memref<8x8x72xbf16, #tpu.memory_space<vmem>>, vector<8x8x8xbf16>,
    %c0_37 = arith.constant 0 : index
    %c2 = arith.constant 2 : index
    %c0_38 = arith.constant 0 : index
    %27 = vector.load %arg7[%c0_37, %c2, %c0_38] : memref<10x10x8xbf16, #tpu.memory_space<vmem>>, vector<8x8x8xbf16>
    %c0_39 = arith.constant 0 : index
    %c0_40 = arith.constant 0 : index
    %c16 = arith.constant 16 : index
    %28 = vector.load %arg8[%c0_39, %c0_40, %c16] : memref<8x8x72xbf16, #tpu.memory_space<vmem>>, vector<8x8x8xbf16>
    tpu.vector_store %arg8[%c0_39, %c0_40, %c16], %27 {strides = array<i32>} : memref<8x8x72xbf16, #tpu.memory_space<vmem>>, vector<8x8x8xbf16>,
    %c1_41 = arith.constant 1 : index
    %c0_42 = arith.constant 0 : index
    %c0_43 = arith.constant 0 : index
    %29 = vector.load %arg7[%c1_41, %c0_42, %c0_43] : memref<10x10x8xbf16, #tpu.memory_space<vmem>>, vector<8x8x8xbf16>
    %c0_44 = arith.constant 0 : index
    %c0_45 = arith.constant 0 : index
    %c24 = arith.constant 24 : index
    %30 = vector.load %arg8[%c0_44, %c0_45, %c24] : memref<8x8x72xbf16, #tpu.memory_space<vmem>>, vector<8x8x8xbf16>
    tpu.vector_store %arg8[%c0_44, %c0_45, %c24], %29 {strides = array<i32>} : memref<8x8x72xbf16, #tpu.memory_space<vmem>>, vector<8x8x8xbf16>,
    %c1_46 = arith.constant 1 : index
    %c1_47 = arith.constant 1 : index
    %c0_48 = arith.constant 0 : index
    %31 = vector.load %arg7[%c1_46, %c1_47, %c0_48] : memref<10x10x8xbf16, #tpu.memory_space<vmem>>, vector<8x8x8xbf16>
    %c0_49 = arith.constant 0 : index
    %c0_50 = arith.constant 0 : index
    %c32 = arith.constant 32 : index
    %32 = vector.load %arg8[%c0_49, %c0_50, %c32] : memref<8x8x72xbf16, #tpu.memory_space<vmem>>, vector<8x8x8xbf16>
    tpu.vector_store %arg8[%c0_49, %c0_50, %c32], %31 {strides = array<i32>} : memref<8x8x72xbf16, #tpu.memory_space<vmem>>, vector<8x8x8xbf16>,
    %c1_51 = arith.constant 1 : index
    %c2_52 = arith.constant 2 : index
    %c0_53 = arith.constant 0 : index
    %33 = vector.load %arg7[%c1_51, %c2_52, %c0_53] : memref<10x10x8xbf16, #tpu.memory_space<vmem>>, vector<8x8x8xbf16>
    %c0_54 = arith.constant 0 : index
    %c0_55 = arith.constant 0 : index
    %c40 = arith.constant 40 : index
    %34 = vector.load %arg8[%c0_54, %c0_55, %c40] : memref<8x8x72xbf16, #tpu.memory_space<vmem>>, vector<8x8x8xbf16>
    tpu.vector_store %arg8[%c0_54, %c0_55, %c40], %33 {strides = array<i32>} : memref<8x8x72xbf16, #tpu.memory_space<vmem>>, vector<8x8x8xbf16>,
    %c2_56 = arith.constant 2 : index
    %c0_57 = arith.constant 0 : index
    %c0_58 = arith.constant 0 : index
    %35 = vector.load %arg7[%c2_56, %c0_57, %c0_58] : memref<10x10x8xbf16, #tpu.memory_space<vmem>>, vector<8x8x8xbf16>
    %c0_59 = arith.constant 0 : index
    %c0_60 = arith.constant 0 : index
    %c48 = arith.constant 48 : index
    %36 = vector.load %arg8[%c0_59, %c0_60, %c48] : memref<8x8x72xbf16, #tpu.memory_space<vmem>>, vector<8x8x8xbf16>
    tpu.vector_store %arg8[%c0_59, %c0_60, %c48], %35 {strides = array<i32>} : memref<8x8x72xbf16, #tpu.memory_space<vmem>>, vector<8x8x8xbf16>,
    %c2_61 = arith.constant 2 : index
    %c1_62 = arith.constant 1 : index
    %c0_63 = arith.constant 0 : index
    %37 = vector.load %arg7[%c2_61, %c1_62, %c0_63] : memref<10x10x8xbf16, #tpu.memory_space<vmem>>, vector<8x8x8xbf16>
    %c0_64 = arith.constant 0 : index
    %c0_65 = arith.constant 0 : index
    %c56 = arith.constant 56 : index
    %38 = vector.load %arg8[%c0_64, %c0_65, %c56] : memref<8x8x72xbf16, #tpu.memory_space<vmem>>, vector<8x8x8xbf16>
    tpu.vector_store %arg8[%c0_64, %c0_65, %c56], %37 {strides = array<i32>} : memref<8x8x72xbf16, #tpu.memory_space<vmem>>, vector<8x8x8xbf16>,
    %c2_66 = arith.constant 2 : index
    %c2_67 = arith.constant 2 : index
    %c0_68 = arith.constant 0 : index
    %39 = vector.load %arg7[%c2_66, %c2_67, %c0_68] : memref<10x10x8xbf16, #tpu.memory_space<vmem>>, vector<8x8x8xbf16>
    %c0_69 = arith.constant 0 : index
    %c0_70 = arith.constant 0 : index
    %c64 = arith.constant 64 : index
    %40 = vector.load %arg8[%c0_69, %c0_70, %c64] : memref<8x8x72xbf16, #tpu.memory_space<vmem>>, vector<8x8x8xbf16>
    tpu.vector_store %arg8[%c0_69, %c0_70, %c64], %39 {strides = array<i32>} : memref<8x8x72xbf16, #tpu.memory_space<vmem>>, vector<8x8x8xbf16>,
    %c0_71 = arith.constant 0 : index
    %c0_72 = arith.constant 0 : index
    %c0_73 = arith.constant 0 : index
    %41 = vector.load %arg8[%c0_71, %c0_72, %c0_73] : memref<8x8x72xbf16, #tpu.memory_space<vmem>>, vector<8x8x72xbf16>
    %42 = vector.shape_cast %41 : vector<8x8x72xbf16> to vector<64x72xbf16>
    %c0_74 = arith.constant 0 : index
    %c0_75 = arith.constant 0 : index
    %43 = vector.load %arg2[%c0_74, %c0_75] : memref<72x8xbf16, #tpu.memory_space<vmem>>, vector<72x8xbf16>
    %cst_76 = arith.constant dense<0.000000e+00> : vector<64x8xf32>
    %44 = tpu.matmul %42, %43, %cst_76 {dimension_numbers = #tpu.dot_dimension_numbers<[1], [0], [0], [1], [0, 0, 1, 1], [], []>} : vector<64x72xbf16>, vector<72x8xbf16>, vector<64x8xf32> -> vector<64x8xf32>
    %c0_77 = arith.constant 0 : index
    %c0_78 = arith.constant 0 : index
    %c0_79 = arith.constant 0 : index
    %45 = vector.load %arg6[%c0_77, %c0_78, %c0_79] : memref<1x2x8xf32, #tpu.memory_space<vmem>>, vector<1x1x8xf32>
    %46 = vector.shape_cast %45 : vector<1x1x8xf32> to vector<1x8xf32>
    %cst_80 = arith.constant dense<0.000000e+00> : vector<8xf32>
    %47 = vector.multi_reduction <add>, %44, %cst_80 [0] : vector<64x8xf32> to vector<8xf32>
    %48 = vector.shape_cast %47 : vector<8xf32> to vector<1x8xf32>
    %49 = arith.addf %46, %48 : vector<1x8xf32>
    %c0_81 = arith.constant 0 : index
    %c0_82 = arith.constant 0 : index
    %c0_83 = arith.constant 0 : index
    %50 = vector.load %arg6[%c0_81, %c0_82, %c0_83] : memref<1x2x8xf32, #tpu.memory_space<vmem>>, vector<1x1x8xf32>
    %51 = vector.shape_cast %50 : vector<1x1x8xf32> to vector<1x8xf32>
    %52 = vector.shape_cast %49 : vector<1x8xf32> to vector<1x1x8xf32>
    tpu.vector_store %arg6[%c0_81, %c0_82, %c0_83], %52 {strides = array<i32>} : memref<1x2x8xf32, #tpu.memory_space<vmem>>, vector<1x1x8xf32>,
    %c0_84 = arith.constant 0 : index
    %c1_85 = arith.constant 1 : index
    %c0_86 = arith.constant 0 : index
    %53 = vector.load %arg6[%c0_84, %c1_85, %c0_86] : memref<1x2x8xf32, #tpu.memory_space<vmem>>, vector<1x1x8xf32>
    %54 = vector.shape_cast %53 : vector<1x1x8xf32> to vector<1x8xf32>
    %55 = arith.mulf %44, %44 : vector<64x8xf32>
    %cst_87 = arith.constant dense<0.000000e+00> : vector<8xf32>
    %56 = vector.multi_reduction <add>, %55, %cst_87 [0] : vector<64x8xf32> to vector<8xf32>
    %57 = vector.shape_cast %56 : vector<8xf32> to vector<1x8xf32>
    %58 = arith.addf %54, %57 : vector<1x8xf32>
    %c0_88 = arith.constant 0 : index
    %c1_89 = arith.constant 1 : index
    %c0_90 = arith.constant 0 : index
    %59 = vector.load %arg6[%c0_88, %c1_89, %c0_90] : memref<1x2x8xf32, #tpu.memory_space<vmem>>, vector<1x1x8xf32>
    %60 = vector.shape_cast %59 : vector<1x1x8xf32> to vector<1x8xf32>
    %61 = vector.shape_cast %58 : vector<1x8xf32> to vector<1x1x8xf32>
    tpu.vector_store %arg6[%c0_88, %c1_89, %c0_90], %61 {strides = array<i32>} : memref<1x2x8xf32, #tpu.memory_space<vmem>>, vector<1x1x8xf32>,
    %62 = vector.shape_cast %44 : vector<64x8xf32> to vector<8x8x8xf32>
    %63 = arith.truncf %62 : vector<8x8x8xf32> to vector<8x8x8xbf16>
    %c0_91 = arith.constant 0 : index
    %c0_92 = arith.constant 0 : index
    %c0_93 = arith.constant 0 : index
    %c0_94 = arith.constant 0 : index
    %64 = vector.load %arg5[%c0_91, %c0_92, %c0_93, %c0_94] : memref<1x8x8x8xbf16, #tpu.memory_space<vmem>>, vector<1x8x8x8xbf16>
    %65 = vector.shape_cast %64 : vector<1x8x8x8xbf16> to vector<8x8x8xbf16>
    %66 = vector.shape_cast %63 : vector<8x8x8xbf16> to vector<1x8x8x8xbf16>
    tpu.vector_store %arg5[%c0_91, %c0_92, %c0_93, %c0_94], %66 {strides = array<i32>} : memref<1x8x8x8xbf16, #tpu.memory_space<vmem>>, vector<1x8x8x8xbf16>,
    return
  }
  func.func @transform_0(%arg0: i32) -> (i32, i32, i32, i32) {
    %c0_i32 = arith.constant 0 : i32
    %c0_i32_0 = arith.constant 0 : i32
    %c0_i32_1 = arith.constant 0 : i32
    %c0_i32_2 = arith.constant 0 : i32
    return %arg0, %c0_i32, %c0_i32_0, %c0_i32_1 : i32, i32, i32, i32
  }
  func.func @transform_1(%arg0: i32) -> (i32, i32) {
    %c0_i32 = arith.constant 0 : i32
    %c0_i32_0 = arith.constant 0 : i32
    %c0_i32_1 = arith.constant 0 : i32
    return %c0_i32, %c0_i32_0 : i32, i32
  }
  func.func @transform_2(%arg0: i32) -> (i32, i32) {
    %c0_i32 = arith.constant 0 : i32
    %c0_i32_0 = arith.constant 0 : i32
    %c0_i32_1 = arith.constant 0 : i32
    return %c0_i32, %c0_i32_0 : i32, i32
  }
  func.func @transform_3(%arg0: i32) -> (i32, i32) {
    %c0_i32 = arith.constant 0 : i32
    %c0_i32_0 = arith.constant 0 : i32
    %c0_i32_1 = arith.constant 0 : i32
    return %c0_i32, %c0_i32_0 : i32, i32
  }
  func.func @transform_4(%arg0: i32) -> (i32, i32, i32, i32) {
    %c0_i32 = arith.constant 0 : i32
    %c0_i32_0 = arith.constant 0 : i32
    %c0_i32_1 = arith.constant 0 : i32
    %c0_i32_2 = arith.constant 0 : i32
    return %arg0, %c0_i32, %c0_i32_0, %c0_i32_1 : i32, i32, i32, i32
  }
  func.func @transform_5(%arg0: i32) -> (i32, i32, i32) {
    %c0_i32 = arith.constant 0 : i32
    %c0_i32_0 = arith.constant 0 : i32
    %c0_i32_1 = arith.constant 0 : i32
    return %arg0, %c0_i32, %c0_i32_0 : i32, i32, i32
  }
}

module attributes {stable_mosaic.version = 11 : i64} {
  func.func @_bn_add_relu_kernel(%arg0: i32, %arg1: i32, %arg2: memref<1x8x64xbf16, #tpu.memory_space<vmem>>, %arg3: memref<1x8x64xbf16, #tpu.memory_space<vmem>>, %arg4: memref<1x64xf32, #tpu.memory_space<vmem>>, %arg5: memref<1x64xf32, #tpu.memory_space<vmem>>, %arg6: memref<1x64xf32, #tpu.memory_space<vmem>>, %arg7: memref<1x64xf32, #tpu.memory_space<vmem>>, %arg8: memref<1x8x64xf32, #tpu.memory_space<vmem>>) attributes {dimension_semantics = [#tpu.dimension_semantics<parallel>, #tpu.dimension_semantics<parallel>], iteration_bounds = array<i64: 2, 1>, scalar_prefetch = 0 : i64, scratch_operands = 0 : i64, tpu.core_type = #tpu.core_type<tc>, window_params = [{transform_indices = @transform_0, window_bounds = array<i64: 1, 8, 64>}, {transform_indices = @transform_1, window_bounds = array<i64: 1, 8, 64>}, {pipeline_mode = #tpu.pipeline_mode<synchronous>, transform_indices = @transform_2, window_bounds = array<i64: 1, 64>}, {pipeline_mode = #tpu.pipeline_mode<synchronous>, transform_indices = @transform_3, window_bounds = array<i64: 1, 64>}, {pipeline_mode = #tpu.pipeline_mode<synchronous>, transform_indices = @transform_4, window_bounds = array<i64: 1, 64>}, {pipeline_mode = #tpu.pipeline_mode<synchronous>, transform_indices = @transform_5, window_bounds = array<i64: 1, 64>}, {transform_indices = @transform_6, window_bounds = array<i64: 1, 8, 64>}]} {
    %c0 = arith.constant 0 : index
    %c0_0 = arith.constant 0 : index
    %c0_1 = arith.constant 0 : index
    %0 = vector.load %arg2[%c0, %c0_0, %c0_1] : memref<1x8x64xbf16, #tpu.memory_space<vmem>>, vector<1x8x64xbf16>
    %1 = vector.shape_cast %0 : vector<1x8x64xbf16> to vector<8x64xbf16>
    %2 = arith.extf %1 : vector<8x64xbf16> to vector<8x64xf32>
    %c0_2 = arith.constant 0 : index
    %c0_3 = arith.constant 0 : index
    %3 = vector.load %arg4[%c0_2, %c0_3] : memref<1x64xf32, #tpu.memory_space<vmem>>, vector<1x64xf32>
    %4 = vector.broadcast %3 : vector<1x64xf32> to vector<8x64xf32>
    %5 = arith.mulf %2, %4 : vector<8x64xf32>
    %c0_4 = arith.constant 0 : index
    %c0_5 = arith.constant 0 : index
    %6 = vector.load %arg5[%c0_4, %c0_5] : memref<1x64xf32, #tpu.memory_space<vmem>>, vector<1x64xf32>
    %7 = vector.broadcast %6 : vector<1x64xf32> to vector<8x64xf32>
    %8 = arith.addf %5, %7 : vector<8x64xf32>
    %c0_6 = arith.constant 0 : index
    %c0_7 = arith.constant 0 : index
    %c0_8 = arith.constant 0 : index
    %9 = vector.load %arg3[%c0_6, %c0_7, %c0_8] : memref<1x8x64xbf16, #tpu.memory_space<vmem>>, vector<1x8x64xbf16>
    %10 = vector.shape_cast %9 : vector<1x8x64xbf16> to vector<8x64xbf16>
    %11 = arith.extf %10 : vector<8x64xbf16> to vector<8x64xf32>
    %c0_9 = arith.constant 0 : index
    %c0_10 = arith.constant 0 : index
    %12 = vector.load %arg6[%c0_9, %c0_10] : memref<1x64xf32, #tpu.memory_space<vmem>>, vector<1x64xf32>
    %13 = vector.broadcast %12 : vector<1x64xf32> to vector<8x64xf32>
    %14 = arith.mulf %11, %13 : vector<8x64xf32>
    %c0_11 = arith.constant 0 : index
    %c0_12 = arith.constant 0 : index
    %15 = vector.load %arg7[%c0_11, %c0_12] : memref<1x64xf32, #tpu.memory_space<vmem>>, vector<1x64xf32>
    %16 = vector.broadcast %15 : vector<1x64xf32> to vector<8x64xf32>
    %17 = arith.addf %14, %16 : vector<8x64xf32>
    %18 = arith.addf %8, %17 : vector<8x64xf32>
    %cst = arith.constant 0.000000e+00 : f32
    %19 = vector.broadcast %cst : f32 to vector<8x64xf32>
    %20 = arith.maximumf %18, %19 : vector<8x64xf32>
    %c0_13 = arith.constant 0 : index
    %c0_14 = arith.constant 0 : index
    %c0_15 = arith.constant 0 : index
    %21 = vector.load %arg8[%c0_13, %c0_14, %c0_15] : memref<1x8x64xf32, #tpu.memory_space<vmem>>, vector<1x8x64xf32>
    %22 = vector.shape_cast %21 : vector<1x8x64xf32> to vector<8x64xf32>
    %23 = vector.shape_cast %20 : vector<8x64xf32> to vector<1x8x64xf32>
    tpu.vector_store %arg8[%c0_13, %c0_14, %c0_15], %23 {strides = array<i32>} : memref<1x8x64xf32, #tpu.memory_space<vmem>>, vector<1x8x64xf32>,
    return
  }
  func.func @transform_0(%arg0: i32, %arg1: i32) -> (i32, i32, i32) {
    %c0_i32 = arith.constant 0 : i32
    %c0_i32_0 = arith.constant 0 : i32
    return %arg0, %arg1, %c0_i32 : i32, i32, i32
  }
  func.func @transform_1(%arg0: i32, %arg1: i32) -> (i32, i32, i32) {
    %c0_i32 = arith.constant 0 : i32
    %c0_i32_0 = arith.constant 0 : i32
    return %arg0, %arg1, %c0_i32 : i32, i32, i32
  }
  func.func @transform_2(%arg0: i32, %arg1: i32) -> (i32, i32) {
    %c0_i32 = arith.constant 0 : i32
    %c0_i32_0 = arith.constant 0 : i32
    %c0_i32_1 = arith.constant 0 : i32
    return %c0_i32, %c0_i32_0 : i32, i32
  }
  func.func @transform_3(%arg0: i32, %arg1: i32) -> (i32, i32) {
    %c0_i32 = arith.constant 0 : i32
    %c0_i32_0 = arith.constant 0 : i32
    %c0_i32_1 = arith.constant 0 : i32
    return %c0_i32, %c0_i32_0 : i32, i32
  }
  func.func @transform_4(%arg0: i32, %arg1: i32) -> (i32, i32) {
    %c0_i32 = arith.constant 0 : i32
    %c0_i32_0 = arith.constant 0 : i32
    %c0_i32_1 = arith.constant 0 : i32
    return %c0_i32, %c0_i32_0 : i32, i32
  }
  func.func @transform_5(%arg0: i32, %arg1: i32) -> (i32, i32) {
    %c0_i32 = arith.constant 0 : i32
    %c0_i32_0 = arith.constant 0 : i32
    %c0_i32_1 = arith.constant 0 : i32
    return %c0_i32, %c0_i32_0 : i32, i32
  }
  func.func @transform_6(%arg0: i32, %arg1: i32) -> (i32, i32, i32) {
    %c0_i32 = arith.constant 0 : i32
    %c0_i32_0 = arith.constant 0 : i32
    return %arg0, %arg1, %c0_i32 : i32, i32, i32
  }
}

</mosaic_0001>

<bundles_post_ra>
// kernel: tile.23
= control target key start
LH: loop header
LB: loop body
LE: loop exit
PB: predicated region body
PF: predicated region fallthrough
CT: control target
= control target key end

     0   :  { %s22_s0 = inlined_call_operand.vmem [shape: f32[8], index: 0, kind: input, shape index: {}]   ;;  %s23_s1 = inlined_call_operand.vmem [shape: f32[8,8], index: 1, kind: output, shape index: {}]  }
   0x1   :  { %v4_v0 = vld [vmem:[%s22_s0] ss:$0 sm:$0xff] }
   0x2   :  { %5 = vst [vmem:[%s23_s1] sm:$0xff] %v4_v0 }

// kernel: tile.24
= control target key start
LH: loop header
LB: loop body
LE: loop exit
PB: predicated region body
PF: predicated region fallthrough
CT: control target
= control target key end

     0   :  { %s67_s10 = smov 56   ;;  %s68_s11 = smov 40   ;;  %vm3_vm0 = vcmask 64512   ;;  %vm9_vm1 = vcmask 523712   ;;  %vm15_vm2 = vcmask 458112   ;;  %vm21_vm3 = vcmask 392512   ;;  %s111_s0 = inlined_call_operand.vmem [shape: f32[8,8], index: 0, kind: input, shape index: {}]   ;;  %s112_s1 = inlined_call_operand.vmem [shape: f32[1,64], index: 1, kind: output, shape index: {}]  }
   0x1   :  { %v53_v0 = vld [vmem:[%s111_s0 + $0x7] sm:$0x1]   ;;  %v55_v1 = vld [vmem:[%s111_s0 + $0x5] sm:$0x1]   ;;  %v57_v2 = vld [vmem:[%s111_s0 + $0x3] sm:$0x1]  }
   0x2   :  { %7 = vrot.lane.b32.xlu0 %v53_v0, %s67_s10  ;;  %19 = vrot.lane.b32.xlu1 %v55_v1, %s68_s11  ;;  %s69_s14 = smov 24   ;;  %v54_v3 = vld [vmem:[%s111_s0 + $0x6] sm:$0x1]   ;;  %v56_v4 = vld [vmem:[%s111_s0 + $0x4] sm:$0x1]   ;;  %s70_s21 = smov 48  }
   0x3   :  { %31 = vrot.lane.b32.xlu2 %v57_v2, %s69_s14  ;;  %v58_v5 = vld [vmem:[%s111_s0 + $0x2] sm:$0x1]   ;;  %s71_s22 = smov 32   ;;  %s72_s23 = smov 16   ;;  %v59_v6 = vld [vmem:[%s111_s0 + $0x1] sm:$0x1]  }
   0x4   :  { %s73_s26 = smov 8   ;;  %v2_v7 = vld [vmem:[%s111_s0] sm:$0x1]   ;;  %vm27_vm4 = vcmask 326912   ;;  %vm33_vm5 = vcmask 261312   ;;  %vm39_vm6 = vcmask 195712  }
   0x5   :  { %4 = vst.msk [vmem:[#allocation0] sm:$0x1] %vm3_vm0, %v2_v7   ;;  %vm45_vm7 = vcmask 130112  }
   0xa   :  { %13 = vrot.lane.b32.xlu0 %v54_v3, %s70_s21  ;;  %25 = vrot.lane.b32.xlu1 %v56_v4, %s71_s22 }
   0xb   :  { %37 = vrot.lane.b32.xlu2 %v58_v5, %s72_s23 }
  0x12   :  { %43 = vrot.lane.b32.xlu0 %v59_v6, %s73_s26 }
  0x5d   :  { %v32_v8 = vpop.permute.xlu2 %31  }
  0x65   :  { %v38_v9 = vpop.permute.xlu2 %37  }
  0x74   :  { %v8_v10 = vpop.permute.xlu0 %7   ;;  %v20_v11 = vpop.permute.xlu1 %19  }
  0x75   :  { %10 = vst.msk [vmem:[#allocation0] sm:$0x1] %vm9_vm1, %v8_v10  }
  0x7c   :  { %v14_v12 = vpop.permute.xlu0 %13   ;;  %v26_v13 = vpop.permute.xlu1 %25  }
  0x7d   :  { %16 = vst.msk [vmem:[#allocation0] sm:$0x1] %vm15_vm2, %v14_v12  }
  0x7e   :  { %22 = vst.msk [vmem:[#allocation0] sm:$0x1] %vm21_vm3, %v20_v11  }
  0x7f   :  { %28 = vst.msk [vmem:[#allocation0] sm:$0x1] %vm27_vm4, %v26_v13  }
  0x80   :  { %34 = vst.msk [vmem:[#allocation0] sm:$0x1] %vm33_vm5, %v32_v8  }
  0x81   :  { %40 = vst.msk [vmem:[#allocation0] sm:$0x1] %vm39_vm6, %v38_v9  }
  0x84   :  { %v44_v14 = vpop.permute.xlu0 %43  }
  0x85   :  { %46 = vst.msk [vmem:[#allocation0] sm:$0x1] %vm45_vm7, %v44_v14  }
  0x8c   :  { %v49_v15 = vld [vmem:[#allocation0] sm:$0x1] }
  0x8d   :  { %52 = vst [vmem:[%s112_s1] sm:$0x1] %v49_v15 }

// kernel: basic_block_forward.5
= control target key start
LH: loop header
LB: loop body
LE: loop exit
PB: predicated region body
PF: predicated region fallthrough
CT: control target
= control target key end

     0   :  { %s520_s21 = smov 0   ;;  %s522_s22 = smov 0   ;;  %s568_s0 = inlined_call_operand.vmem [shape: bf16[2,8,64], index: 0, kind: input, shape index: {}]   ;;  %s569_s1 = inlined_call_operand.vmem [shape: bf16[2,8,64], index: 1, kind: input, shape index: {}]   ;;  %s570_s2 = inlined_call_operand.vmem [shape: f32[1,64], index: 2, kind: input, shape index: {}]   ;;  %s571_s3 = inlined_call_operand.vmem [shape: f32[1,64], index: 3, kind: input, shape index: {}]   ;;  %s572_s4 = inlined_call_operand.vmem [shape: f32[1,64], index: 4, kind: input, shape index: {}]   ;;  %s573_s5 = inlined_call_operand.vmem [shape: f32[1,64], index: 5, kind: input, shape index: {}]   ;;  %s574_s6 = inlined_call_operand.vmem [shape: f32[2,8,64], index: 6, kind: output, shape index: {}]  }
   0x1   :  { %s524_s23 = smov 0  }
   0x2 LB: > { %s28_s24 = sadd.s32 1, %s479_s22  ;;  %p427_p0 = scmp.ge.s32.totalorder %s483_s23, 1  ;;  %s483_s23 = sphi %s524_s23, %s16_s23   ;;  %s479_s22 = sphi %s522_s22, %s576_s22   ;;  %s475_s21 = sphi %s520_s21, %s575_s21  }
   0x3   : > { %p30_p1 = scmp.ge.s32.totalorder %s28_s24, 2  ;;  %p244_p2 = scmp.lt.s32.totalorder %s483_s23, 3 }
   0x5   : > { %s578_s24 = smov (%p30_p1, %s28_s24), 0  ;;  %p245_p3 = pnand %p427_p0, %p244_p2 }
   0x6   : > { %p285_p4 = scmp.lt.s32.totalorder (!%p245_p3), %s475_s21, 1 }
   0x7   : > { %248 = sbr.rel (%p245_p3) target bundleno = 28 (0x1c), region = 44 }
   0xc   : > { %s580_s21 = smov (!%p285_p4, %s475_s21), 1  ;;  %v457_v0 = vld [vmem:[%s570_s2] ss:$0 sm:$0xff]  ;;  %vm332_vm0 = vcmask 523264  }
   0xd   : > { %s428_s25 = sshll.u32 %s580_s21, 2  ;;  %v459_v1 = vld [vmem:[%s572_s4] ss:$0 sm:$0xff]  ;;  %s430_s16 = sshll.u32 %s580_s21, 3 }
   0xe   : > { %s291_s28 = scalar_lea.vmem %s568_s0, %s428_s25  ;;  %s298_s7 = scalar_lea.vmem %s569_s1, %s428_s25  ;;  %v458_v5 = vld [vmem:[%s571_s3] ss:$0 sm:$0xff] }
   0xf   : > { %v306_v2 = vld [vmem:[%s291_s28] sm:$0xf]  ;;  %s305_s19 = scalar_lea.vmem %s574_s6, %s430_s16 }
  0x10   : > { %v318_v3 = vld [vmem:[%s298_s7] sm:$0xf]  ;;  %v307_v4 = vunpack.c.l.bf16 %v306_v2 }
  0x11   : > { %v319_v6 = vunpack.c.l.bf16 %v318_v3  ;;  %v460_v7 = vld [vmem:[%s573_s5] ss:$0 sm:$0xff] }
  0x12   : > { %v312_v8 = vmul.f32 %v457_v0, %v307_v4 }
  0x13   : > { %v324_v9 = vmul.f32 %v459_v1, %v319_v6 }
  0x14   : > { %v317_v10 = vadd.f32 %v458_v5, %v312_v8 }
  0x15   : > { %v329_v11 = vadd.f32 %v460_v7, %v324_v9 }
  0x17   : > { %v330_v12 = vadd.f32 %v329_v11, %v317_v10 }
  0x19   : > { %v331_v13 = vmax.f32 %v330_v12, 0.0 }
  0x1b   : > { %333 = vst.msk [vmem:[%s305_s19] sm:$0xff] %vm332_vm0, %v331_v13 }
  0x1c PF: > { %s16_s23 = sadd.s32 1, %s483_s23   ;;  %s575_s21 = smov %s479_s22 }
  0x1d   : > { %p13_p5 = scmp.ge.s32.totalorder %s16_s23, 4   ;;  %s576_s22 = smov %s578_s24 }
  0x1f   :  { %15 = sbr.rel (!%p13_p5) target bundleno = 2 (0x2), region = 77 }

// kernel: basic_block_forward.3
= control target key start
LH: loop header
LB: loop body
LE: loop exit
PB: predicated region body
PF: predicated region fallthrough
CT: control target
= control target key end

     0   :  { %s1446_s21 = smov 0   ;;  %s1870_s0 = inlined_call_operand.vmem [shape: f32[8,9,9,4], index: 0, kind: input, shape index: {}]   ;;  %s1871_s1 = inlined_call_operand.vmem [shape: bf16[36,8], index: 1, kind: input, shape index: {}]   ;;  %s1872_s2 = inlined_call_operand.vmem [shape: bf16[4,8], index: 2, kind: input, shape index: {}]   ;;  %s1873_s3 = inlined_call_operand.vmem [shape: bf16[2,8,8,8], index: 3, kind: output, shape index: {0}]   ;;  %s1874_s4 = inlined_call_operand.vmem [shape: bf16[2,8,8,8], index: 4, kind: output, shape index: {1}]   ;;  %s1875_s5 = inlined_call_operand.vmem [shape: f32[2,2,8], index: 5, kind: output, shape index: {2}]   ;;  %s1876_s6 = inlined_call_operand.vmem [shape: f32[2,2,8], index: 6, kind: output, shape index: {3}]  }
   0x1 LB: > { %s1452_s22 = sadd.s32 4294967295, %s1400_s21   ;;  %p1257_p0 = scmp.ge.s32.totalorder %s1400_s21, 1  ;;  %s1400_s21 = sphi %s1446_s21, %s17_s21  }
   0x2   : > { %p221_p1 = scmp.lt.s32.totalorder %s1400_s21, 3 }
   0x4   : > { %p222_p2 = pnand %p1257_p0, %p221_p1 }
   0x5   : > { %s1258_s23 = sshll.u32 (!%p222_p2), %s1452_s22, 2  ;;  %s1402_s28 = smov (!%p222_p2), 8  }
   0x6   : > { %225 = sbr.rel (%p222_p2) target bundleno = 469 (0x1d5), region = 32  ;;  %p266_p3 = scmp.lt.s32.totalorder (!%p222_p2), %s1258_s23, 7 }
   0x7   : > { %s1403_s29 = smov (!%p222_p2), 4   ;;  %s1404_s30 = smov (!%p222_p2), 12  }
   0x8   : > { %s1405_s7 = smov (!%p222_p2), 16   ;;  %s1406_s8 = smov (!%p222_p2), 20  }
   0x9   : > { %s1407_s9 = smov (!%p222_p2), 24   ;;  %s1408_s10 = smov (!%p222_p2), 28  }
   0xa   : > { %s1409_s11 = smov (!%p222_p2), 32   ;;  %p272_p4 = scmp.lt.s32.totalorder (!%p222_p2), %s1452_s22, 1 }
   0xb   : > { %s1878_s23 = smov (!%p266_p3, %s1258_s23), 7  ;;  %vm310_vm0 = vcmask 27648   ;;  %vm368_vm1 = vcmask 60448   ;;  %vm425_vm2 = vcmask 93248   ;;  %vm483_vm3 = vcmask 126048  }
   0xc   : > { %s1376_s24 = smul.u32 144, %s1878_s23  ;;  %vm541_vm4 = vcmask 158848   ;;  %vm598_vm5 = vcmask 191648   ;;  %vm841_vm6 = vcmask 1041408   ;;  %vm656_vm7 = vcmask 224448   ;;  %s1880_s22 = smov (!%p272_p4, %s1452_s22), 1 }
   0xd   : > { %vm714_vm8 = vcmask 257248   ;;  %vm771_vm9 = vcmask 290048   ;;  %vm986_vm10 = vcmask 31744   ;;  %vm828_vm11 = vcmask 293888   ;;  %s1364_s20 = sshll.u32 %s1880_s22, 5 }
   0xe   : > { %s1460_s27 = scalar_lea.vmem %s1870_s0, %s1376_s24  ;;  %s1744_s25 = scalar_lea.vmem %s1873_s3, %s1364_s20  ;;  %vm940_vm12 = vcmask 60416   ;;  %vm291_vm13 = vcmask 58368   ;;  %vm875_vm14 = vcmask 64512   ;;  %vm898_vm15 = vcmask 57344  }
   0xf   : > { %v377_v0 = vld [vmem:[%s1460_s27 + $0x1] sm:$0xff]  ;;  %v1266_v1 = vld [vmem:[%s1460_s27 + $0x90] sm:$0xff] }
  0x10   : > { %v385_v2 = vpack.c.bf16 %v377_v0, %v377_v0  ;;  %v328_v3 = vpack.c.bf16 %v1266_v1, %v1266_v1  ;;  %v1270_v4 = vld [vmem:[%s1460_s27 + $0xd0] sm:$0xff]  ;;  %v1267_v7 = vld [vmem:[%s1460_s27 + $0xa0] sm:$0xff] }
  0x11   : > { %v1467_v5 = vpack.c.bf16 %v1270_v4, %v1270_v4  ;;  %v378_v6 = vld [vmem:[%s1460_s27 + $0x11] sm:$0xff]  ;;  %v1271_v8 = vld [vmem:[%s1460_s27 + $0xe0] sm:$0xff]  ;;  %v329_v10 = vpack.c.bf16 %v1267_v7, %v1267_v7 }
  0x12   : > { %401 = vrot.lane.b32.xlu1 %v385_v2, %s1402_s28  ;;  %344 = vrot.lane.b32.xlu0 %v328_v3, %s1403_s29  ;;  %v1474_v9 = vpack.c.bf16 %v378_v6, %v378_v6  ;;  %v1476_v11 = vpack.c.bf16 %v1271_v8, %v1271_v8  ;;  %v1275_v12 = vld [vmem:[%s1460_s27 + $0x130] sm:$0xff]  ;;  %v1274_v13 = vld [vmem:[%s1460_s27 + $0x120] sm:$0xff] }
  0x13   : > { %352 = vrot.lane.b32.xlu2 %v1467_v5, %s1403_s29  ;;  %v381_v14 = vld [vmem:[%s1460_s27 + $0x41] sm:$0xff]  ;;  %v444_v15 = vpack.c.bf16 %v1275_v12, %v1275_v12  ;;  %v443_v16 = vpack.c.bf16 %v1274_v13, %v1274_v13  ;;  %v1282_v18 = vld [vmem:[%s1460_s27 + $0x1b0] sm:$0xff] }
  0x14   : > { %v1486_v17 = vpack.c.bf16 %v381_v14, %v381_v14  ;;  %v382_v19 = vld [vmem:[%s1460_s27 + $0x51] sm:$0xff]  ;;  %v1283_v20 = vld [vmem:[%s1460_s27 + $0x1c0] sm:$0xff]  ;;  %v1495_v21 = vpack.c.bf16 %v1282_v18, %v1282_v18 }
  0x15   : > { %v390_v22 = vpack.c.bf16 %v382_v19, %v382_v19  ;;  %v1497_v23 = vpack.c.bf16 %v1283_v20, %v1283_v20  ;;  %v1279_v24 = vld [vmem:[%s1460_s27 + $0x170] sm:$0xff]  ;;  %v1278_v25 = vld [vmem:[%s1460_s27 + $0x160] sm:$0xff] }
  0x16   : > { %v1290_v26 = vld [vmem:[%s1460_s27 + $0x121] sm:$0xff]  ;;  %v448_v27 = vpack.c.bf16 %v1279_v24, %v1279_v24  ;;  %v447_v28 = vpack.c.bf16 %v1278_v25, %v1278_v25  ;;  %v1286_v30 = vld [vmem:[%s1460_s27 + $0x1f0] sm:$0xff] }
  0x17   : > { %v558_v29 = vpack.c.bf16 %v1290_v26, %v1290_v26  ;;  %v1291_v31 = vld [vmem:[%s1460_s27 + $0x131] sm:$0xff]  ;;  %v1287_v32 = vld [vmem:[%s1460_s27 + $0x200] sm:$0xff]  ;;  %v1513_v33 = vpack.c.bf16 %v1286_v30, %v1286_v30 }
  0x18   : > { %v559_v34 = vpack.c.bf16 %v1291_v31, %v1291_v31  ;;  %v1515_v35 = vpack.c.bf16 %v1287_v32, %v1287_v32  ;;  %v1299_v36 = vld [vmem:[%s1460_s27 + $0x20] sm:$0xff]  ;;  %v1298_v37 = vld [vmem:[%s1460_s27 + $0x10] sm:$0xff] }
  0x19   : > { %v1294_v38 = vld [vmem:[%s1460_s27 + $0x161] sm:$0xff]  ;;  %v617_v39 = vpack.c.bf16 %v1299_v36, %v1299_v36  ;;  %v616_v40 = vpack.c.bf16 %v1298_v37, %v1298_v37  ;;  %v1295_v42 = vld [vmem:[%s1460_s27 + $0x171] sm:$0xff] }
  0x1a   : > { %403 = vrot.lane.b32.xlu1 %v1474_v9, %s1402_s28  ;;  %346 = vrot.lane.b32.xlu0 %v329_v10, %s1403_s29  ;;  %v562_v41 = vpack.c.bf16 %v1294_v38, %v1294_v38  ;;  %v1307_v43 = vld [vmem:[%s1460_s27 + $0xb0] sm:$0xff]  ;;  %v563_v44 = vpack.c.bf16 %v1295_v42, %v1295_v42  ;;  %v1303_v46 = vld [vmem:[%s1460_s27 + $0x60] sm:$0xff] }
  0x1b   : > { %354 = vrot.lane.b32.xlu2 %v1476_v11, %s1403_s29  ;;  %v675_v45 = vpack.c.bf16 %v1307_v43, %v1307_v43  ;;  %v1302_v47 = vld [vmem:[%s1460_s27 + $0x50] sm:$0xff]  ;;  %v621_v48 = vpack.c.bf16 %v1303_v46, %v1303_v46  ;;  %v1315_v50 = vld [vmem:[%s1460_s27 + $0x21] sm:$0xff]  ;;  %312 = vst.msk [vmem:[#allocation2 + $0x4] sm:$0xf] %vm310_vm0, %v616_v40 }
  0x1c   : > { %v620_v49 = vpack.c.bf16 %v1302_v47, %v1302_v47  ;;  %v1311_v51 = vld [vmem:[%s1460_s27 + $0xf0] sm:$0xff]  ;;  %v732_v52 = vpack.c.bf16 %v1315_v50, %v1315_v50  ;;  %v1319_v54 = vld [vmem:[%s1460_s27 + $0x61] sm:$0xff]  ;;  %313 = vst.msk [vmem:[#allocation2 + $0x8] sm:$0xf] %vm310_vm0, %v617_v39 }
  0x1d   : > { %v679_v53 = vpack.c.bf16 %v1311_v51, %v1311_v51  ;;  %v736_v55 = vpack.c.bf16 %v1319_v54, %v1319_v54  ;;  %v294_v56 = vld [vmem:[%s1460_s27] sm:$0xff]  ;;  %v380_v60 = vld [vmem:[%s1460_s27 + $0x31] sm:$0xff]  ;;  %317 = vst.msk [vmem:[#allocation2 + $0x18] sm:$0xf] %vm310_vm0, %v621_v48 }
  0x1e   : > { %v302_v57 = vpack.c.bf16 %v294_v56, %v294_v56  ;;  %v1269_v58 = vld [vmem:[%s1460_s27 + $0xc0] sm:$0xff]  ;;  %316 = vst.msk [vmem:[#allocation2 + $0x14] sm:$0xf] %vm310_vm0, %v620_v49  ;;  %v1562_v63 = vpack.c.bf16 %v380_v60, %v380_v60  ;;  %v1277_v6 = vld [vmem:[%s1460_s27 + $0x150] sm:$0xff] }
  0x1f   : > { %v298_v59 = vld [vmem:[%s1460_s27 + $0x40] sm:$0xff]  ;;  %v1557_v62 = vpack.c.bf16 %v1269_v58, %v1269_v58  ;;  %v384_v7 = vld [vmem:[%s1460_s27 + $0x71] sm:$0xff]  ;;  %v446_v8 = vpack.c.bf16 %v1277_v6, %v1277_v6 }
  0x20   : > { %311 = vst.msk [vmem:[#allocation2] sm:$0xf] %vm310_vm0, %v302_v57  ;;  %v1554_v61 = vpack.c.bf16 %v298_v59, %v298_v59  ;;  %v1273_v0 = vld [vmem:[%s1460_s27 + $0x100] sm:$0xff]  ;;  %v1284_v12 = vld [vmem:[%s1460_s27 + $0x1d0] sm:$0xff] }
  0x21   : > { %v1276_v1 = vld [vmem:[%s1460_s27 + $0x140] sm:$0xff]  ;;  %v1573_v2 = vpack.c.bf16 %v1273_v0, %v1273_v0  ;;  %v1281_v20 = vld [vmem:[%s1460_s27 + $0x190] sm:$0xff] }
  0x22   : > { %461 = vrot.lane.b32.xlu1 %v444_v15, %s1404_s30  ;;  %459 = vrot.lane.b32.xlu0 %v443_v16, %s1404_s30  ;;  %315 = vst.msk [vmem:[#allocation2 + $0x10] sm:$0xf] %vm310_vm0, %v1554_v61  ;;  %v445_v4 = vpack.c.bf16 %v1276_v1, %v1276_v1  ;;  %v1280_v13 = vld [vmem:[%s1460_s27 + $0x180] sm:$0xff]  ;;  %v1594_v15 = vpack.c.bf16 %v1284_v12, %v1284_v12  ;;  %v1293_v25 = vld [vmem:[%s1460_s27 + $0x151] sm:$0xff] }
  0x23   : > { %409 = vrot.lane.b32.xlu2 %v1486_v17, %s1402_s28  ;;  %v449_v18 = vpack.c.bf16 %v1280_v13, %v1280_v13  ;;  %v1292_v19 = vld [vmem:[%s1460_s27 + $0x141] sm:$0xff]  ;;  %v1300_v30 = vld [vmem:[%s1460_s27 + $0x30] sm:$0xff] }
  0x24   : > { %v560_v26 = vpack.c.bf16 %v1292_v19, %v1292_v19  ;;  %v618_v31 = vpack.c.bf16 %v1300_v30, %v1300_v30  ;;  %v1289_v32 = vld [vmem:[%s1460_s27 + $0x220] sm:$0xff]  ;;  %v1304_v47 = vld [vmem:[%s1460_s27 + $0x70] sm:$0xff] }
  0x25   : > { %v1615_v38 = vpack.c.bf16 %v1289_v32, %v1289_v32  ;;  %v792_v58 = vld [vmem:[%s1871_s1 + $0x10] sm:$0x3] }
  0x26   : > { %314 = vst.msk [vmem:[#allocation2 + $0xc] sm:$0xf] %vm310_vm0, %v618_v31  ;;  %v1313_v60 = vld [vmem:[%s1460_s27 + $0x110] sm:$0xff] }
  0x27   : > { %v681_v1 = vpack.c.bf16 %v1313_v60, %v1313_v60 }
  0x2a   : > { %517 = vrot.lane.b32.xlu1 %v1495_v21, %s1405_s7  ;;  %411 = vrot.lane.b32.xlu0 %v390_v22, %s1402_s28 }
  0x2b   : > { %519 = vrot.lane.b32.xlu2 %v1497_v23, %s1405_s7 }
  0x32   : > { %469 = vrot.lane.b32.xlu1 %v448_v27, %s1404_s30  ;;  %467 = vrot.lane.b32.xlu0 %v447_v28, %s1404_s30  ;;  %v450_v27 = vpack.c.bf16 %v1281_v20, %v1281_v20  ;;  %v965_v20 = vld [vmem:[%s1872_s2] sm:$0x3] }
  0x33   : > { %574 = vrot.lane.b32.xlu2 %v558_v29, %s1406_s8  ;;  %v561_v29 = vpack.c.bf16 %v1293_v25, %v1293_v25 }
  0x3a   : > { %525 = vrot.lane.b32.xlu1 %v1513_v33, %s1405_s7  ;;  %576 = vrot.lane.b32.xlu0 %v559_v34, %s1406_s8  ;;  %v1288_v34 = vld [vmem:[%s1460_s27 + $0x210] sm:$0xff] }
  0x3b   : > { %527 = vrot.lane.b32.xlu2 %v1515_v35, %s1405_s7 }
  0x42   : > { %634 = vrot.lane.b32.xlu1 %v617_v39, %s1407_s9  ;;  %632 = vrot.lane.b32.xlu0 %v616_v40, %s1407_s9  ;;  %v1617_v39 = vpack.c.bf16 %v1288_v34, %v1288_v34  ;;  %v978_v34 = vunpack.c.l.b16 %v1513_v33  ;;  %v974_v33 = vunpack.c.l.b16 %v1495_v21 }
  0x43   : > { %582 = vrot.lane.b32.xlu2 %v562_v41, %s1406_s8  ;;  %v1296_v41 = vld [vmem:[%s1460_s27 + $0x181] sm:$0xff] }
  0x4a   : > { %690 = vrot.lane.b32.xlu1 %v329_v10, %s1408_s10  ;;  %584 = vrot.lane.b32.xlu0 %v563_v44, %s1406_s8  ;;  %v1583_v10 = vpack.c.bf16 %v384_v7, %v384_v7  ;;  %v1297_v44 = vld [vmem:[%s1460_s27 + $0x191] sm:$0xff] }
  0x4b   : > { %692 = vrot.lane.b32.xlu2 %v675_v45, %s1408_s10 }
  0x52   : > { %642 = vrot.lane.b32.xlu1 %v621_v48, %s1407_s9  ;;  %640 = vrot.lane.b32.xlu0 %v620_v49, %s1407_s9  ;;  %v622_v48 = vpack.c.bf16 %v1304_v47, %v1304_v47  ;;  %v565_v49 = vpack.c.bf16 %v1297_v44, %v1297_v44  ;;  %v980_v47 = vunpack.c.l.b16 %v1617_v39 }
  0x53   : > { %747 = vrot.lane.b32.xlu2 %v1474_v9, %s1409_s11 }
  0x54   : > { %318 = vst.msk [vmem:[#allocation2 + $0x1c] sm:$0xf] %vm310_vm0, %v622_v48 }
  0x5a   : > { %698 = vrot.lane.b32.xlu1 %v1476_v11, %s1408_s10  ;;  %749 = vrot.lane.b32.xlu0 %v732_v52, %s1409_s11  ;;  %v1285_v11 = vld [vmem:[%s1460_s27 + $0x1e0] sm:$0xff] }
  0x5b   : > { %700 = vrot.lane.b32.xlu2 %v679_v53, %s1408_s10  ;;  %v1592_v14 = vpack.c.bf16 %v1285_v11, %v1285_v11 }
  0x5d   : > { %v977_v25 = vunpack.c.l.b16 %v1592_v14 }
  0x62   : > { %757 = vrot.lane.b32.xlu1 %v736_v55, %s1409_s11  ;;  %755 = vrot.lane.b32.xlu0 %v390_v22, %s1409_s11 }
  0x63   : > { %348 = vrot.lane.b32.xlu2 %v675_v45, %s1403_s29  ;;  %v564_v45 = vpack.c.bf16 %v1296_v41, %v1296_v41 }
  0x6a   : > { %405 = vrot.lane.b32.xlu1 %v732_v52, %s1402_s28  ;;  %350 = vrot.lane.b32.xlu0 %v1557_v62, %s1403_s29 }
  0x6b   : > { %407 = vrot.lane.b32.xlu2 %v1562_v63, %s1402_s28 }
  0x6d   : > { %v353_v3 = vpop.permute.xlu2 %352 }
  0x6e   : > { %373 = vst.msk [vmem:[#allocation2 + $0x10] sm:$0xf] %vm368_vm1, %v353_v3 }
  0x72   : > { %358 = vrot.lane.b32.xlu1 %v1573_v2, %s1403_s29  ;;  %356 = vrot.lane.b32.xlu0 %v679_v53, %s1403_s29  ;;  %v1305_v53 = vld [vmem:[%s1460_s27 + $0x80] sm:$0xff]  ;;  %s1264_s29 = sshll.u32 %s1880_s22, 1 }
  0x73   : > { %463 = vrot.lane.b32.xlu2 %v445_v4, %s1404_s30  ;;  %v623_v56 = vpack.c.bf16 %v1305_v53, %v1305_v53  ;;  %v1370_v4 = vld [vmem:[%s1871_s1] sm:$0xff] }
  0x75   : > { %v355_v9 = vpop.permute.xlu2 %354 }
  0x76   : > { %374 = vst.msk [vmem:[#allocation2 + $0x14] sm:$0xf] %vm368_vm1, %v355_v9 }
  0x7a   : > { %413 = vrot.lane.b32.xlu1 %v736_v55, %s1402_s28  ;;  %465 = vrot.lane.b32.xlu0 %v446_v8, %s1404_s30 }
  0x7b   : > { %415 = vrot.lane.b32.xlu2 %v1583_v10, %s1402_s28  ;;  %s1753_s28 = scalar_lea.vmem %s1874_s4, %s1364_s20 }
  0x7d   : > { %v410_v16 = vpop.permute.xlu2 %409 }
  0x7e   : > { %430 = vst.msk [vmem:[#allocation2 + $0x10] sm:$0xf] %vm425_vm2, %v410_v16 }
  0x82   : > { %523 = vrot.lane.b32.xlu1 %v1592_v14, %s1405_s7  ;;  %521 = vrot.lane.b32.xlu0 %v1594_v15, %s1405_s7 }
  0x83   : > { %471 = vrot.lane.b32.xlu2 %v449_v18, %s1404_s30 }
  0x84   : > { %v402_v22 = vpop.permute.xlu1 %401  ;;  %v345_v24 = vpop.permute.xlu0 %344 }
  0x85   : > { %369 = vst.msk [vmem:[#allocation2] sm:$0xf] %vm368_vm1, %v345_v24  ;;  %v520_v28 = vpop.permute.xlu2 %519  ;;  %v976_v24 = vunpack.c.l.b16 %v1594_v15 }
  0x86   : > { %426 = vst.msk [vmem:[#allocation2] sm:$0xf] %vm425_vm2, %v402_v22  ;;  %v1000_v22 = vsel %vm841_vm6, %v965_v20, 0 }
  0x87   : > { %1375 = vmatpush.bf16.msra.mxu3 %v1000_v22  ;;  %1009 = vmatpush.bf16.msra.mxu1 %v1000_v22 }
  0x8a   : > { %578 = vrot.lane.b32.xlu1 %v560_v26, %s1406_s8  ;;  %473 = vrot.lane.b32.xlu0 %v450_v27, %s1404_s30  ;;  %v983_v27 = vpack.c.b16 %v977_v25, %v976_v24 }
  0x8b   : > { %580 = vrot.lane.b32.xlu2 %v561_v29, %s1406_s8 }
  0x8c   : > { %v404_v36 = vpop.permute.xlu1 %403  ;;  %v347_v37 = vpop.permute.xlu0 %346  ;;  %1359 = vmatmul.msk.bf16.vlgmr.msra.gmra.mxu3 %vm986_vm10, %v983_v27 }
  0x8d   : > { %370 = vst.msk [vmem:[#allocation2 + $0x4] sm:$0xf] %vm368_vm1, %v347_v37  ;;  %v575_v40 = vpop.permute.xlu2 %574 }
  0x8e   : > { %427 = vst.msk [vmem:[#allocation2 + $0x4] sm:$0xf] %vm425_vm2, %v404_v36  ;;  %v979_v36 = vunpack.c.l.b16 %v1515_v35  ;;  %v975_v35 = vunpack.c.l.b16 %v1497_v23 }
  0x90   : > { %v984_v37 = vpack.c.b16 %v979_v36, %v978_v34 }
  0x92   : > { %531 = vrot.lane.b32.xlu1 %v1615_v38, %s1405_s7  ;;  %529 = vrot.lane.b32.xlu0 %v1617_v39, %s1405_s7 }
  0x93   : > { %636 = vrot.lane.b32.xlu2 %v618_v31, %s1407_s9 }
  0x94   : > { %v462_v42 = vpop.permute.xlu1 %461  ;;  %v460_v43 = vpop.permute.xlu0 %459 }
  0x95   : > { %485 = vst.msk [vmem:[#allocation2 + $0x4] sm:$0xf] %vm483_vm3, %v462_v42  ;;  %v528_v46 = vpop.permute.xlu2 %527 }
  0x96   : > { %484 = vst.msk [vmem:[#allocation2] sm:$0xf] %vm483_vm3, %v460_v43  ;;  %v982_v43 = vpack.c.b16 %v975_v35, %v974_v33 }
  0x97   : > { %543 = vst.msk [vmem:[#allocation2 + $0x4] sm:$0xf] %vm541_vm4, %v520_v28 }
  0x98   : > { %1358 = vmatmul.msk.bf16.vlgmr.msra.gmra.mxu1 %vm986_vm10, %v982_v43 }
  0x9a   : > { %586 = vrot.lane.b32.xlu1 %v564_v45, %s1406_s8  ;;  %638 = vrot.lane.b32.xlu0 %v1554_v61, %s1407_s9 }
  0x9b   : > { %588 = vrot.lane.b32.xlu2 %v565_v49, %s1406_s8  ;;  %s1766_s8 = scalar_lea.vmem %s1876_s6, %s1264_s29 }
  0x9c   : > { %v518_v50 = vpop.permute.xlu1 %517  ;;  %v412_v51 = vpop.permute.xlu0 %411  ;;  %1360 = vmatmul.msk.bf16.gmra.mxu3 %vm986_vm10, %v984_v37 }
  0x9d   : > { %542 = vst.msk [vmem:[#allocation2] sm:$0xf] %vm541_vm4, %v518_v50  ;;  %v583_v52 = vpop.permute.xlu2 %582 }
  0x9e   : > { %431 = vst.msk [vmem:[#allocation2 + $0x14] sm:$0xf] %vm425_vm2, %v412_v51 }
  0x9f   : > { %599 = vst.msk [vmem:[#allocation2] sm:$0xf] %vm598_vm5, %v575_v40 }
  0xa2   : > { %696 = vrot.lane.b32.xlu1 %v1467_v5, %s1408_s10  ;;  %694 = vrot.lane.b32.xlu0 %v1557_v62, %s1408_s10  ;;  %v822_v5 = vunpack.c.l.b16 %v792_v58 }
  0xa3   : > { %644 = vrot.lane.b32.xlu2 %v622_v48, %s1407_s9  ;;  %v981_v48 = vunpack.c.l.b16 %v1615_v38 }
  0xa4   : > { %v470_v54 = vpop.permute.xlu1 %469  ;;  %v468_v55 = vpop.permute.xlu0 %467  ;;  %v825_v59 = vpack.c.b16 %v822_v5, %v822_v5 }
  0xa5   : > { %489 = vst.msk [vmem:[#allocation2 + $0x14] sm:$0xf] %vm483_vm3, %v470_v54  ;;  %v693_v57 = vpop.permute.xlu2 %692  ;;  %v985_v21 = vpack.c.b16 %v981_v48, %v980_v47 }
  0xa6   : > { %488 = vst.msk [vmem:[#allocation2 + $0x10] sm:$0xf] %vm483_vm3, %v468_v55  ;;  %v843_v61 = vsel %vm841_vm6, %v825_v59, 0 }
  0xa7   : > { %547 = vst.msk [vmem:[#allocation2 + $0x14] sm:$0xf] %vm541_vm4, %v528_v46  ;;  %850 = vmatpush.bf16.msra.mxu0 %v843_v61  ;;  %1372 = vmatpush.bf16.msra.mxu2 %v843_v61 }
  0xaa   : > { %751 = vrot.lane.b32.xlu1 %v1562_v63, %s1409_s11  ;;  %646 = vrot.lane.b32.xlu0 %v623_v56, %s1407_s9  ;;  %v1371_v63 = vld [vmem:[%s1871_s1 + $0x8] sm:$0xff] }
  0xab   : > { %753 = vrot.lane.b32.xlu2 %v1486_v17, %s1409_s11  ;;  %851 = vmatpush.bf16.msra.mxu0 %v1371_v63  ;;  %v1321_v17 = vld [vmem:[%s1460_s27 + $0x81] sm:$0xff] }
  0xac   : > { %v526_v62 = vpop.permute.xlu1 %525  ;;  %v577_v0 = vpop.permute.xlu0 %576  ;;  %1373 = vmatpush.bf16.msra.mxu2 %v1371_v63  ;;  %v738_v8 = vpack.c.bf16 %v1321_v17, %v1321_v17  ;;  %1361 = vmatmul.msk.bf16.gmra.mxu3 %vm986_vm10, %v985_v21 }
  0xad   : > { %546 = vst.msk [vmem:[#allocation2 + $0x10] sm:$0xf] %vm541_vm4, %v526_v62  ;;  %v748_v3 = vpop.permute.xlu2 %747 }
  0xae   : > { %600 = vst.msk [vmem:[#allocation2 + $0x4] sm:$0xf] %vm598_vm5, %v577_v0 }
  0xaf   : > { %603 = vst.msk [vmem:[#allocation2 + $0x10] sm:$0xf] %vm598_vm5, %v583_v52  ;;  %852 = vmatpush.bf16.msra.mxu0 %v1370_v4 }
  0xb0   : > { %1374 = vmatpush.bf16.msra.mxu2 %v1370_v4 }
  0xb2   : > { %702 = vrot.lane.b32.xlu0 %v1573_v2, %s1408_s10  ;;  %704 = vrot.lane.b32.xlu1 %v681_v1, %s1408_s10  ;;  %s1773_s10 = scalar_lea.vmem %s1875_s5, %s1264_s29 }
  0xb3   : > { %759 = vrot.lane.b32.xlu2 %v1583_v10, %s1409_s11 }
  0xb4   : > { %v635_v6 = vpop.permute.xlu1 %634  ;;  %v633_v7 = vpop.permute.xlu0 %632 }
  0xb5   : > { %658 = vst.msk [vmem:[#allocation2 + $0x4] sm:$0xf] %vm656_vm7, %v635_v6  ;;  %v701_v9 = vpop.permute.xlu2 %700 }
  0xb6   : > { %657 = vst.msk [vmem:[#allocation2] sm:$0xf] %vm656_vm7, %v633_v7 }
  0xb7   : > { %716 = vst.msk [vmem:[#allocation2 + $0x4] sm:$0xf] %vm714_vm8, %v693_v57 }
  0xba   : > { %761 = vrot.lane.b32.xlu0 %v738_v8, %s1409_s11 }
  0xbc   : > { %v691_v2 = vpop.permute.xlu1 %690  ;;  %v585_v11 = vpop.permute.xlu0 %584 }
  0xbd   : > { %715 = vst.msk [vmem:[#allocation2] sm:$0xf] %vm714_vm8, %v691_v2  ;;  %v349_v10 = vpop.permute.xlu2 %348 }
  0xbe   : > { %604 = vst.msk [vmem:[#allocation2 + $0x14] sm:$0xf] %vm598_vm5, %v585_v11 }
  0xbf   : > { %772 = vst.msk [vmem:[#allocation2] sm:$0xf] %vm771_vm9, %v748_v3 }
  0xc0   : > { %371 = vst.msk [vmem:[#allocation2 + $0x8] sm:$0xf] %vm368_vm1, %v349_v10  ;;  %v1410_v10 = vmov 0.0  }
  0xc1   : > { %293 = vst.msk [vmem:[%s1766_s8] sm:$0x3] %vm291_vm13, %v1410_v10 }
  0xc2   : > { %292 = vst.msk [vmem:[%s1773_s10] sm:$0x3] %vm291_vm13, %v1410_v10 }
  0xc4   : > { %v643_v12 = vpop.permute.xlu1 %642  ;;  %v641_v13 = vpop.permute.xlu0 %640 }
  0xc5   : > { %662 = vst.msk [vmem:[#allocation2 + $0x14] sm:$0xf] %vm656_vm7, %v643_v12  ;;  %v408_v16 = vpop.permute.xlu2 %407 }
  0xc6   : > { %661 = vst.msk [vmem:[#allocation2 + $0x10] sm:$0xf] %vm656_vm7, %v641_v13 }
  0xc7   : > { %720 = vst.msk [vmem:[#allocation2 + $0x14] sm:$0xf] %vm714_vm8, %v701_v9 }
  0xcc   : > { %v699_v18 = vpop.permute.xlu1 %698  ;;  %v750_v19 = vpop.permute.xlu0 %749 }
  0xcd   : > { %719 = vst.msk [vmem:[#allocation2 + $0x10] sm:$0xf] %vm714_vm8, %v699_v18  ;;  %v464_v26 = vpop.permute.xlu2 %463 }
  0xce   : > { %773 = vst.msk [vmem:[#allocation2 + $0x4] sm:$0xf] %vm771_vm9, %v750_v19 }
  0xd4   : > { %v758_v28 = vpop.permute.xlu1 %757  ;;  %v756_v29 = vpop.permute.xlu0 %755 }
  0xd5   : > { %777 = vst.msk [vmem:[#allocation2 + $0x14] sm:$0xf] %vm771_vm9, %v758_v28  ;;  %v1366_v30 = vld [vmem:[#allocation2] sm:$0xff]  ;;  %v416_v14 = vpop.permute.xlu2 %415 }
  0xd6   : > { %776 = vst.msk [vmem:[#allocation2 + $0x10] sm:$0xf] %vm771_vm9, %v756_v29  ;;  %1346 = vmatmul.msk.bf16.vlgmr.msra.gmra.mxu0 %vm828_vm11, %v1366_v30 }
  0xdc   : > { %v406_v15 = vpop.permute.xlu1 %405  ;;  %v351_v31 = vpop.permute.xlu0 %350 }
  0xdd   : > { %428 = vst.msk [vmem:[#allocation2 + $0x8] sm:$0xf] %vm425_vm2, %v406_v15  ;;  %v1368_v32 = vld [vmem:[#allocation2 + $0x10] sm:$0xff]  ;;  %v472_v40 = vpop.permute.xlu2 %471 }
  0xde   : > { %372 = vst.msk [vmem:[#allocation2 + $0xc] sm:$0xf] %vm368_vm1, %v351_v31  ;;  %1348 = vmatmul.msk.bf16.vlgmr.msra.gmra.mxu2 %vm828_vm11, %v1368_v32 }
  0xdf   : > { %429 = vst.msk [vmem:[#allocation2 + $0xc] sm:$0xf] %vm425_vm2, %v408_v16 }
  0xe0   : > { %486 = vst.msk [vmem:[#allocation2 + $0x8] sm:$0xf] %vm483_vm3, %v464_v26 }
  0xe4   : > { %v359_v41 = vpop.permute.xlu1 %358  ;;  %v357_v42 = vpop.permute.xlu0 %356 }
  0xe5   : > { %376 = vst.msk [vmem:[#allocation2 + $0x1c] sm:$0xf] %vm368_vm1, %v359_v41  ;;  %v581_v44 = vpop.permute.xlu2 %580 }
  0xe6   : > { %375 = vst.msk [vmem:[#allocation2 + $0x18] sm:$0xf] %vm368_vm1, %v357_v42 }
  0xe7   : > { %433 = vst.msk [vmem:[#allocation2 + $0x1c] sm:$0xf] %vm425_vm2, %v416_v14 }
  0xec   : > { %v414_v45 = vpop.permute.xlu1 %413  ;;  %v466_v46 = vpop.permute.xlu0 %465 }
  0xed   : > { %432 = vst.msk [vmem:[#allocation2 + $0x18] sm:$0xf] %vm425_vm2, %v414_v45  ;;  %v637_v50 = vpop.permute.xlu2 %636 }
  0xee   : > { %487 = vst.msk [vmem:[#allocation2 + $0xc] sm:$0xf] %vm483_vm3, %v466_v46 }
  0xef   : > { %490 = vst.msk [vmem:[#allocation2 + $0x18] sm:$0xf] %vm483_vm3, %v472_v40 }
  0xf4   : > { %v524_v23 = vpop.permute.xlu1 %523  ;;  %v522_v49 = vpop.permute.xlu0 %521 }
  0xf5   : > { %545 = vst.msk [vmem:[#allocation2 + $0xc] sm:$0xf] %vm541_vm4, %v524_v23  ;;  %v589_v38 = vpop.permute.xlu2 %588 }
  0xf6   : > { %544 = vst.msk [vmem:[#allocation2 + $0x8] sm:$0xf] %vm541_vm4, %v522_v49 }
  0xf7   : > { %602 = vst.msk [vmem:[#allocation2 + $0xc] sm:$0xf] %vm598_vm5, %v581_v44 }
  0xfc   : > { %v579_v51 = vpop.permute.xlu1 %578  ;;  %v474_v39 = vpop.permute.xlu0 %473 }
  0xfd   : > { %601 = vst.msk [vmem:[#allocation2 + $0x8] sm:$0xf] %vm598_vm5, %v579_v51  ;;  %v645_v54 = vpop.permute.xlu2 %644 }
  0xfe   : > { %491 = vst.msk [vmem:[#allocation2 + $0x1c] sm:$0xf] %vm483_vm3, %v474_v39 }
  0xff   : > { %659 = vst.msk [vmem:[#allocation2 + $0x8] sm:$0xf] %vm656_vm7, %v637_v50 }
 0x104   : > { %v532_v52 = vpop.permute.xlu1 %531  ;;  %v530_v53 = vpop.permute.xlu0 %529 }
 0x105   : > { %549 = vst.msk [vmem:[#allocation2 + $0x1c] sm:$0xf] %vm541_vm4, %v532_v52  ;;  %v754_v57 = vpop.permute.xlu2 %753 }
 0x106   : > { %548 = vst.msk [vmem:[#allocation2 + $0x18] sm:$0xf] %vm541_vm4, %v530_v53 }
 0x107   : > { %606 = vst.msk [vmem:[#allocation2 + $0x1c] sm:$0xf] %vm598_vm5, %v589_v38 }
 0x10c   : > { %v587_v55 = vpop.permute.xlu1 %586  ;;  %v639_v56 = vpop.permute.xlu0 %638 }
 0x10d   : > { %605 = vst.msk [vmem:[#allocation2 + $0x18] sm:$0xf] %vm598_vm5, %v587_v55  ;;  %v760_v61 = vpop.permute.xlu2 %759 }
 0x10e   : > { %660 = vst.msk [vmem:[#allocation2 + $0xc] sm:$0xf] %vm656_vm7, %v639_v56 }
 0x10f   : > { %663 = vst.msk [vmem:[#allocation2 + $0x18] sm:$0xf] %vm656_vm7, %v645_v54  ;;  %v1016_v17 = vpop.f32.mrf.mxu3 }
 0x110   : > { %v1089_v7 = vpack.c.bf16 %v1016_v17, %v1016_v17  ;;  %v1058_v28 = vmul.f32 %v1016_v17, %v1016_v17  ;;  %v1035_v30 = vsel %vm875_vm14, %v1016_v17, 0.0 }
 0x112   : > { %1097 = vst.msk [vmem:[%s1753_s28 + $0x8] sm:$0xf] %vm940_vm12, %v1089_v7  ;;  %v1067_v40 = vsel %vm875_vm14, %v1058_v28, 0.0 }
 0x114   : > { %v697_v58 = vpop.permute.xlu1 %696  ;;  %v695_v5 = vpop.permute.xlu0 %694 }
 0x115   : > { %718 = vst.msk [vmem:[#allocation2 + $0xc] sm:$0xf] %vm714_vm8, %v697_v58  ;;  %v1011_v19 = vpop.f32.mrf.mxu1 }
 0x116   : > { %717 = vst.msk [vmem:[#allocation2 + $0x8] sm:$0xf] %vm714_vm8, %v695_v5  ;;  %v1087_v20 = vpack.c.bf16 %v1011_v19, %v1011_v19  ;;  %v1056_v25 = vmul.f32 %v1011_v19, %v1011_v19  ;;  %v1032_v29 = vsel %vm875_vm14, %v1011_v19, 0.0 }
 0x117   : > { %775 = vst.msk [vmem:[#allocation2 + $0xc] sm:$0xf] %vm771_vm9, %v754_v57  ;;  %v1018_v9 = vpop.f32.mrf.mxu3 }
 0x118   : > { %v1090_v11 = vpack.c.bf16 %v1018_v9, %v1018_v9  ;;  %1095 = vst.msk [vmem:[%s1753_s28] sm:$0xf] %vm940_vm12, %v1087_v20  ;;  %v1059_v14 = vmul.f32 %v1018_v9, %v1018_v9  ;;  %v1064_v31 = vsel %vm875_vm14, %v1056_v25, 0.0  ;;  %v1037_v41 = vsel %vm875_vm14, %v1018_v9, 0.0  ;;  %v1055_v20 = vld [vmem:[%s1766_s8 + $0x1] sm:$0x1] }
 0x11a   : > { %1098 = vst.msk [vmem:[%s1753_s28 + $0xc] sm:$0xf] %vm940_vm12, %v1090_v11  ;;  %v1069_v44 = vsel %vm875_vm14, %v1059_v14, 0.0 }
 0x11c   : > { %v752_v59 = vpop.permute.xlu1 %751  ;;  %v647_v60 = vpop.permute.xlu0 %646 }
 0x11d   : > { %774 = vst.msk [vmem:[#allocation2 + $0x8] sm:$0xf] %vm771_vm9, %v752_v59  ;;  %v1013_v15 = vpop.f32.mrf.mxu1 }
 0x11e   : > { %664 = vst.msk [vmem:[#allocation2 + $0x1c] sm:$0xf] %vm656_vm7, %v647_v60  ;;  %v1033_v32 = vsel %vm875_vm14, %v1013_v15, 0.0  ;;  %v1057_v34 = vmul.f32 %v1013_v15, %v1013_v15  ;;  %v1088_v36 = vpack.c.bf16 %v1013_v15, %v1013_v15 }
 0x11f   : > { %v1021_v16 = vpop.f32.mrf.mxu3  ;;  %v1034_v37 = vadd.f32 %v1033_v32, %v1032_v29 }
 0x120   : > { %v1091_v18 = vpack.c.bf16 %v1021_v16, %v1021_v16  ;;  %v1060_v42 = vmul.f32 %v1021_v16, %v1021_v16  ;;  %v1065_v33 = vsel %vm875_vm14, %v1057_v34, 0.0  ;;  %1096 = vst.msk [vmem:[%s1753_s28 + $0x4] sm:$0xf] %vm940_vm12, %v1088_v36  ;;  %v1039_v45 = vsel %vm875_vm14, %v1021_v16, 0.0  ;;  %v1031_v16 = vld [vmem:[%s1766_s8] sm:$0x1] }
 0x121   : > { %v1036_v35 = vadd.f32 %v1035_v30, %v1034_v37  ;;  %v1066_v43 = vadd.f32 %v1065_v33, %v1064_v31 }
 0x122   : > { %1099 = vst.msk [vmem:[%s1753_s28 + $0x10] sm:$0xf] %vm940_vm12, %v1091_v18  ;;  %v1071_v23 = vsel %vm875_vm14, %v1060_v42, 0.0 }
 0x123   : > { %v1038_v48 = vadd.f32 %v1037_v41, %v1036_v35  ;;  %v1068_v21 = vadd.f32 %v1067_v40, %v1066_v43 }
 0x124   : > { %v703_v62 = vpop.permute.xlu0 %702  ;;  %v1367_v0 = vld [vmem:[#allocation2 + $0x8] sm:$0xff]  ;;  %v705_v1 = vpop.permute.xlu1 %704 }
 0x125   : > { %721 = vst.msk [vmem:[#allocation2 + $0x18] sm:$0xf] %vm714_vm8, %v703_v62  ;;  %1347 = vmatmul.msk.bf16.gmra.mxu0 %vm828_vm11, %v1367_v0  ;;  %v1070_v39 = vadd.f32 %v1069_v44, %v1068_v21  ;;  %v1040_v38 = vadd.f32 %v1039_v45, %v1038_v48 }
 0x126   : > { %722 = vst.msk [vmem:[#allocation2 + $0x1c] sm:$0xf] %vm714_vm8, %v705_v1 }
 0x127   : > { %778 = vst.msk [vmem:[#allocation2 + $0x18] sm:$0xf] %vm771_vm9, %v760_v61  ;;  %v1023_v26 = vpop.f32.mrf.mxu3  ;;  %v1072_v55 = vadd.f32 %v1071_v23, %v1070_v39 }
 0x128   : > { %v1092_v27 = vpack.c.bf16 %v1023_v26, %v1023_v26  ;;  %v1061_v46 = vmul.f32 %v1023_v26, %v1023_v26  ;;  %v1041_v49 = vsel %vm875_vm14, %v1023_v26, 0.0 }
 0x129   : > { %v1042_v54 = vadd.f32 %v1041_v49, %v1040_v38 }
 0x12a   : > { %1100 = vst.msk [vmem:[%s1753_s28 + $0x14] sm:$0xf] %vm940_vm12, %v1092_v27  ;;  %v1073_v52 = vsel %vm875_vm14, %v1061_v46, 0.0 }
 0x12b   : > { %v1074_v58 = vadd.f32 %v1073_v52, %v1072_v55 }
 0x12c   : > { %v762_v3 = vpop.permute.xlu0 %761 }
 0x12d   : > { %779 = vst.msk [vmem:[#allocation2 + $0x1c] sm:$0xf] %vm771_vm9, %v762_v3 }
 0x12f   : > { %v1026_v47 = vpop.f32.mrf.mxu3 }
 0x130   : > { %v1062_v50 = vmul.f32 %v1026_v47, %v1026_v47  ;;  %v1093_v51 = vpack.c.bf16 %v1026_v47, %v1026_v47  ;;  %v1043_v53 = vsel %vm875_vm14, %v1026_v47, 0.0 }
 0x131   : > { %v1044_v57 = vadd.f32 %v1043_v53, %v1042_v54 }
 0x132   : > { %1101 = vst.msk [vmem:[%s1753_s28 + $0x18] sm:$0xf] %vm940_vm12, %v1093_v51  ;;  %v1075_v56 = vsel %vm875_vm14, %v1062_v50, 0.0 }
 0x133   : > { %v1076_v59 = vadd.f32 %v1075_v56, %v1074_v58 }
 0x134   : > { %v1369_v63 = vld [vmem:[#allocation2 + $0x18] sm:$0xff] }
 0x135   : > { %1349 = vmatmul.msk.bf16.gmra.mxu2 %vm828_vm11, %v1369_v63 }
 0x137   : > { %v1028_v5 = vpop.f32.mrf.mxu3 }
 0x138   : > { %v1045_v60 = vsel %vm875_vm14, %v1028_v5, 0.0  ;;  %v1063_v61 = vmul.f32 %v1028_v5, %v1028_v5  ;;  %v1094_v62 = vpack.c.bf16 %v1028_v5, %v1028_v5 }
 0x139   : > { %v1046_v0 = vadd.f32 %v1045_v60, %v1044_v57 }
 0x13a   : > { %v1077_v1 = vsel %vm875_vm14, %v1063_v61, 0.0  ;;  %1102 = vst.msk [vmem:[%s1753_s28 + $0x1c] sm:$0xf] %vm940_vm12, %v1094_v62 }
 0x13b   : > { %v1047_v3 = vrot.slane %v1046_v0, 4  ;;  %v1078_v63 = vadd.f32 %v1077_v1, %v1076_v59 }
 0x13d   : > { %v1048_v17 = vadd.f32 %v1047_v3, %v1046_v0 }
 0x13f   : > { %v1049_v7 = vrot.slane %v1048_v17, 2 }
 0x153   : > { %v1746_v4 = vpop.f32.mrf.mxu0 }
 0x154   : > { %v932_v6 = vpack.c.bf16 %v1746_v4, %v1746_v4  ;;  %v901_v30 = vmul.f32 %v1746_v4, %v1746_v4  ;;  %v876_v31 = vsel %vm875_vm14, %v1746_v4, 0.0 }
 0x156   : > { %941 = vst.msk [vmem:[%s1744_s25] sm:$0xf] %vm940_vm12, %v932_v6  ;;  %v1079_v6 = vrot.slane %v1078_v63, 4  ;;  %v909_v37 = vsel %vm875_vm14, %v901_v30, 0.0 }
 0x158   : > { %v1080_v9 = vadd.f32 %v1079_v6, %v1078_v63 }
 0x15a   : > { %v1081_v11 = vrot.slane %v1080_v9, 2 }
 0x15b   : > { %v1759_v8 = vpop.f32.mrf.mxu0 }
 0x15c   : > { %v933_v2 = vpack.c.bf16 %v1759_v8, %v1759_v8  ;;  %v902_v28 = vmul.f32 %v1759_v8, %v1759_v8  ;;  %v877_v14 = vsel %vm875_vm14, %v1759_v8, 0.0 }
 0x15d   : > { %v878_v36 = vadd.f32 %v877_v14, %v876_v31 }
 0x15e   : > { %942 = vst.msk [vmem:[%s1744_s25 + $0x4] sm:$0xf] %vm940_vm12, %v933_v2  ;;  %v1050_v2 = vadd.f32 %v1049_v7, %v1048_v17  ;;  %v910_v32 = vsel %vm875_vm14, %v902_v28, 0.0 }
 0x15f   : > { %v911_v41 = vadd.f32 %v910_v32, %v909_v37 }
 0x160   : > { %v1051_v10 = vrot.slane %v1050_v2, 1 }
 0x161   : > { %v1778_v12 = vpop.f32.mrf.mxu2 }
 0x162   : > { %v936_v13 = vpack.c.bf16 %v1778_v12, %v1778_v12  ;;  %v1052_v18 = vadd.f32 %v1051_v10, %v1050_v2  ;;  %v905_v8 = vmul.f32 %v1778_v12, %v1778_v12  ;;  %v883_v46 = vsel %vm875_vm14, %v1778_v12, 0.0  ;;  %v874_v10 = vld [vmem:[%s1773_s10] sm:$0x1] }
 0x164   : > { %945 = vst.msk [vmem:[%s1744_s25 + $0x10] sm:$0xf] %vm940_vm12, %v936_v13  ;;  %v1082_v13 = vadd.f32 %v1081_v11, %v1080_v9  ;;  %v916_v23 = vsel %vm875_vm14, %v905_v8, 0.0 }
 0x166   : > { %v1083_v19 = vrot.slane %v1082_v13, 1 }
 0x168   : > { %v1084_v25 = vadd.f32 %v1083_v19, %v1082_v13 }
 0x169   : > { %v1787_v22 = vpop.f32.mrf.mxu2 }
 0x16a   : > { %v937_v24 = vpack.c.bf16 %v1787_v22, %v1787_v22  ;;  %v1085_v26 = vadd.f32 %v1084_v25, %v1055_v20  ;;  %v906_v39 = vmul.f32 %v1787_v22, %v1787_v22  ;;  %v885_v12 = vsel %vm875_vm14, %v1787_v22, 0.0 }
 0x16c   : > { %946 = vst.msk [vmem:[%s1744_s25 + $0x14] sm:$0xf] %vm940_vm12, %v937_v24  ;;  %v1053_v24 = vadd.f32 %v1052_v18, %v1031_v16  ;;  %v918_v54 = vsel %vm875_vm14, %v906_v39, 0.0  ;;  %v900_v18 = vld [vmem:[%s1773_s10 + $0x1] sm:$0x1] }
 0x16d   : > { %1086 = vst.msk [vmem:[%s1766_s8 + $0x1] sm:$0x1] %vm898_vm15, %v1085_v26 }
 0x16e   : > { %1054 = vst.msk [vmem:[%s1766_s8] sm:$0x1] %vm898_vm15, %v1053_v24 }
 0x1a2   : > { %v859_v27 = vpop.f32.mrf.mxu0 }
 0x1a3   : > { %v934_v29 = vpack.c.bf16 %v859_v27, %v859_v27  ;;  %v903_v15 = vmul.f32 %v859_v27, %v859_v27  ;;  %v879_v34 = vsel %vm875_vm14, %v859_v27, 0.0 }
 0x1a4   : > { %v880_v42 = vadd.f32 %v879_v34, %v878_v36 }
 0x1a5   : > { %943 = vst.msk [vmem:[%s1744_s25 + $0x8] sm:$0xf] %vm940_vm12, %v934_v29  ;;  %v912_v40 = vsel %vm875_vm14, %v903_v15, 0.0 }
 0x1a6   : > { %v913_v44 = vadd.f32 %v912_v40, %v911_v41 }
 0x1aa   : > { %v861_v33 = vpop.f32.mrf.mxu0 }
 0x1ab   : > { %v881_v35 = vsel %vm875_vm14, %v861_v33, 0.0  ;;  %v904_v4 = vmul.f32 %v861_v33, %v861_v33  ;;  %v935_v43 = vpack.c.bf16 %v861_v33, %v861_v33 }
 0x1ac   : > { %v882_v45 = vadd.f32 %v881_v35, %v880_v42 }
 0x1ad   : > { %v914_v47 = vsel %vm875_vm14, %v904_v4, 0.0  ;;  %944 = vst.msk [vmem:[%s1744_s25 + $0xc] sm:$0xf] %vm940_vm12, %v935_v43 }
 0x1ae   : > { %v884_v48 = vadd.f32 %v883_v46, %v882_v45  ;;  %v915_v21 = vadd.f32 %v914_v47, %v913_v44 }
 0x1b0   : > { %v917_v49 = vadd.f32 %v916_v23, %v915_v21  ;;  %v886_v53 = vadd.f32 %v885_v12, %v884_v48 }
 0x1b2   : > { %v919_v57 = vadd.f32 %v918_v54, %v917_v49 }
 0x1b8   : > { %v869_v50 = vpop.f32.mrf.mxu2 }
 0x1b9   : > { %v938_v51 = vpack.c.bf16 %v869_v50, %v869_v50  ;;  %v907_v38 = vmul.f32 %v869_v50, %v869_v50  ;;  %v887_v52 = vsel %vm875_vm14, %v869_v50, 0.0 }
 0x1ba   : > { %v888_v56 = vadd.f32 %v887_v52, %v886_v53 }
 0x1bb   : > { %947 = vst.msk [vmem:[%s1744_s25 + $0x18] sm:$0xf] %vm940_vm12, %v938_v51  ;;  %v920_v55 = vsel %vm875_vm14, %v907_v38, 0.0 }
 0x1bc   : > { %v921_v61 = vadd.f32 %v920_v55, %v919_v57 }
 0x1c0   : > { %v871_v58 = vpop.f32.mrf.mxu2 }
 0x1c1   : > { %v889_v5 = vsel %vm875_vm14, %v871_v58, 0.0  ;;  %v908_v59 = vmul.f32 %v871_v58, %v871_v58  ;;  %v939_v60 = vpack.c.bf16 %v871_v58, %v871_v58 }
 0x1c2   : > { %v890_v62 = vadd.f32 %v889_v5, %v888_v56 }
 0x1c3   : > { %v922_v22 = vsel %vm875_vm14, %v908_v59, 0.0  ;;  %948 = vst.msk [vmem:[%s1744_s25 + $0x1c] sm:$0xf] %vm940_vm12, %v939_v60 }
 0x1c4   : > { %v891_v0 = vrot.slane %v890_v62, 4  ;;  %v923_v1 = vadd.f32 %v922_v22, %v921_v61 }
 0x1c6   : > { %v892_v3 = vadd.f32 %v891_v0, %v890_v62  ;;  %v924_v63 = vrot.slane %v923_v1, 4 }
 0x1c8   : > { %v893_v17 = vrot.slane %v892_v3, 2  ;;  %v925_v6 = vadd.f32 %v924_v63, %v923_v1 }
 0x1ca   : > { %v894_v7 = vadd.f32 %v893_v17, %v892_v3  ;;  %v926_v9 = vrot.slane %v925_v6, 2 }
 0x1cc   : > { %v895_v2 = vrot.slane %v894_v7, 1  ;;  %v927_v11 = vadd.f32 %v926_v9, %v925_v6 }
 0x1ce   : > { %v896_v13 = vadd.f32 %v895_v2, %v894_v7  ;;  %v928_v16 = vrot.slane %v927_v11, 1 }
 0x1d0   : > { %v897_v19 = vadd.f32 %v896_v13, %v874_v10  ;;  %v929_v20 = vadd.f32 %v928_v16, %v927_v11 }
 0x1d2   : > { %899 = vst.msk [vmem:[%s1773_s10] sm:$0x1] %vm898_vm15, %v897_v19  ;;  %v930_v24 = vadd.f32 %v929_v20, %v900_v18 }
 0x1d4   : > { %931 = vst.msk [vmem:[%s1773_s10 + $0x1] sm:$0x1] %vm898_vm15, %v930_v24 }
 0x1d5 PF: > { %s17_s21 = sadd.s32 1, %s1400_s21  }
 0x1d6   : > { %p14_p5 = scmp.ge.s32.totalorder %s17_s21, 4  }
 0x1d8   :  { %16 = sbr.rel (!%p14_p5) target bundleno = 1 (0x1), region = 103 }

// kernel: basic_block_forward.4
= control target key start
LH: loop header
LB: loop body
LE: loop exit
PB: predicated region body
PF: predicated region fallthrough
CT: control target
= control target key end

     0   :  { %s1846_s18 = smov 0   ;;  %s2347_s0 = inlined_call_operand.vmem [shape: bf16[2,8,8,8], index: 0, kind: input, shape index: {}]   ;;  %s2348_s1 = inlined_call_operand.vmem [shape: bf16[72,8], index: 1, kind: input, shape index: {}]   ;;  %s2349_s2 = inlined_call_operand.vmem [shape: f32[1,8], index: 2, kind: input, shape index: {}]   ;;  %s2350_s3 = inlined_call_operand.vmem [shape: f32[1,8], index: 3, kind: input, shape index: {}]   ;;  %s2351_s4 = inlined_call_operand.vmem [shape: bf16[2,8,8,8], index: 4, kind: output, shape index: {0}]   ;;  %s2352_s5 = inlined_call_operand.vmem [shape: f32[2,2,8], index: 5, kind: output, shape index: {1}]  }
   0x1 LB: > { %s1662_s19 = sadd.s32 4294967295, %s1804_s18   ;;  %p1666_p0 = scmp.ge.s32.totalorder %s1804_s18, 1  ;;  %s1804_s18 = sphi %s1846_s18, %s16_s18  }
   0x2   : > { %p190_p1 = scmp.lt.s32.totalorder %s1804_s18, 3 }
   0x4   : > { %p191_p2 = pnand %p1666_p0, %p190_p1 }
   0x5   : > { %p222_p3 = scmp.lt.s32.totalorder (!%p191_p2), %s1662_s19, 1  ;;  %s1807_s28 = smov (!%p191_p2), 16  }
   0x6   : > { %194 = sbr.rel (%p191_p2) target bundleno = 489 (0x1e9), region = 36  ;;  %s1808_s29 = smov (!%p191_p2), 8  }
   0x7   : > { %s1809_s30 = smov (!%p191_p2), 24   ;;  %s1810_s6 = smov (!%p191_p2), 40  }
   0x8   : > { %s1811_s7 = smov (!%p191_p2), 32   ;;  %s1812_s8 = smov (!%p191_p2), 48  }
   0x9   : > { %s1813_s9 = smov (!%p191_p2), 56   ;;  %s1814_s10 = smov (!%p191_p2), 64  }
   0xb   : > { %vm237_vm0 = vcmask 60416   ;;  %vm239_vm1 = vcmask 57344   ;;  %vm245_vm2 = vsmask.f32 256  ;;  %v1806_v0 = vmov 0   ;;  %s2364_s19 = smov (!%p222_p3, %s1662_s19), 1 }
   0xc   : > { %238 = vst.msk [vmem:[#allocation2] sm:$0xf] %vm237_vm0, %v1806_v0  ;;  %vm277_vm3 = vsmask.f32 7938  ;;  %vm1857_vm4 = vmand %vm239_vm1, %vm245_vm2  ;;  %v253_v2 = vld [vmem:[#allocation2 + $0x10] sm:$0x1] }
   0xd   : > { %240 = vst.msk [vmem:[#allocation2 + $0x4] sm:$0x1] %vm239_vm1, %v1806_v0  ;;  %v254_v3 = vsel %vm1857_vm4, 0, %v253_v2  ;;  %v262_v4 = vld [vmem:[#allocation2 + $0x28] sm:$0x1]  ;;  %vm1869_vm5 = vmand %vm239_vm1, %vm277_vm3  ;;  %s1734_s20 = sshll.u32 %s2364_s19, 5 }
   0xe   : > { %242 = vst.msk [vmem:[#allocation2 + $0x48] sm:$0xf] %vm237_vm0, %v1806_v0  ;;  %v1877_v6 = vld [vmem:[%s2349_s2] ss:$0 sm:$0xff]  ;;  %v263_v7 = vsel %vm1857_vm4, 0, %v262_v4  ;;  %s1886_s25 = scalar_lea.vmem %s2347_s0, %s1734_s20  ;;  %vm710_vm6 = vcmask 1042432   ;;  %vm1943_vm12 = vmand %vm237_vm0, %vm277_vm3  ;;  %s2297_s26 = scalar_lea.vmem %s2351_s4, %s1734_s20 }
   0xf   : > { %243 = vst.msk [vmem:[#allocation2 + $0x4c] sm:$0x1] %vm239_vm1, %v1806_v0  ;;  %v250_v8 = vld [vmem:[#allocation2 + $0x8] sm:$0x1]  ;;  %v1891_v10 = vld [vmem:[%s2350_s3] ss:$0 sm:$0xff] }
  0x10   : > { %255 = vst [vmem:[#allocation2 + $0x10] sm:$0x1] %v254_v3  ;;  %v282_v11 = vld [vmem:[#allocation2 + $0xc] sm:$0x1]  ;;  %v1745_v14 = vld [vmem:[%s1886_s25] sm:$0xff]   ;;  %v1761_v15 = vld [vmem:[%s1886_s25 + $0x10] sm:$0xff]  }
  0x11   : > { %264 = vst [vmem:[#allocation2 + $0x28] sm:$0x1] %v263_v7  ;;  %v1747_v17 = vunpack.c.h.bf16 %v1745_v14  ;;  %v1754_v18 = vunpack.c.l.bf16 %v1761_v15  ;;  %v251_v19 = vsel %vm1857_vm4, 0, %v250_v8  ;;  %v259_v20 = vld [vmem:[#allocation2 + $0x20] sm:$0x1]  ;;  %v1746_v21 = vunpack.c.l.bf16 %v1745_v14  ;;  %v1910_v29 = vld [vmem:[%s1886_s25 + $0x8] sm:$0xff]  }
  0x12   : > { %vm530_vm7 = vsmask.f32 3328  ;;  %v283_v22 = vsel %vm1869_vm5, 0, %v282_v11  ;;  %v260_v23 = vsel %vm1857_vm4, 0, %v259_v20  ;;  %v291_v24 = vld [vmem:[#allocation2 + $0x24] sm:$0x1]  ;;  %v1755_v25 = vunpack.c.h.bf16 %v1761_v15 }
  0x13   : > { %v247_v9 = vld [vmem:[#allocation2] sm:$0x1]  ;;  %vm531_vm8 = vsmask.f32 7440  ;;  %v330_v26 = vmul.f32 %v1877_v6, %v1747_v17  ;;  %v333_v27 = vmul.f32 %v1877_v6, %v1754_v18  ;;  %252 = vst [vmem:[#allocation2 + $0x8] sm:$0x1] %v251_v19  ;;  %v329_v31 = vmul.f32 %v1877_v6, %v1746_v21 }
  0x14   : > { %v279_v12 = vld [vmem:[#allocation2 + $0x4] sm:$0x1]  ;;  %v248_v13 = vsel %vm1857_vm4, 0, %v247_v9  ;;  %v292_v28 = vsel %vm1869_vm5, 0, %v291_v24  ;;  %v678_v30 = vld [vmem:[#allocation2] sm:$0xe]  ;;  %v1751_v32 = vunpack.c.h.bf16 %v1910_v29  ;;  %v334_v34 = vmul.f32 %v1877_v6, %v1755_v25  ;;  %vm1937_vm11 = vmor %vm530_vm7, %vm531_vm8 }
  0x15   : > { %v280_v16 = vsel %vm1869_vm5, 0, %v279_v12  ;;  %249 = vst [vmem:[#allocation2] sm:$0x1] %v248_v13  ;;  %v265_v33 = vld [vmem:[#allocation2 + $0x30] sm:$0x1]  ;;  %vm711_vm9 = vcmask 1046532   ;;  %v342_v35 = vadd.f32 %v1891_v10, %v330_v26  ;;  %v345_v36 = vadd.f32 %v1891_v10, %v333_v27 }
  0x16   : > { %281 = vst [vmem:[#allocation2 + $0x4] sm:$0x1] %v280_v16  ;;  %v266_v37 = vsel %vm1857_vm4, 0, %v265_v33  ;;  %v285_v38 = vld [vmem:[#allocation2 + $0x14] sm:$0x1]  ;;  %v341_v39 = vadd.f32 %v1891_v10, %v329_v31  ;;  %v332_v40 = vmul.f32 %v1877_v6, %v1751_v32  ;;  %v346_v41 = vadd.f32 %v1891_v10, %v334_v34  ;;  %vm1928_vm10 = vmor %vm710_vm6, %vm711_vm9  ;;  %s1671_s27 = sshll.u32 %s2364_s19, 1 }
  0x17   : > { %284 = vst [vmem:[#allocation2 + $0xc] sm:$0x1] %v283_v22  ;;  %v286_v42 = vsel %vm1869_vm5, 0, %v285_v38  ;;  %v1672_v43 = vrot.slane %v678_v30, 9  ;;  %v350_v44 = vmax.f32 %v342_v35, 0.0  ;;  %v353_v45 = vmax.f32 %v345_v36, 0.0  ;;  %s2307_s20 = scalar_lea.vmem %s2352_s5, %s1671_s27 }
  0x18   : > { %261 = vst [vmem:[#allocation2 + $0x20] sm:$0x1] %v260_v23  ;;  %v349_v47 = vmax.f32 %v341_v39, 0.0  ;;  %v344_v48 = vadd.f32 %v1891_v10, %v332_v40  ;;  %v354_v49 = vmax.f32 %v346_v41, 0.0  ;;  %v1750_v50 = vunpack.c.l.bf16 %v1910_v29  ;;  %v294_v3 = vld [vmem:[#allocation2 + $0x2c] sm:$0x1] }
  0x19   : > { %293 = vst [vmem:[#allocation2 + $0x24] sm:$0x1] %v292_v28  ;;  %v358_v56 = vpack.c.bf16 %v350_v44, %v350_v44  ;;  %v361_v57 = vpack.c.bf16 %v353_v45, %v353_v45  ;;  %v454_v14 = vld [vmem:[#allocation2 + $0x10] sm:$0xf]  ;;  %v472_v19 = vld [vmem:[#allocation2 + $0x28] sm:$0xf] }
  0x1a   : > { %267 = vst [vmem:[#allocation2 + $0x30] sm:$0x1] %v266_v37  ;;  %v357_v60 = vpack.c.bf16 %v349_v47, %v349_v47  ;;  %v352_v61 = vmax.f32 %v344_v48, 0.0  ;;  %v448_v20 = vld [vmem:[#allocation2 + $0x8] sm:$0xf]  ;;  %v362_v22 = vpack.c.bf16 %v354_v49, %v354_v49  ;;  %v295_v23 = vsel %vm1869_vm5, 0, %v294_v3 }
  0x1b   : > { %287 = vst [vmem:[#allocation2 + $0x14] sm:$0x1] %v286_v42  ;;  %v374_v0 = vshrl.u32 %v358_v56, 16  ;;  %v377_v2 = vshll.u32 %v358_v56, 16  ;;  %v398_v8 = vshrl.u32 %v361_v57, 16  ;;  %v401_v9 = vshll.u32 %v361_v57, 16 }
  0x1c   : > { %v514_v46 = vld [vmem:[#allocation2] sm:$0xf]  ;;  %v366_v15 = vshrl.u32 %v357_v60, 16  ;;  %v369_v16 = vshll.u32 %v357_v60, 16  ;;  %v360_v21 = vpack.c.bf16 %v352_v61, %v352_v61  ;;  %296 = vst [vmem:[#allocation2 + $0x2c] sm:$0x1] %v295_v23  ;;  %v331_v33 = vmul.f32 %v1877_v6, %v1750_v50 }
  0x1d   : > { %v679_v51 = vld [vmem:[#allocation2 + $0x4] sm:$0x1]  ;;  %v534_v54 = vshrl.u32 %v514_v46, 16  ;;  %v537_v55 = vshll.u32 %v514_v46, 16  ;;  %v376_v13 = vrot.slane %v374_v0, 7  ;;  %v400_v18 = vrot.slane %v398_v8, 7 }
  0x1e   : > { %v515_v53 = vld [vmem:[#allocation2 + $0x4] sm:$0x1]  ;;  %v715_v58 = vrot.slane %v679_v51, 5  ;;  %v368_v27 = vrot.slane %v366_v15, 7  ;;  %v451_v28 = vld [vmem:[#allocation2 + $0xc] sm:$0x1] }
  0x1f   : > { %v543_v59 = vshll.u32 %v515_v53, 16  ;;  %v536_v62 = vrot.slane %v534_v54, 4  ;;  %v539_v63 = vrot.slane %v537_v55, 5  ;;  %v379_v25 = vor.u32 %v377_v2, %v376_v13  ;;  %v466_v44 = vld [vmem:[#allocation2 + $0x20] sm:$0xf] }
  0x20   : > { %v716_v4 = vsel %vm1928_vm10, %v1672_v43, %v715_v58  ;;  %v380_v26 = vrot.slane %v376_v13, 4  ;;  %v403_v29 = vor.u32 %v401_v9, %v400_v18  ;;  %v390_v30 = vshrl.u32 %v360_v21, 16  ;;  %v469_v45 = vld [vmem:[#allocation2 + $0x24] sm:$0x1]  ;;  %v1971_v57 = vld [vmem:[#allocation2 + $0x18] sm:$0x1] }
  0x21   : > { %v545_v7 = vrot.slane %v543_v59, 5  ;;  %745 = vrot.lane.b32.xlu1 %v716_v4, %s1807_s28  ;;  %v540_v12 = vor.u32 %v539_v63, %v536_v62  ;;  %v393_v31 = vshll.u32 %v360_v21, 16  ;;  %v455_v35 = vsel %vm1943_vm12, %v379_v25, %v454_v14  ;;  %v478_v51 = vld [vmem:[#allocation2 + $0x30] sm:$0xf]  ;;  %v1977_v61 = vld [vmem:[#allocation2 + $0x1c] sm:$0x1] }
  0x22   : > { %v457_v32 = vld [vmem:[#allocation2 + $0x14] sm:$0x1]  ;;  %v371_v36 = vor.u32 %v369_v16, %v368_v27  ;;  %v372_v37 = vrot.slane %v368_v27, 4  ;;  %456 = vst [vmem:[#allocation2 + $0x10] sm:$0xf] %v455_v35  ;;  %v473_v38 = vsel %vm1943_vm12, %v403_v29, %v472_v19  ;;  %v392_v39 = vrot.slane %v390_v30, 7 }
  0x23   : > { %v541_v24 = vrot.slane %v540_v12, 4  ;;  %v406_v40 = vshrl.u32 %v362_v22, 16  ;;  %v409_v41 = vshll.u32 %v362_v22, 16  ;;  %474 = vst [vmem:[#allocation2 + $0x28] sm:$0xf] %v473_v38  ;;  %v458_v46 = vsel %vm1857_vm4, %v380_v26, %v457_v32  ;;  %v1992_v21 = vld [vmem:[%s1886_s25 + $0x18] sm:$0xff]  }
  0x24   : > { %v449_v42 = vsel %vm1943_vm12, %v371_v36, %v448_v20  ;;  %v452_v43 = vsel %vm1857_vm4, %v372_v37, %v451_v28  ;;  %v404_v47 = vrot.slane %v400_v18, 4  ;;  %v395_v48 = vor.u32 %v393_v31, %v392_v39  ;;  %459 = vst [vmem:[#allocation2 + $0x14] sm:$0x1] %v458_v46  ;;  %v475_v58 = vld [vmem:[#allocation2 + $0x2c] sm:$0x1] }
  0x25   : > { %v546_v34 = vsel %vm1937_vm11, %v541_v24, %v545_v7  ;;  %450 = vst [vmem:[#allocation2 + $0x8] sm:$0xf] %v449_v42  ;;  %v396_v49 = vrot.slane %v392_v39, 4  ;;  %v1963_v50 = vrot.slane %v406_v40, 7  ;;  %v343_v53 = vadd.f32 %v1891_v10, %v331_v33 }
  0x26   : > { %645 = vrot.lane.b32.xlu0 %v546_v34, %s1808_s29  ;;  %453 = vst [vmem:[#allocation2 + $0xc] sm:$0x1] %v452_v43  ;;  %v467_v54 = vsel %vm1943_vm12, %v395_v48, %v466_v44  ;;  %v476_v60 = vsel %vm1857_vm4, %v404_v47, %v475_v58  ;;  %v257_v0 = vsel %vm1857_vm4, 0, %v1971_v57  ;;  %v289_v14 = vsel %vm1869_vm5, 0, %v1977_v61 }
  0x27   : > { %v470_v55 = vsel %vm1857_vm4, %v396_v49, %v469_v45  ;;  %v411_v56 = vor.u32 %v409_v41, %v1963_v50  ;;  %468 = vst [vmem:[#allocation2 + $0x20] sm:$0xf] %v467_v54  ;;  %v351_v62 = vmax.f32 %v343_v53, 0.0  ;;  %v1758_v38 = vunpack.c.l.bf16 %v1992_v21 }
  0x28   : > { %471 = vst [vmem:[#allocation2 + $0x24] sm:$0x1] %v470_v55  ;;  %vm669_vm13 = vcmask 126016   ;;  %vm769_vm14 = vcmask 191616   ;;  %vm818_vm15 = vcmask 257216   ;;  %vm979_vm2 = vcmask 322816  }
  0x29   : > { %v479_v59 = vsel %vm1943_vm12, %v411_v56, %v478_v51  ;;  %v779_v63 = vld [vmem:[#allocation2 + $0x10] sm:$0xf]  ;;  %477 = vst [vmem:[#allocation2 + $0x2c] sm:$0x1] %v476_v60  ;;  %v359_v15 = vpack.c.bf16 %v351_v62, %v351_v62  ;;  %vm1076_vm3 = vcmask 388416   ;;  %vm1287_vm6 = vcmask 519616  }
  0x2a   : > { %480 = vst [vmem:[#allocation2 + $0x30] sm:$0xf] %v479_v59  ;;  %796 = vrot.lane.b32.xlu1 %v779_v63, %s1809_s30  ;;  %v782_v2 = vld [vmem:[#allocation2 + $0x28] sm:$0xf]  ;;  %v1983_v3 = vld [vmem:[#allocation2 + $0x10] sm:$0xe] }
  0x2b   : > { %802 = vrot.lane.b32.xlu2 %v782_v2, %s1809_s30  ;;  %v1681_v20 = vrot.slane %v1983_v3, 9  ;;  %v991_v23 = vld [vmem:[#allocation2 + $0x14] sm:$0x1]  ;;  %v688_v28 = vld [vmem:[#allocation2 + $0x28] sm:$0xe]  ;;  %v382_v37 = vshrl.u32 %v359_v15, 16 }
  0x2c   : > { %v778_v4 = vld [vmem:[#allocation2 + $0x8] sm:$0xf]  ;;  %v1026_v34 = vrot.slane %v991_v23, 5  ;;  %v1677_v40 = vrot.slane %v688_v28, 9  ;;  %258 = vst [vmem:[#allocation2 + $0x18] sm:$0x1] %v257_v0 }
  0x2d   : > { %v680_v7 = vld [vmem:[#allocation2 + $0x8] sm:$0xe]  ;;  %v681_v9 = vld [vmem:[#allocation2 + $0xc] sm:$0x1]  ;;  %v384_v54 = vrot.slane %v382_v37, 7  ;;  %v385_v61 = vshll.u32 %v359_v15, 16 }
  0x2e   : > { %v988_v8 = vld [vmem:[#allocation2 + $0x8] sm:$0xe]  ;;  %794 = vrot.lane.b32.xlu0 %v778_v4, %s1809_s30  ;;  %v1673_v12 = vrot.slane %v680_v7, 9  ;;  %v989_v13 = vld [vmem:[#allocation2 + $0xc] sm:$0x1]  ;;  %v719_v16 = vrot.slane %v681_v9, 5  ;;  %v335_v4 = vmul.f32 %v1877_v6, %v1758_v38  ;;  %v1027_v0 = vsel %vm1928_vm10, %v1681_v20, %v1026_v34 }
  0x2f   : > { %v1680_v18 = vrot.slane %v988_v8, 9  ;;  %v1022_v19 = vrot.slane %v989_v13, 5  ;;  %v686_v22 = vld [vmem:[#allocation2 + $0x20] sm:$0xe]  ;;  %v827_v24 = vld [vmem:[#allocation2 + $0x8] sm:$0xf]  ;;  %v387_v8 = vor.u32 %v385_v61, %v384_v54 }
  0x30   : > { %v720_v25 = vsel %vm1928_vm10, %v1673_v12, %v719_v16  ;;  %v687_v26 = vld [vmem:[#allocation2 + $0x24] sm:$0x1]  ;;  %v1676_v27 = vrot.slane %v686_v22, 9  ;;  %v844_v29 = vshrl.u32 %v827_v24, 16  ;;  %v828_v32 = vld [vmem:[#allocation2 + $0xc] sm:$0x1]  ;;  %v347_v37 = vadd.f32 %v1891_v10, %v335_v4 }
  0x31   : > { %v731_v30 = vrot.slane %v687_v26, 5  ;;  %v783_v31 = vld [vmem:[#allocation2 + $0x30] sm:$0xf]  ;;  %v847_v33 = vshll.u32 %v827_v24, 16  ;;  %v689_v35 = vld [vmem:[#allocation2 + $0x2c] sm:$0x1]  ;;  %v1023_v63 = vsel %vm1928_vm10, %v1680_v18, %v1022_v19 }
  0x32   : > { %v522_v36 = vld [vmem:[#allocation2 + $0x20] sm:$0xf]  ;;  %747 = vrot.lane.b32.xlu1 %v720_v25, %s1807_s28  ;;  %v846_v41 = vrot.slane %v844_v29, 4  ;;  %v523_v43 = vld [vmem:[#allocation2 + $0x24] sm:$0x1]  ;;  %v735_v44 = vrot.slane %v689_v35, 5 }
  0x33   : > { %v732_v39 = vsel %vm1928_vm10, %v1676_v27, %v731_v30  ;;  %v849_v42 = vrot.slane %v847_v33, 5  ;;  %v853_v45 = vshll.u32 %v828_v32, 16  ;;  %v590_v46 = vshrl.u32 %v522_v36, 16  ;;  %v516_v48 = vld [vmem:[#allocation2 + $0x8] sm:$0xf] }
  0x34   : > { %753 = vrot.lane.b32.xlu2 %v732_v39, %s1807_s28  ;;  %v593_v47 = vshll.u32 %v522_v36, 16  ;;  %v599_v49 = vshll.u32 %v523_v43, 16  ;;  %v548_v51 = vshrl.u32 %v516_v48, 16  ;;  %v551_v53 = vshll.u32 %v516_v48, 16  ;;  %v517_v57 = vld [vmem:[#allocation2 + $0xc] sm:$0x1] }
  0x35   : > { %v592_v55 = vrot.slane %v590_v46, 4  ;;  %290 = vst [vmem:[#allocation2 + $0x1c] sm:$0x1] %v289_v14  ;;  %v850_v58 = vor.u32 %v849_v42, %v846_v41  ;;  %v518_v62 = vld [vmem:[#allocation2 + $0x10] sm:$0xf]  ;;  %v736_v7 = vsel %vm1928_vm10, %v1677_v40, %v735_v44  ;;  %v557_v14 = vshll.u32 %v517_v57, 16 }
  0x36   : > { %804 = vrot.lane.b32.xlu0 %v783_v31, %s1809_s30  ;;  %v595_v56 = vrot.slane %v593_v47, 5  ;;  %v550_v59 = vrot.slane %v548_v51, 4  ;;  %v553_v60 = vrot.slane %v551_v53, 5  ;;  %v562_v3 = vshrl.u32 %v518_v62, 16  ;;  %v524_v12 = vld [vmem:[#allocation2 + $0x28] sm:$0xf] }
  0x37   : > { %v565_v9 = vshll.u32 %v518_v62, 16  ;;  %v388_v15 = vrot.slane %v384_v54, 4  ;;  %v604_v16 = vshrl.u32 %v524_v12, 16  ;;  %v851_v18 = vrot.slane %v850_v58, 4  ;;  %v519_v23 = vld [vmem:[#allocation2 + $0x14] sm:$0x1] }
  0x38   : > { %v596_v2 = vor.u32 %v595_v56, %v592_v55  ;;  %v554_v13 = vor.u32 %v553_v60, %v550_v59  ;;  %v855_v19 = vrot.slane %v853_v45, 5  ;;  %v601_v22 = vrot.slane %v599_v49, 5  ;;  %v460_v25 = vld [vmem:[#allocation2 + $0x18] sm:$0xf]  ;;  %v525_v27 = vld [vmem:[#allocation2 + $0x2c] sm:$0x1] }
  0x39   : > { %v607_v24 = vshll.u32 %v524_v12, 16  ;;  %v564_v26 = vrot.slane %v562_v3, 4  ;;  %v461_v28 = vsel %vm1943_vm12, %v387_v8, %v460_v25  ;;  %v567_v30 = vrot.slane %v565_v9, 5  ;;  %v297_v36 = vld [vmem:[#allocation2 + $0x34] sm:$0x1] }
  0x3a   : > { %1052 = vrot.lane.b32.xlu1 %v1023_v63, %s1810_s6  ;;  %v597_v20 = vrot.slane %v596_v2, 4  ;;  %v606_v31 = vrot.slane %v604_v16, 4  ;;  %v555_v33 = vrot.slane %v554_v13, 4  ;;  %v559_v34 = vrot.slane %v557_v14, 5  ;;  %462 = vst [vmem:[#allocation2 + $0x18] sm:$0xf] %v461_v28 }
  0x3b   : > { %v609_v32 = vrot.slane %v607_v24, 5  ;;  %v571_v38 = vshll.u32 %v519_v23, 16  ;;  %v298_v39 = vsel %vm1869_vm5, 0, %v297_v36  ;;  %v856_v40 = vsel %vm1937_vm11, %v851_v18, %v855_v19  ;;  %v829_v43 = vld [vmem:[#allocation2 + $0x10] sm:$0xf] }
  0x3c   : > { %1054 = vrot.lane.b32.xlu2 %v1027_v0, %s1810_s6  ;;  %v463_v29 = vld [vmem:[#allocation2 + $0x1c] sm:$0x1]  ;;  %v602_v41 = vsel %vm1937_vm11, %v597_v20, %v601_v22  ;;  %v613_v42 = vshll.u32 %v525_v27, 16  ;;  %299 = vst [vmem:[#allocation2 + $0x34] sm:$0x1] %v298_v39  ;;  %v568_v44 = vor.u32 %v567_v30, %v564_v26  ;;  %v858_v46 = vshrl.u32 %v829_v43, 16 }
  0x3d   : > { %v464_v35 = vsel %vm1857_vm4, %v388_v15, %v463_v29  ;;  %v610_v45 = vor.u32 %v609_v32, %v606_v31  ;;  %v861_v47 = vshll.u32 %v829_v43, 16  ;;  %v412_v48 = vrot.slane %v1963_v50, 4  ;;  %v2026_v51 = vld [vmem:[#allocation2 + $0x10] sm:$0xe]  ;;  %v2028_v53 = vld [vmem:[#allocation2 + $0x14] sm:$0x1] }
  0x3e   : > { %755 = vrot.lane.b32.xlu0 %v736_v7, %s1807_s28  ;;  %465 = vst [vmem:[#allocation2 + $0x1c] sm:$0x1] %v464_v35  ;;  %v560_v49 = vsel %vm1937_vm11, %v555_v33, %v559_v34  ;;  %v268_v54 = vld [vmem:[#allocation2 + $0x38] sm:$0x1]  ;;  %v355_v55 = vmax.f32 %v347_v37, 0.0  ;;  %v573_v56 = vrot.slane %v571_v38, 5 }
  0x3f   : > { %v830_v57 = vld [vmem:[#allocation2 + $0x14] sm:$0x1]  ;;  %v269_v58 = vsel %vm1857_vm4, 0, %v268_v54  ;;  %v300_v59 = vld [vmem:[#allocation2 + $0x3c] sm:$0x1]  ;;  %v615_v50 = vrot.slane %v613_v42, 5 }
  0x40   : > { %v860_v60 = vrot.slane %v858_v46, 4  ;;  %v863_v61 = vrot.slane %v861_v47, 5  ;;  %270 = vst [vmem:[#allocation2 + $0x38] sm:$0x1] %v269_v58  ;;  %v301_v62 = vsel %vm1869_vm5, 0, %v300_v59  ;;  %v569_v2 = vrot.slane %v568_v44, 4 }
  0x41   : > { %v520_v63 = vld [vmem:[#allocation2 + $0x18] sm:$0xf]  ;;  %v611_v3 = vrot.slane %v610_v45, 4  ;;  %302 = vst [vmem:[#allocation2 + $0x3c] sm:$0x1] %v301_v62  ;;  %v363_v4 = vpack.c.bf16 %v355_v55, %v355_v55  ;;  %v1674_v13 = vrot.slane %v2026_v51, 9 }
  0x42   : > { %955 = vrot.lane.b32.xlu1 %v856_v40, %s1811_s7  ;;  %v576_v7 = vshrl.u32 %v520_v63, 16  ;;  %v579_v8 = vshll.u32 %v520_v63, 16  ;;  %v837_v9 = vld [vmem:[#allocation2 + $0x30] sm:$0xf]  ;;  %v723_v14 = vrot.slane %v2028_v53, 5  ;;  %v867_v16 = vshll.u32 %v830_v57, 16 }
  0x43   : > { %v481_v15 = vld [vmem:[#allocation2 + $0x34] sm:$0x1]  ;;  %v864_v23 = vor.u32 %v863_v61, %v860_v60  ;;  %v835_v24 = vld [vmem:[#allocation2 + $0x28] sm:$0xf]  ;;  %v616_v20 = vsel %vm1937_vm11, %v611_v3, %v615_v50  ;;  %v914_v25 = vshrl.u32 %v837_v9, 16  ;;  %v414_v26 = vshrl.u32 %v363_v4, 16 }
  0x44   : > { %653 = vrot.lane.b32.xlu2 %v602_v41, %s1808_s29  ;;  %v578_v18 = vrot.slane %v576_v7, 4  ;;  %v581_v19 = vrot.slane %v579_v8, 5  ;;  %v482_v22 = vsel %vm1857_vm4, %v412_v48, %v481_v15  ;;  %v417_v27 = vshll.u32 %v363_v4, 16  ;;  %v684_v32 = vld [vmem:[#allocation2 + $0x18] sm:$0xe] }
  0x45   : > { %v521_v0 = vld [vmem:[#allocation2 + $0x1c] sm:$0x1]  ;;  %483 = vst [vmem:[#allocation2 + $0x34] sm:$0x1] %v482_v22  ;;  %v574_v30 = vsel %vm1937_vm11, %v569_v2, %v573_v56  ;;  %v917_v31 = vshll.u32 %v837_v9, 16  ;;  %v869_v33 = vrot.slane %v867_v16, 5  ;;  %v724_v62 = vsel %vm1928_vm10, %v1674_v13, %v723_v14 }
  0x46   : > { %647 = vrot.lane.b32.xlu0 %v560_v49, %s1808_s29  ;;  %v585_v12 = vshll.u32 %v521_v0, 16  ;;  %v582_v28 = vor.u32 %v581_v19, %v578_v18  ;;  %v416_v34 = vrot.slane %v414_v26, 7  ;;  %v900_v35 = vshrl.u32 %v835_v24, 16  ;;  %v685_v41 = vld [vmem:[#allocation2 + $0x1c] sm:$0x1] }
  0x47   : > { %v903_v36 = vshll.u32 %v835_v24, 16  ;;  %v865_v38 = vrot.slane %v864_v23, 4  ;;  %v484_v39 = vld [vmem:[#allocation2 + $0x38] sm:$0xf]  ;;  %v916_v47 = vrot.slane %v914_v25, 4  ;;  %v919_v48 = vrot.slane %v917_v31, 5 }
  0x48   : > { %v587_v29 = vrot.slane %v585_v12, 5  ;;  %v583_v37 = vrot.slane %v582_v28, 4  ;;  %v487_v40 = vld [vmem:[#allocation2 + $0x3c] sm:$0x1]  ;;  %v419_v42 = vor.u32 %v417_v27, %v416_v34  ;;  %v420_v43 = vrot.slane %v416_v34, 4 }
  0x49   : > { %v902_v44 = vrot.slane %v900_v35, 4  ;;  %v905_v45 = vrot.slane %v903_v36, 5  ;;  %v526_v49 = vld [vmem:[#allocation2 + $0x30] sm:$0xf]  ;;  %v836_v51 = vld [vmem:[#allocation2 + $0x2c] sm:$0x1]  ;;  %v870_v58 = vsel %vm1937_vm11, %v865_v38, %v869_v33  ;;  %v920_v63 = vor.u32 %v919_v48, %v916_v47 }
  0x4a   : > { %v588_v46 = vsel %vm1937_vm11, %v583_v37, %v587_v29  ;;  %v485_v53 = vsel %vm1943_vm12, %v419_v42, %v484_v39  ;;  %v488_v54 = vsel %vm1857_vm4, %v420_v43, %v487_v40  ;;  %v1675_v55 = vrot.slane %v684_v32, 9  ;;  %v1086_v26 = vld [vmem:[#allocation2 + $0x10] sm:$0xf]  ;;  %v1087_v34 = vld [vmem:[#allocation2 + $0x18] sm:$0xf] }
  0x4b   : > { %651 = vrot.lane.b32.xlu1 %v588_v46, %s1808_s29  ;;  %v727_v56 = vrot.slane %v685_v41, 5  ;;  %486 = vst [vmem:[#allocation2 + $0x38] sm:$0xf] %v485_v53  ;;  %v618_v59 = vshrl.u32 %v526_v49, 16  ;;  %v621_v50 = vshll.u32 %v526_v49, 16  ;;  %v906_v60 = vor.u32 %v905_v45, %v902_v44 }
  0x4c   : > { %655 = vrot.lane.b32.xlu2 %v616_v20, %s1808_s29  ;;  %v838_v57 = vld [vmem:[#allocation2 + $0x34] sm:$0x1]  ;;  %489 = vst [vmem:[#allocation2 + $0x3c] sm:$0x1] %v488_v54  ;;  %v909_v61 = vshll.u32 %v836_v51, 16  ;;  %v921_v9 = vrot.slane %v920_v63, 4 }
  0x4d   : > { %v923_v2 = vshll.u32 %v838_v57, 16  ;;  %v728_v3 = vsel %vm1928_vm10, %v1675_v55, %v727_v56  ;;  %v620_v4 = vrot.slane %v618_v59, 4  ;;  %v623_v0 = vrot.slane %v621_v50, 5  ;;  %v527_v16 = vld [vmem:[#allocation2 + $0x34] sm:$0x1] }
  0x4e   : > { %649 = vrot.lane.b32.xlu0 %v574_v30, %s1808_s29  ;;  %v907_v7 = vrot.slane %v906_v60, 4  ;;  %v911_v8 = vrot.slane %v909_v61, 5  ;;  %v627_v25 = vshll.u32 %v527_v16, 16  ;;  %v1135_v31 = vld [vmem:[#allocation2 + $0x10] sm:$0xf]  ;;  %vm1384_vm7 = vcmask 585216  }
  0x4f   : > { %v925_v12 = vrot.slane %v923_v2, 5  ;;  %v624_v19 = vor.u32 %v623_v0, %v620_v4  ;;  %v1137_v35 = vld [vmem:[#allocation2 + $0x18] sm:$0xf]  ;;  %v1152_v37 = vshrl.u32 %v1135_v31, 16  ;;  %v1155_v38 = vshll.u32 %v1135_v31, 16 }
  0x50   : > { %v912_v22 = vsel %vm1937_vm11, %v907_v7, %v911_v8  ;;  %v629_v30 = vrot.slane %v627_v25, 5  ;;  %v996_v40 = vld [vmem:[#allocation2 + $0x28] sm:$0xe]  ;;  %v997_v41 = vld [vmem:[#allocation2 + $0x2c] sm:$0x1]  ;;  %v1166_v42 = vshrl.u32 %v1137_v35, 16 }
  0x51   : > { %v926_v23 = vsel %vm1937_vm11, %v921_v9, %v925_v12  ;;  %v625_v29 = vrot.slane %v624_v19, 4  ;;  %v1169_v43 = vshll.u32 %v1137_v35, 16  ;;  %v1154_v44 = vrot.slane %v1152_v37, 4  ;;  %v1136_v48 = vld [vmem:[#allocation2 + $0x14] sm:$0x1] }
  0x52   : > { %v528_v15 = vld [vmem:[#allocation2 + $0x38] sm:$0xf]  ;;  %v1157_v45 = vrot.slane %v1155_v38, 5  ;;  %v1684_v46 = vrot.slane %v996_v40, 9  ;;  %v1038_v47 = vrot.slane %v997_v41, 5  ;;  %v1168_v51 = vrot.slane %v1166_v42, 4 }
  0x53   : > { %751 = vrot.lane.b32.xlu1 %v728_v3, %s1807_s28  ;;  %v632_v13 = vshrl.u32 %v528_v15, 16  ;;  %v635_v14 = vshll.u32 %v528_v15, 16  ;;  %v529_v18 = vld [vmem:[#allocation2 + $0x3c] sm:$0x1]  ;;  %v630_v36 = vsel %vm1937_vm11, %v625_v29, %v629_v30  ;;  %v781_v49 = vld [vmem:[#allocation2 + $0x20] sm:$0xf]  ;;  %v1759_v9 = vunpack.c.h.bf16 %v1992_v21 }
  0x54   : > { %957 = vrot.lane.b32.xlu2 %v870_v58, %s1811_s7  ;;  %v641_v28 = vshll.u32 %v529_v18, 16  ;;  %v1171_v53 = vrot.slane %v1169_v43, 5  ;;  %v1138_v54 = vld [vmem:[#allocation2 + $0x1c] sm:$0x1]  ;;  %v780_v55 = vld [vmem:[#allocation2 + $0x18] sm:$0xf]  ;;  %v1158_v57 = vor.u32 %v1157_v45, %v1154_v44  ;;  %v1039_v60 = vsel %vm1928_vm10, %v1684_v46, %v1038_v47 }
  0x55   : > { %v634_v24 = vrot.slane %v632_v13, 4  ;;  %v637_v20 = vrot.slane %v635_v14, 5  ;;  %v831_v56 = vld [vmem:[#allocation2 + $0x18] sm:$0xf]  ;;  %v1161_v58 = vshll.u32 %v1136_v48, 16  ;;  %vm1457_vm8 = vcmask 588800  }
  0x56   : > { %749 = vrot.lane.b32.xlu0 %v724_v62, %s1807_s28  ;;  %v643_v33 = vrot.slane %v641_v28, 5  ;;  %v998_v59 = vld [vmem:[#allocation2 + $0x30] sm:$0xe]  ;;  %v999_v50 = vld [vmem:[#allocation2 + $0x34] sm:$0x1]  ;;  %v1172_v61 = vor.u32 %v1171_v53, %v1168_v51  ;;  %v1175_v62 = vshll.u32 %v1138_v54, 16 }
  0x57   : > { %v638_v27 = vor.u32 %v637_v20, %v634_v24  ;;  %v872_v63 = vshrl.u32 %v831_v56, 16  ;;  %v875_v2 = vshll.u32 %v831_v56, 16  ;;  %v1685_v3 = vrot.slane %v998_v59, 9  ;;  %v833_v8 = vld [vmem:[#allocation2 + $0x20] sm:$0xf] }
  0x58   : > { %v1042_v4 = vrot.slane %v999_v50, 5  ;;  %v1159_v0 = vrot.slane %v1158_v57, 4  ;;  %v1163_v7 = vrot.slane %v1161_v58, 5  ;;  %v1173_v12 = vrot.slane %v1172_v61, 4  ;;  %v832_v14 = vld [vmem:[#allocation2 + $0x1c] sm:$0x1] }
  0x59   : > { %v639_v32 = vrot.slane %v638_v27, 4  ;;  %v1177_v15 = vrot.slane %v1175_v62, 5  ;;  %v874_v16 = vrot.slane %v872_v63, 4  ;;  %v877_v13 = vrot.slane %v875_v2, 5  ;;  %v690_v19 = vld [vmem:[#allocation2 + $0x30] sm:$0xe] }
  0x5a   : > { %v1043_v18 = vsel %vm1928_vm10, %v1685_v3, %v1042_v4  ;;  %v336_v24 = vmul.f32 %v1877_v6, %v1759_v9  ;;  %v1164_v20 = vsel %vm1937_vm11, %v1159_v0, %v1163_v7  ;;  %v691_v25 = vld [vmem:[#allocation2 + $0x34] sm:$0x1]  ;;  %v692_v21 = vld [vmem:[#allocation2 + $0x38] sm:$0xe]  ;;  %v881_v30 = vshll.u32 %v832_v14, 16 }
  0x5b   : > { %1102 = vrot.lane.b32.xlu1 %v1086_v26, %s1812_s8  ;;  %v644_v39 = vsel %vm1937_vm11, %v639_v32, %v643_v33  ;;  %v693_v26 = vld [vmem:[#allocation2 + $0x3c] sm:$0x1]  ;;  %v1178_v28 = vsel %vm1937_vm11, %v1173_v12, %v1177_v15  ;;  %v878_v29 = vor.u32 %v877_v13, %v874_v16  ;;  %v1678_v31 = vrot.slane %v690_v19, 9  ;;  %v271_v32 = vld [vmem:[#allocation2 + $0x40] sm:$0x1] }
  0x5c   : > { %963 = vrot.lane.b32.xlu2 %v912_v22, %s1811_s7  ;;  %v886_v22 = vshrl.u32 %v833_v8, 16  ;;  %v348_v27 = vadd.f32 %v1891_v10, %v336_v24  ;;  %v739_v6 = vrot.slane %v691_v25, 5  ;;  %v743_v37 = vrot.slane %v693_v26, 5  ;;  %v834_v38 = vld [vmem:[#allocation2 + $0x24] sm:$0x1] }
  0x5d   : > { %v498_v10 = vld [vmem:[#allocation2] sm:$0xf]  ;;  %v879_v41 = vrot.slane %v878_v29, 4  ;;  %v883_v42 = vrot.slane %v881_v30, 5  ;;  %v895_v45 = vshll.u32 %v834_v38, 16  ;;  %vm496_vm9 = vcmask 58368  }
  0x5e   : > { %965 = vrot.lane.b32.xlu0 %v926_v23, %s1811_s7  ;;  %v889_v23 = vshll.u32 %v833_v8, 16  ;;  %v888_v33 = vrot.slane %v886_v22, 4  ;;  %v356_v35 = vmax.f32 %v348_v27, 0.0  ;;  %506 = vst.msk [vmem:[#allocation3] sm:$0xf] %vm237_vm0, %v498_v10  ;;  %v740_v43 = vsel %vm1928_vm10, %v1678_v31, %v739_v6 }
  0x5f   : > { %v884_v48 = vsel %vm1937_vm11, %v879_v41, %v883_v42  ;;  %v897_v53 = vrot.slane %v895_v45, 5  ;;  %v303_v57 = vld [vmem:[#allocation2 + $0x44] sm:$0x1]  ;;  %v1296_v61 = vld [vmem:[#allocation2 + $0x10] sm:$0xe] }
  0x60   : > { %v364_v40 = vpack.c.bf16 %v356_v35, %v356_v35  ;;  %v304_v58 = vsel %vm1869_vm5, 0, %v303_v57  ;;  %v1297_v62 = vld [vmem:[#allocation2 + $0x14] sm:$0x1]  ;;  %v1298_v2 = vld [vmem:[#allocation2 + $0x18] sm:$0xe]  ;;  %v1688_v0 = vrot.slane %v1296_v61, 9 }
  0x61   : > { %305 = vst [vmem:[#allocation2 + $0x44] sm:$0x1] %v304_v58  ;;  %v1299_v3 = vld [vmem:[#allocation2 + $0x1c] sm:$0x1]  ;;  %v1091_v4 = vld [vmem:[#allocation2 + $0x38] sm:$0xf] }
  0x62   : > { %v422_v47 = vshrl.u32 %v364_v40, 16  ;;  %v1330_v7 = vrot.slane %v1297_v62, 5  ;;  %v1689_v9 = vrot.slane %v1298_v2, 9  ;;  %v1334_v12 = vrot.slane %v1299_v3, 5  ;;  %v1143_v16 = vld [vmem:[#allocation2 + $0x30] sm:$0xf] }
  0x63   : > { %659 = vrot.lane.b32.xlu1 %v644_v39, %s1808_s29  ;;  %v272_v39 = vsel %vm1857_vm4, 0, %v271_v32  ;;  %v1145_v17 = vld [vmem:[#allocation2 + $0x38] sm:$0xf]  ;;  %v1211_v19 = vshll.u32 %v1143_v16, 16  ;;  %v995_v29 = vld [vmem:[#allocation2 + $0x24] sm:$0x1] }
  0x64   : > { %1104 = vrot.lane.b32.xlu2 %v1087_v34, %s1812_s8  ;;  %v891_v34 = vrot.slane %v889_v23, 5  ;;  %273 = vst [vmem:[#allocation2 + $0x40] sm:$0x1] %v272_v39  ;;  %v424_v54 = vrot.slane %v422_v47, 7  ;;  %v1331_v13 = vsel %vm1928_vm10, %v1688_v0, %v1330_v7  ;;  %v839_v14 = vld [vmem:[#allocation2 + $0x38] sm:$0xf]  ;;  %v1335_v23 = vsel %vm1928_vm10, %v1689_v9, %v1334_v12 }
  0x65   : > { %v992_v24 = vld [vmem:[#allocation2 + $0x18] sm:$0xe]  ;;  %v1222_v25 = vshrl.u32 %v1145_v17, 16  ;;  %v928_v30 = vshrl.u32 %v839_v14, 16  ;;  %v931_v31 = vshll.u32 %v839_v14, 16 }
  0x66   : > { %657 = vrot.lane.b32.xlu0 %v630_v36, %s1808_s29  ;;  %v1679_v36 = vrot.slane %v692_v21, 9  ;;  %v892_v44 = vor.u32 %v891_v34, %v888_v33  ;;  %v428_v15 = vrot.slane %v424_v54, 4  ;;  %v1225_v21 = vshll.u32 %v1145_v17, 16  ;;  %v784_v27 = vld [vmem:[#allocation2 + $0x38] sm:$0xf] }
  0x67   : > { %v1682_v32 = vrot.slane %v992_v24, 9  ;;  %v1213_v34 = vrot.slane %v1211_v19, 5  ;;  %v1144_v38 = vld [vmem:[#allocation2 + $0x34] sm:$0x1]  ;;  %v1146_v41 = vld [vmem:[#allocation2 + $0x3c] sm:$0x1] }
  0x68   : > { %v744_v46 = vsel %vm1928_vm10, %v1679_v36, %v743_v37  ;;  %v893_v51 = vrot.slane %v892_v44, 4  ;;  %v493_v22 = vld [vmem:[#allocation2 + $0x44] sm:$0x1]  ;;  %v1224_v36 = vrot.slane %v1222_v25, 4  ;;  %v1227_v37 = vrot.slane %v1225_v21, 5 }
  0x69   : > { %v494_v26 = vsel %vm1857_vm4, %v428_v15, %v493_v22  ;;  %v503_v42 = vld [vmem:[#allocation2 + $0x28] sm:$0xf]  ;;  %v930_v44 = vrot.slane %v928_v30, 4  ;;  %v933_v45 = vrot.slane %v931_v31, 5  ;;  %v1139_v25 = vld [vmem:[#allocation2 + $0x20] sm:$0xf] }
  0x6a   : > { %v898_v59 = vsel %vm1937_vm11, %v893_v51, %v897_v53  ;;  %495 = vst [vmem:[#allocation2 + $0x44] sm:$0x1] %v494_v26  ;;  %v499_v7 = vld [vmem:[#allocation2 + $0x8] sm:$0xf]  ;;  %v1088_v26 = vld [vmem:[#allocation2 + $0x20] sm:$0xf] }
  0x6b   : > { %1060 = vrot.lane.b32.xlu1 %v1039_v60, %s1810_s6  ;;  %v490_v50 = vld [vmem:[#allocation2 + $0x40] sm:$0xf]  ;;  %v1090_v60 = vld [vmem:[#allocation2 + $0x30] sm:$0xf]  ;;  %511 = vst.msk [vmem:[#allocation3 + $0x14] sm:$0xf] %vm237_vm0, %v503_v42  ;;  %v934_v58 = vor.u32 %v933_v45, %v930_v44 }
  0x6c   : > { %798 = vrot.lane.b32.xlu2 %v780_v55, %s1809_s30  ;;  %v502_v55 = vld [vmem:[#allocation2 + $0x20] sm:$0xf]  ;;  %507 = vst.msk [vmem:[#allocation3 + $0x4] sm:$0xf] %vm237_vm0, %v499_v7  ;;  %v274_v15 = vld [vmem:[#allocation2 + $0x48] sm:$0x1] }
  0x6d   : > { %510 = vst.msk [vmem:[#allocation3 + $0x10] sm:$0xf] %vm237_vm0, %v502_v55  ;;  %v1231_v55 = vshll.u32 %v1146_v41, 16  ;;  %v935_v9 = vrot.slane %v934_v58, 4  ;;  %v275_v14 = vsel %vm1857_vm4, 0, %v274_v15  ;;  %v1180_v30 = vshrl.u32 %v1139_v25, 16 }
  0x6e   : > { %800 = vrot.lane.b32.xlu0 %v781_v49, %s1809_s30  ;;  %v425_v49 = vshll.u32 %v364_v40, 16  ;;  %v1034_v40 = vrot.slane %v995_v29, 5  ;;  %276 = vst [vmem:[#allocation2 + $0x48] sm:$0x1] %v275_v14  ;;  %v1141_v21 = vld [vmem:[#allocation2 + $0x28] sm:$0xf] }
  0x6f   : > { %v1183_v31 = vshll.u32 %v1139_v25, 16  ;;  %v306_v42 = vld [vmem:[#allocation2 + $0x4c] sm:$0x1]  ;;  %v1182_v45 = vrot.slane %v1180_v30, 4  ;;  %v505_v25 = vld [vmem:[#allocation2 + $0x38] sm:$0xf] }
  0x70   : > { %v427_v56 = vor.u32 %v425_v49, %v424_v54  ;;  %v1228_v54 = vor.u32 %v1227_v37, %v1224_v36  ;;  %v1000_v36 = vld [vmem:[#allocation2 + $0x38] sm:$0xe]  ;;  %v1307_v37 = vld [vmem:[#allocation2 + $0x3c] sm:$0x1]  ;;  %513 = vst.msk [vmem:[#allocation3 + $0x1c] sm:$0xf] %vm237_vm0, %v505_v25 }
  0x71   : > { %v842_v0 = vld [vmem:[#allocation2 + $0x44] sm:$0x1]  ;;  %vm1126_vm4 = vcmask 454016  }
  0x72   : > { %v491_v63 = vsel %vm1943_vm12, %v427_v56, %v490_v50  ;;  %v1229_v3 = vrot.slane %v1228_v54, 4 }
  0x73   : > { %1265 = vrot.lane.b32.xlu1 %v1178_v28, %s1813_s9  ;;  %492 = vst [vmem:[#allocation2 + $0x40] sm:$0xf] %v491_v63  ;;  %v994_v28 = vld [vmem:[#allocation2 + $0x20] sm:$0xe] }
  0x74   : > { %1062 = vrot.lane.b32.xlu2 %v1043_v18, %s1810_s6  ;;  %v1208_v18 = vshrl.u32 %v1143_v16, 16  ;;  %v1683_v39 = vrot.slane %v994_v28, 9  ;;  %v501_v28 = vld [vmem:[#allocation2 + $0x18] sm:$0xf] }
  0x75   : > { %509 = vst.msk [vmem:[#allocation3 + $0xc] sm:$0xf] %vm237_vm0, %v501_v28 }
  0x76   : > { %1263 = vrot.lane.b32.xlu0 %v1164_v20, %s1813_s9  ;;  %v993_v20 = vld [vmem:[#allocation2 + $0x1c] sm:$0x1]  ;;  %v1210_v33 = vrot.slane %v1208_v18, 4  ;;  %v1035_v57 = vsel %vm1928_vm10, %v1683_v39, %v1034_v40 }
  0x77   : > { %v1030_v6 = vrot.slane %v993_v20, 5 }
  0x78   : > { %v1214_v47 = vor.u32 %v1213_v34, %v1210_v33  ;;  %v1305_v33 = vld [vmem:[#allocation2 + $0x34] sm:$0x1]  ;;  %v500_v34 = vld [vmem:[#allocation2 + $0x10] sm:$0xf] }
  0x79   : > { %v1031_v53 = vsel %vm1928_vm10, %v1682_v32, %v1030_v6  ;;  %v1304_v32 = vld [vmem:[#allocation2 + $0x30] sm:$0xe]  ;;  %v1089_v6 = vld [vmem:[#allocation2 + $0x28] sm:$0xf]  ;;  %508 = vst.msk [vmem:[#allocation3 + $0x8] sm:$0xf] %vm237_vm0, %v500_v34 }
  0x7a   : > { %v841_v10 = vld [vmem:[#allocation2 + $0x40] sm:$0xf]  ;;  %v1346_v41 = vrot.slane %v1305_v33, 5 }
  0x7b   : > { %959 = vrot.lane.b32.xlu1 %v884_v48, %s1811_s7  ;;  %v1217_v48 = vshll.u32 %v1144_v38, 16  ;;  %v942_v49 = vshrl.u32 %v841_v10, 16  ;;  %v945_v51 = vshll.u32 %v841_v10, 16  ;;  %v1194_v38 = vshrl.u32 %v1141_v21, 16 }
  0x7c   : > { %757 = vrot.lane.b32.xlu2 %v740_v43, %s1807_s28  ;;  %v840_v43 = vld [vmem:[#allocation2 + $0x3c] sm:$0x1]  ;;  %v1197_v10 = vshll.u32 %v1141_v21, 16  ;;  %v1301_v21 = vld [vmem:[#allocation2 + $0x24] sm:$0x1] }
  0x7d   : > { %v1219_v61 = vrot.slane %v1217_v48, 5  ;;  %v944_v62 = vrot.slane %v942_v49, 4  ;;  %v947_v63 = vrot.slane %v945_v51, 5  ;;  %v1140_v49 = vld [vmem:[#allocation2 + $0x24] sm:$0x1]  ;;  %v1686_v51 = vrot.slane %v1000_v36, 9 }
  0x7e   : > { %759 = vrot.lane.b32.xlu0 %v744_v46, %s1807_s28  ;;  %v785_v46 = vld [vmem:[#allocation2 + $0x40] sm:$0xf]  ;;  %v1196_v54 = vrot.slane %v1194_v38, 4  ;;  %v1338_v34 = vrot.slane %v1301_v21, 5  ;;  %v1093_v36 = vld [vmem:[#allocation2 + $0x48] sm:$0xf] }
  0x7f   : > { %v948_v17 = vor.u32 %v947_v63, %v944_v62  ;;  %v1741_v21 = vld [vmem:[%s2348_s1 + $0x8] sm:$0xff] }
  0x83   : > { %1112 = vrot.lane.b32.xlu1 %v1091_v4, %s1812_s8  ;;  %v1233_v4 = vrot.slane %v1231_v55, 5  ;;  %v1199_v55 = vrot.slane %v1197_v10, 5  ;;  %v1092_v10 = vld [vmem:[#allocation2 + $0x40] sm:$0xf] }
  0x84   : > { %961 = vrot.lane.b32.xlu2 %v898_v59, %s1811_s7  ;;  %v937_v59 = vshll.u32 %v840_v43, 16  ;;  %v1350_v43 = vrot.slane %v1307_v37, 5 }
  0x85   : > { %v2115_v8 = vpop.permute.xlu2 %802  ;;  %v1234_v18 = vsel %vm1937_vm11, %v1229_v3, %v1233_v4  ;;  %v1200_v62 = vor.u32 %v1199_v55, %v1196_v54 }
  0x86   : > { %1110 = vrot.lane.b32.xlu0 %v1090_v60, %s1812_s8  ;;  %v1215_v60 = vrot.slane %v1214_v47, 4  ;;  %v939_v12 = vrot.slane %v937_v59, 5  ;;  %v307_v47 = vsel %vm1869_vm5, 0, %v306_v42  ;;  %v1189_v59 = vshll.u32 %v1140_v49, 16  ;;  %v1303_v42 = vld [vmem:[#allocation2 + $0x2c] sm:$0x1] }
  0x87   : > { %308 = vst [vmem:[#allocation2 + $0x4c] sm:$0x1] %v307_v47  ;;  %vm1470_vm5 = vcmask 1043456  }
  0x88   : > { %v1220_v16 = vsel %vm1937_vm11, %v1215_v60, %v1219_v61  ;;  %v940_v19 = vsel %vm1937_vm11, %v935_v9, %v939_v12  ;;  %v1003_v60 = vld [vmem:[#allocation2 + $0x44] sm:$0x1]  ;;  %v1191_v9 = vrot.slane %v1189_v59, 5 }
  0x8b   : > { %806 = vrot.lane.b32.xlu1 %v784_v27, %s1809_s30  ;;  %v1306_v27 = vld [vmem:[#allocation2 + $0x38] sm:$0xe] }
  0x8c   : > { %1360 = vrot.lane.b32.xlu2 %v1331_v13, %s1814_s10  ;;  %v951_v13 = vshll.u32 %v842_v0, 16  ;;  %v1693_v40 = vrot.slane %v1306_v27, 9  ;;  %v1050_v0 = vrot.slane %v1003_v60, 5 }
  0x8e   : > { %1362 = vrot.lane.b32.xlu0 %v1335_v23, %s1814_s10  ;;  %v2126_v35 = vpop.permute.xlu2 %753  ;;  %v949_v23 = vrot.slane %v948_v17, 4  ;;  %v953_v24 = vrot.slane %v951_v13, 5  ;;  %v1351_v58 = vsel %vm1928_vm10, %v1693_v40, %v1350_v43  ;;  %v1201_v17 = vrot.slane %v1200_v62, 4  ;;  %v1150_v40 = vld [vmem:[#allocation2 + $0x4c] sm:$0x1] }
  0x8f   : > { %v504_v43 = vld [vmem:[#allocation2 + $0x30] sm:$0xf]  ;;  %v1308_v62 = vld [vmem:[#allocation2 + $0x40] sm:$0xe] }
  0x90   : > { %v954_v29 = vsel %vm1937_vm11, %v949_v23, %v953_v24  ;;  %512 = vst.msk [vmem:[#allocation3 + $0x18] sm:$0xf] %vm237_vm0, %v504_v43 }
  0x93   : > { %v746_v56 = vpop.permute.xlu1 %745  ;;  %1058 = vrot.lane.b32.xlu1 %v1035_v57, %s1810_s6 }
  0x94   : > { %808 = vrot.lane.b32.xlu2 %v785_v46, %s1809_s30  ;;  %v1185_v46 = vrot.slane %v1183_v31, 5 }
  0x96   : > { %1056 = vrot.lane.b32.xlu0 %v1031_v53, %s1810_s6  ;;  %v2136_v2 = vpop.permute.xlu2 %1054  ;;  %v1186_v5 = vor.u32 %v1185_v46, %v1182_v45  ;;  %v1259_v45 = vshll.u32 %v1150_v40, 16  ;;  %v1342_v46 = vrot.slane %v1303_v42, 5 }
  0x98   : > { %v646_v50 = vpop.permute.xlu0 %645  ;;  %v1187_v7 = vrot.slane %v1186_v5, 4 }
  0x99   : > { %670 = vst.msk [vmem:[#allocation3] sm:$0xf] %vm669_vm13, %v646_v50  ;;  %v1002_v50 = vld [vmem:[#allocation2 + $0x40] sm:$0xe] }
  0x9a   : > { %770 = vst.msk [vmem:[#allocation3] sm:$0xf] %vm769_vm14, %v746_v56  ;;  %v1142_v56 = vld [vmem:[#allocation2 + $0x2c] sm:$0x1]  ;;  %v1687_v4 = vrot.slane %v1002_v50, 9 }
  0x9b   : > { %967 = vrot.lane.b32.xlu1 %v940_v19, %s1811_s7  ;;  %v1203_v63 = vshll.u32 %v1142_v56, 16  ;;  %v1192_v19 = vsel %vm1937_vm11, %v1187_v7, %v1191_v9 }
  0x9c   : > { %1271 = vrot.lane.b32.xlu2 %v1220_v16, %s1813_s9  ;;  %v2151_v22 = vpop.permute.xlu1 %796  ;;  %v1147_v16 = vld [vmem:[#allocation2 + $0x40] sm:$0xf]  ;;  %v1051_v14 = vsel %vm1928_vm10, %v1687_v4, %v1050_v0 }
  0x9d   : > { %v1205_v13 = vrot.slane %v1203_v63, 5  ;;  %v1236_v23 = vshrl.u32 %v1147_v16, 16  ;;  %v1239_v24 = vshll.u32 %v1147_v16, 16  ;;  %v1309_v63 = vld [vmem:[#allocation2 + $0x44] sm:$0x1] }
  0x9e   : > { %1273 = vrot.lane.b32.xlu0 %v1234_v18, %s1813_s9  ;;  %v654_v20 = vpop.permute.xlu2 %653  ;;  %v1149_v18 = vld [vmem:[#allocation2 + $0x48] sm:$0xf]  ;;  %v1354_v4 = vrot.slane %v1309_v63, 5 }
  0x9f   : > { %674 = vst.msk [vmem:[#allocation3 + $0x10] sm:$0xf] %vm669_vm13, %v654_v20  ;;  %v1300_v20 = vld [vmem:[#allocation2 + $0x20] sm:$0xe]  ;;  %v1253_v27 = vshll.u32 %v1149_v18, 16  ;;  %v1238_v31 = vrot.slane %v1236_v23, 4 }
  0xa0   : > { %v795_v1 = vpop.permute.xlu0 %794  ;;  %774 = vst.msk [vmem:[#allocation3 + $0x10] sm:$0xf] %vm769_vm14, %v2126_v35  ;;  %v1001_v35 = vld [vmem:[#allocation2 + $0x3c] sm:$0x1]  ;;  %v1690_v33 = vrot.slane %v1300_v20, 9 }
  0xa1   : > { %819 = vst.msk [vmem:[#allocation3] sm:$0xf] %vm818_vm15, %v795_v1  ;;  %v1046_v53 = vrot.slane %v1001_v35, 5  ;;  %v1206_v1 = vsel %vm1937_vm11, %v1201_v17, %v1205_v13  ;;  %v1255_v38 = vrot.slane %v1253_v27, 5  ;;  %v1409_v17 = vld [vmem:[%s2348_s1 + $0x20] sm:$0xf] }
  0xa2   : > { %823 = vst.msk [vmem:[#allocation3 + $0x10] sm:$0xf] %vm818_vm15, %v2115_v8  ;;  %v1692_v8 = vrot.slane %v1304_v32, 9  ;;  %v1241_v32 = vrot.slane %v1239_v24, 5  ;;  %v1447_v13 = vunpack.c.l.b16 %v1409_v17  ;;  %v1743_v23 = vld [vmem:[%s2348_s1 + $0x18] sm:$0xff] }
  0xa3   : > { %1108 = vrot.lane.b32.xlu1 %v1089_v6, %s1812_s8  ;;  %v1047_v61 = vsel %vm1928_vm10, %v1686_v51, %v1046_v53  ;;  %v1261_v53 = vrot.slane %v1259_v45, 5 }
  0xa4   : > { %969 = vrot.lane.b32.xlu2 %v954_v29, %s1811_s7  ;;  %v2166_v39 = vpop.permute.xlu1 %747  ;;  %v1347_v57 = vsel %vm1928_vm10, %v1692_v8, %v1346_v41  ;;  %v1148_v29 = vld [vmem:[#allocation2 + $0x44] sm:$0x1]  ;;  %v1242_v8 = vor.u32 %v1241_v32, %v1238_v31  ;;  %v1302_v41 = vld [vmem:[#allocation2 + $0x28] sm:$0xe] }
  0xa5   : > { %v1245_v37 = vshll.u32 %v1148_v29, 16  ;;  %v1740_v29 = vld [vmem:[%s2348_s1] sm:$0xff] }
  0xa6   : > { %1106 = vrot.lane.b32.xlu0 %v1088_v26, %s1812_s8  ;;  %v656_v44 = vpop.permute.xlu2 %655  ;;  %v1250_v26 = vshrl.u32 %v1149_v18, 16  ;;  %v1243_v47 = vrot.slane %v1242_v8, 4  ;;  %v1452_v18 = vpack.c.b16 %v1447_v13, %v1447_v13 }
  0xa7   : > { %675 = vst.msk [vmem:[#allocation3 + $0x14] sm:$0xf] %vm669_vm13, %v656_v44  ;;  %v1339_v44 = vsel %vm1928_vm10, %v1690_v33, %v1338_v34 }
  0xa8   : > { %v805_v48 = vpop.permute.xlu0 %804  ;;  %v1252_v35 = vrot.slane %v1250_v26, 4 }
  0xab   : > { %1064 = vrot.lane.b32.xlu1 %v1047_v61, %s1810_s6 }
  0xac   : > { %1368 = vrot.lane.b32.xlu2 %v1347_v57, %s1814_s10  ;;  %v1053_v3 = vpop.permute.xlu1 %1052  ;;  %v1310_v57 = vld [vmem:[#allocation2 + $0x48] sm:$0xe] }
  0xad   : > { %v1695_v59 = vrot.slane %v1310_v57, 9 }
  0xae   : > { %1370 = vrot.lane.b32.xlu0 %v1351_v58, %s1814_s10  ;;  %v958_v12 = vpop.permute.xlu2 %957  ;;  %v1311_v58 = vld [vmem:[#allocation2 + $0x4c] sm:$0x1] }
  0xaf   : > { %v1358_v50 = vrot.slane %v1311_v58, 5 }
  0xb0   : > { %v756_v15 = vpop.permute.xlu0 %755 }
  0xb1   : > { %775 = vst.msk [vmem:[#allocation3 + $0x14] sm:$0xf] %vm769_vm14, %v756_v15  ;;  %v1359_v11 = vsel %vm1928_vm10, %v1695_v59, %v1358_v50 }
  0xb2   : > { %824 = vst.msk [vmem:[#allocation3 + $0x14] sm:$0xf] %vm818_vm15, %v805_v48  ;;  %v1247_v48 = vrot.slane %v1245_v37, 5 }
  0xb3   : > { %1269 = vrot.lane.b32.xlu1 %v1206_v1, %s1813_s9  ;;  %v1742_v1 = vld [vmem:[%s2348_s1 + $0x10] sm:$0xff] }
  0xb4   : > { %1066 = vrot.lane.b32.xlu2 %v1051_v14, %s1810_s6  ;;  %v956_v28 = vpop.permute.xlu1 %955  ;;  %v1248_v56 = vsel %vm1937_vm11, %v1243_v47, %v1247_v48 }
  0xb5   : > { %980 = vst.msk [vmem:[#allocation3] sm:$0xf] %vm979_vm2, %v956_v28 }
  0xb6   : > { %1267 = vrot.lane.b32.xlu0 %v1192_v19, %s1813_s9  ;;  %v964_v30 = vpop.permute.xlu2 %963  ;;  %1077 = vst.msk [vmem:[#allocation3] sm:$0xf] %vm1076_vm3, %v1053_v3  ;;  %v1694_v3 = vrot.slane %v1308_v62, 9  ;;  %v1472_v19 = vsel %vm1470_vm5, %v1452_v18, 0 }
  0xb7   : > { %984 = vst.msk [vmem:[#allocation3 + $0x10] sm:$0xf] %vm979_vm2, %v964_v30  ;;  %1477 = vmatpush.bf16.msra.mxu0 %v1472_v19  ;;  %1764 = vmatpush.bf16.msra.mxu2 %v1472_v19 }
  0xb8   : > { %v648_v6 = vpop.permute.xlu0 %647  ;;  %v1355_v7 = vsel %vm1928_vm10, %v1694_v3, %v1354_v4  ;;  %1763 = vmatpush.bf16.msra.mxu1 %v1472_v19  ;;  %1765 = vmatpush.bf16.msra.mxu3 %v1472_v19  ;;  %v1815_v3 = vmov 0.0  }
  0xb9   : > { %671 = vst.msk [vmem:[#allocation3 + $0x4] sm:$0xf] %vm669_vm13, %v648_v6 }
  0xba   : > { %771 = vst.msk [vmem:[#allocation3 + $0x4] sm:$0xf] %vm769_vm14, %v2166_v39  ;;  %v1256_v39 = vor.u32 %v1255_v38, %v1252_v35 }
  0xbb   : > { %820 = vst.msk [vmem:[#allocation3 + $0x4] sm:$0xf] %vm818_vm15, %v2151_v22  ;;  %v1691_v22 = vrot.slane %v1302_v41, 9  ;;  %1364 = vrot.lane.b32.xlu1 %v1339_v44, %s1814_s10  ;;  %1478 = vmatpush.bf16.msra.mxu0 %v1743_v23 }
  0xbc   : > { %981 = vst.msk [vmem:[#allocation3 + $0x4] sm:$0xf] %vm979_vm2, %v958_v12  ;;  %1114 = vrot.lane.b32.xlu2 %v1092_v10, %s1812_s8  ;;  %1767 = vmatpush.bf16.msra.mxu2 %v1743_v23 }
  0xbd   : > { %1078 = vst.msk [vmem:[#allocation3 + $0x4] sm:$0xf] %vm1076_vm3, %v2136_v2  ;;  %v1257_v2 = vrot.slane %v1256_v39, 4  ;;  %v652_v54 = vpop.permute.xlu1 %651  ;;  %v1343_v55 = vsel %vm1928_vm10, %v1691_v22, %v1342_v46  ;;  %1766 = vmatpush.bf16.msra.mxu1 %v1743_v23  ;;  %1768 = vmatpush.bf16.msra.mxu3 %v1743_v23  ;;  %vm1504_vm10 = vcmask 64512  }
  0xbe   : > { %1116 = vrot.lane.b32.xlu0 %v1093_v36, %s1812_s8  ;;  %v1105_v49 = vpop.permute.xlu2 %1104  ;;  %673 = vst.msk [vmem:[#allocation3 + $0xc] sm:$0xf] %vm669_vm13, %v652_v54 }
  0xbf   : > { %1128 = vst.msk [vmem:[#allocation3 + $0x4] sm:$0xf] %vm1126_vm4, %v1105_v49  ;;  %v1262_v5 = vsel %vm1937_vm11, %v1257_v2, %v1261_v53  ;;  %1479 = vmatpush.bf16.msra.mxu0 %v1742_v1 }
  0xc0   : > { %v650_v51 = vpop.permute.xlu0 %649  ;;  %1770 = vmatpush.bf16.msra.mxu2 %v1742_v1  ;;  %497 = vst.msk [vmem:[%s2307_s20] sm:$0x3] %vm496_vm9, %v1815_v3 }
  0xc1   : > { %672 = vst.msk [vmem:[#allocation3 + $0x8] sm:$0xf] %vm669_vm13, %v650_v51  ;;  %1769 = vmatpush.bf16.msra.mxu1 %v1742_v1  ;;  %1771 = vmatpush.bf16.msra.mxu3 %v1742_v1 }
  0xc3   : > { %1277 = vrot.lane.b32.xlu1 %v1262_v5, %s1813_s9  ;;  %1480 = vmatpush.bf16.msra.mxu0 %v1741_v21 }
  0xc4   : > { %1366 = vrot.lane.b32.xlu2 %v1343_v55, %s1814_s10  ;;  %1773 = vmatpush.bf16.msra.mxu2 %v1741_v21 }
  0xc5   : > { %v752_v0 = vpop.permute.xlu1 %751  ;;  %1772 = vmatpush.bf16.msra.mxu1 %v1741_v21  ;;  %1774 = vmatpush.bf16.msra.mxu3 %v1741_v21 }
  0xc6   : > { %1275 = vrot.lane.b32.xlu0 %v1248_v56, %s1813_s9  ;;  %v799_v60 = vpop.permute.xlu2 %798  ;;  %773 = vst.msk [vmem:[#allocation3 + $0xc] sm:$0xf] %vm769_vm14, %v752_v0 }
  0xc7   : > { %1481 = vmatpush.bf16.msra.mxu0 %v1740_v29 }
  0xc8   : > { %v750_v61 = vpop.permute.xlu0 %749  ;;  %1776 = vmatpush.bf16.msra.mxu2 %v1740_v29 }
  0xc9   : > { %772 = vst.msk [vmem:[#allocation3 + $0x8] sm:$0xf] %vm769_vm14, %v750_v61  ;;  %1775 = vmatpush.bf16.msra.mxu1 %v1740_v29  ;;  %1777 = vmatpush.bf16.msra.mxu3 %v1740_v29 }
  0xca   : > { %821 = vst.msk [vmem:[#allocation3 + $0x8] sm:$0xf] %vm818_vm15, %v799_v60 }
  0xcc   : > { %1372 = vrot.lane.b32.xlu2 %v1355_v7, %s1814_s10 }
  0xcd   : > { %v1103_v15 = vpop.permute.xlu1 %1102 }
  0xce   : > { %1374 = vrot.lane.b32.xlu0 %v1359_v11, %s1814_s10  ;;  %v1063_v9 = vpop.permute.xlu2 %1062  ;;  %1127 = vst.msk [vmem:[#allocation3] sm:$0xf] %vm1126_vm4, %v1103_v15 }
  0xd0   : > { %v966_v12 = vpop.permute.xlu0 %965 }
  0xd1   : > { %985 = vst.msk [vmem:[#allocation3 + $0x14] sm:$0xf] %vm979_vm2, %v966_v12 }
  0xd2   : > { %1082 = vst.msk [vmem:[#allocation3 + $0x14] sm:$0xf] %vm1076_vm3, %v1063_v9 }
  0xd5   : > { %v660_v14 = vpop.permute.xlu1 %659 }
  0xd6   : > { %v758_v16 = vpop.permute.xlu2 %757  ;;  %677 = vst.msk [vmem:[#allocation3 + $0x1c] sm:$0xf] %vm669_vm13, %v660_v14 }
  0xd8   : > { %v658_v52 = vpop.permute.xlu0 %657 }
  0xd9   : > { %676 = vst.msk [vmem:[#allocation3 + $0x18] sm:$0xf] %vm669_vm13, %v658_v52 }
  0xda   : > { %776 = vst.msk [vmem:[#allocation3 + $0x18] sm:$0xf] %vm769_vm14, %v758_v16 }
  0xdd   : > { %v1061_v25 = vpop.permute.xlu1 %1060 }
  0xde   : > { %v962_v24 = vpop.permute.xlu2 %961  ;;  %1081 = vst.msk [vmem:[#allocation3 + $0x10] sm:$0xf] %vm1076_vm3, %v1061_v25 }
  0xe0   : > { %v801_v20 = vpop.permute.xlu0 %800 }
  0xe1   : > { %822 = vst.msk [vmem:[#allocation3 + $0xc] sm:$0xf] %vm818_vm15, %v801_v20 }
  0xe2   : > { %983 = vst.msk [vmem:[#allocation3 + $0xc] sm:$0xf] %vm979_vm2, %v962_v24 }
  0xe5   : > { %v1266_v28 = vpop.permute.xlu1 %1265 }
  0xe6   : > { %v1361_v26 = vpop.permute.xlu2 %1360  ;;  %1289 = vst.msk [vmem:[#allocation3 + $0x4] sm:$0xf] %vm1287_vm6, %v1266_v28 }
  0xe8   : > { %v1264_v27 = vpop.permute.xlu0 %1263 }
  0xe9   : > { %1288 = vst.msk [vmem:[#allocation3] sm:$0xf] %vm1287_vm6, %v1264_v27 }
  0xea   : > { %1385 = vst.msk [vmem:[#allocation3] sm:$0xf] %vm1384_vm7, %v1361_v26 }
  0xed   : > { %v960_v32 = vpop.permute.xlu1 %959 }
  0xee   : > { %v809_v30 = vpop.permute.xlu2 %808  ;;  %982 = vst.msk [vmem:[#allocation3 + $0x8] sm:$0xf] %vm979_vm2, %v960_v32 }
  0xf0   : > { %v760_v31 = vpop.permute.xlu0 %759 }
  0xf1   : > { %777 = vst.msk [vmem:[#allocation3 + $0x1c] sm:$0xf] %vm769_vm14, %v760_v31 }
  0xf2   : > { %826 = vst.msk [vmem:[#allocation3 + $0x1c] sm:$0xf] %vm818_vm15, %v809_v30 }
  0xf5   : > { %v1113_v34 = vpop.permute.xlu1 %1112 }
  0xf6   : > { %v1272_v6 = vpop.permute.xlu2 %1271  ;;  %1132 = vst.msk [vmem:[#allocation3 + $0x14] sm:$0xf] %vm1126_vm4, %v1113_v34 }
  0xf8   : > { %v1111_v33 = vpop.permute.xlu0 %1110 }
  0xf9   : > { %1131 = vst.msk [vmem:[#allocation3 + $0x10] sm:$0xf] %vm1126_vm4, %v1111_v33 }
  0xfa   : > { %1292 = vst.msk [vmem:[#allocation3 + $0x10] sm:$0xf] %vm1287_vm6, %v1272_v6 }
  0xfd   : > { %v807_v35 = vpop.permute.xlu1 %806 }
  0xfe   : > { %v970_v36 = vpop.permute.xlu2 %969  ;;  %825 = vst.msk [vmem:[#allocation3 + $0x18] sm:$0xf] %vm818_vm15, %v807_v35 }
  0xff   : > { %987 = vst.msk [vmem:[#allocation3 + $0x1c] sm:$0xf] %vm979_vm2, %v970_v36 }
 0x100   : > { %v1363_v37 = vpop.permute.xlu0 %1362 }
 0x101   : > { %1386 = vst.msk [vmem:[#allocation3 + $0x4] sm:$0xf] %vm1384_vm7, %v1363_v37 }
 0x105   : > { %v1059_v8 = vpop.permute.xlu1 %1058 }
 0x106   : > { %v1369_v38 = vpop.permute.xlu2 %1368  ;;  %1080 = vst.msk [vmem:[#allocation3 + $0xc] sm:$0xf] %vm1076_vm3, %v1059_v8 }
 0x107   : > { %1389 = vst.msk [vmem:[#allocation3 + $0x10] sm:$0xf] %vm1384_vm7, %v1369_v38 }
 0x108   : > { %v1057_v10 = vpop.permute.xlu0 %1056  ;;  %v1736_v40 = vld [vmem:[#allocation3] sm:$0xff] }
 0x109   : > { %1079 = vst.msk [vmem:[#allocation3 + $0x8] sm:$0xf] %vm1076_vm3, %v1057_v10  ;;  %1728 = vmatmul.msk.bf16.vlgmr.msra.gmra.mxu0 %vm1457_vm8, %v1736_v40 }
 0x10d   : > { %v968_v43 = vpop.permute.xlu1 %967 }
 0x10e   : > { %v1067_v41 = vpop.permute.xlu2 %1066  ;;  %986 = vst.msk [vmem:[#allocation3 + $0x18] sm:$0xf] %vm979_vm2, %v968_v43 }
 0x10f   : > { %1084 = vst.msk [vmem:[#allocation3 + $0x1c] sm:$0xf] %vm1076_vm3, %v1067_v41 }
 0x110   : > { %v1274_v42 = vpop.permute.xlu0 %1273 }
 0x111   : > { %1293 = vst.msk [vmem:[#allocation3 + $0x14] sm:$0xf] %vm1287_vm6, %v1274_v42 }
 0x115   : > { %v1109_v39 = vpop.permute.xlu1 %1108 }
 0x116   : > { %1130 = vst.msk [vmem:[#allocation3 + $0xc] sm:$0xf] %vm1126_vm4, %v1109_v39  ;;  %v1115_v45 = vpop.permute.xlu2 %1114 }
 0x118   : > { %v1107_v44 = vpop.permute.xlu0 %1106 }
 0x119   : > { %1129 = vst.msk [vmem:[#allocation3 + $0x8] sm:$0xf] %vm1126_vm4, %v1107_v44 }
 0x11d   : > { %v1065_v46 = vpop.permute.xlu1 %1064 }
 0x11e   : > { %1083 = vst.msk [vmem:[#allocation3 + $0x18] sm:$0xf] %vm1076_vm3, %v1065_v46  ;;  %v1367_v49 = vpop.permute.xlu2 %1366 }
 0x11f   : > { %1133 = vst.msk [vmem:[#allocation3 + $0x18] sm:$0xf] %vm1126_vm4, %v1115_v45 }
 0x120   : > { %v1371_v22 = vpop.permute.xlu0 %1370 }
 0x121   : > { %1390 = vst.msk [vmem:[#allocation3 + $0x14] sm:$0xf] %vm1384_vm7, %v1371_v22 }
 0x125   : > { %v1270_v51 = vpop.permute.xlu1 %1269 }
 0x126   : > { %1291 = vst.msk [vmem:[#allocation3 + $0xc] sm:$0xf] %vm1287_vm6, %v1270_v51  ;;  %v1373_v54 = vpop.permute.xlu2 %1372 }
 0x127   : > { %1388 = vst.msk [vmem:[#allocation3 + $0xc] sm:$0xf] %vm1384_vm7, %v1367_v49 }
 0x128   : > { %v1268_v47 = vpop.permute.xlu0 %1267  ;;  %v1738_v48 = vld [vmem:[#allocation3 + $0x10] sm:$0xff] }
 0x129   : > { %1290 = vst.msk [vmem:[#allocation3 + $0x8] sm:$0xf] %vm1287_vm6, %v1268_v47  ;;  %1730 = vmatmul.msk.bf16.vlgmr.msra.gmra.mxu2 %vm1457_vm8, %v1738_v48 }
 0x12d   : > { %v1365_v53 = vpop.permute.xlu1 %1364 }
 0x12e   : > { %1387 = vst.msk [vmem:[#allocation3 + $0x8] sm:$0xf] %vm1384_vm7, %v1365_v53 }
 0x130   : > { %v1117_v2 = vpop.permute.xlu0 %1116 }
 0x131   : > { %1134 = vst.msk [vmem:[#allocation3 + $0x1c] sm:$0xf] %vm1126_vm4, %v1117_v2 }
 0x135   : > { %v1737_v56 = vld [vmem:[#allocation3 + $0x8] sm:$0xff]  ;;  %v1278_v57 = vpop.permute.xlu1 %1277 }
 0x136   : > { %1295 = vst.msk [vmem:[#allocation3 + $0x1c] sm:$0xf] %vm1287_vm6, %v1278_v57  ;;  %1729 = vmatmul.msk.bf16.vlgmr.msra.gmra.mxu1 %vm1457_vm8, %v1737_v56 }
 0x138   : > { %v1276_v55 = vpop.permute.xlu0 %1275 }
 0x139   : > { %1294 = vst.msk [vmem:[#allocation3 + $0x18] sm:$0xf] %vm1287_vm6, %v1276_v55 }
 0x13a   : > { %1391 = vst.msk [vmem:[#allocation3 + $0x18] sm:$0xf] %vm1384_vm7, %v1373_v54 }
 0x140   : > { %v1375_v58 = vpop.permute.xlu0 %1374 }
 0x141   : > { %1392 = vst.msk [vmem:[#allocation3 + $0x1c] sm:$0xf] %vm1384_vm7, %v1375_v58 }
 0x148   : > { %v1739_v5 = vld [vmem:[#allocation3 + $0x18] sm:$0xff] }
 0x149   : > { %1731 = vmatmul.msk.bf16.vlgmr.msra.gmra.mxu3 %vm1457_vm8, %v1739_v5 }
 0x186   : > { %v1483_v59 = vpop.f32.mrf.mxu0 }
 0x187   : > { %v1560_v50 = vpack.c.bf16 %v1483_v59, %v1483_v59  ;;  %v1529_v16 = vmul.f32 %v1483_v59, %v1483_v59  ;;  %v1505_v13 = vsel %vm1504_vm10, %v1483_v59, 0.0  ;;  %v1503_v59 = vld [vmem:[%s2307_s20] sm:$0x1] }
 0x189   : > { %1568 = vst.msk [vmem:[%s2297_s26] sm:$0xf] %vm237_vm0, %v1560_v50  ;;  %v1537_v24 = vsel %vm1504_vm10, %v1529_v16, 0.0 }
 0x18e   : > { %v1485_v60 = vpop.f32.mrf.mxu0 }
 0x18f   : > { %v1561_v61 = vpack.c.bf16 %v1485_v60, %v1485_v60  ;;  %v1530_v12 = vmul.f32 %v1485_v60, %v1485_v60  ;;  %v1506_v17 = vsel %vm1504_vm10, %v1485_v60, 0.0 }
 0x190   : > { %v1507_v23 = vadd.f32 %v1506_v17, %v1505_v13 }
 0x191   : > { %1569 = vst.msk [vmem:[%s2297_s26 + $0x4] sm:$0xf] %vm237_vm0, %v1561_v61  ;;  %v1538_v14 = vsel %vm1504_vm10, %v1530_v12, 0.0  ;;  %v1528_v61 = vld [vmem:[%s2307_s20 + $0x1] sm:$0x1] }
 0x192   : > { %v1539_v1 = vadd.f32 %v1538_v14, %v1537_v24 }
 0x1ac   : > { %v1493_v62 = vpop.f32.mrf.mxu2 }
 0x1ad   : > { %v1564_v63 = vpack.c.bf16 %v1493_v62, %v1493_v62  ;;  %v1533_v29 = vmul.f32 %v1493_v62, %v1493_v62  ;;  %v1512_v32 = vsel %vm1504_vm10, %v1493_v62, 0.0 }
 0x1af   : > { %1572 = vst.msk [vmem:[%s2297_s26 + $0x10] sm:$0xf] %vm237_vm0, %v1564_v63  ;;  %v1544_v34 = vsel %vm1504_vm10, %v1533_v29, 0.0 }
 0x1b3   : > { %v1488_v11 = vpop.f32.mrf.mxu1 }
 0x1b4   : > { %v1495_v4 = vpop.f32.mrf.mxu2  ;;  %v1562_v7 = vpack.c.bf16 %v1488_v11, %v1488_v11  ;;  %v1531_v52 = vmul.f32 %v1488_v11, %v1488_v11  ;;  %v1508_v18 = vsel %vm1504_vm10, %v1488_v11, 0.0 }
 0x1b5   : > { %v1565_v0 = vpack.c.bf16 %v1495_v4, %v1495_v4  ;;  %v1509_v21 = vadd.f32 %v1508_v18, %v1507_v23  ;;  %v1534_v36 = vmul.f32 %v1495_v4, %v1495_v4  ;;  %v1514_v38 = vsel %vm1504_vm10, %v1495_v4, 0.0 }
 0x1b6   : > { %1570 = vst.msk [vmem:[%s2297_s26 + $0x8] sm:$0xf] %vm237_vm0, %v1562_v7  ;;  %v1540_v20 = vsel %vm1504_vm10, %v1531_v52, 0.0 }
 0x1b7   : > { %1573 = vst.msk [vmem:[%s2297_s26 + $0x14] sm:$0xf] %vm237_vm0, %v1565_v0  ;;  %v1541_v27 = vadd.f32 %v1540_v20, %v1539_v1  ;;  %v1546_v8 = vsel %vm1504_vm10, %v1534_v36, 0.0 }
 0x1bb   : > { %v1490_v9 = vpop.f32.mrf.mxu1 }
 0x1bc   : > { %v1563_v15 = vpack.c.bf16 %v1490_v9, %v1490_v9  ;;  %v1532_v19 = vmul.f32 %v1490_v9, %v1490_v9  ;;  %v1510_v25 = vsel %vm1504_vm10, %v1490_v9, 0.0 }
 0x1bd   : > { %v1511_v28 = vadd.f32 %v1510_v25, %v1509_v21 }
 0x1be   : > { %1571 = vst.msk [vmem:[%s2297_s26 + $0xc] sm:$0xf] %vm237_vm0, %v1563_v15  ;;  %v1542_v26 = vsel %vm1504_vm10, %v1532_v19, 0.0 }
 0x1bf   : > { %v1543_v30 = vadd.f32 %v1542_v26, %v1541_v27  ;;  %v1513_v33 = vadd.f32 %v1512_v32, %v1511_v28 }
 0x1c1   : > { %v1545_v35 = vadd.f32 %v1544_v34, %v1543_v30  ;;  %v1515_v40 = vadd.f32 %v1514_v38, %v1513_v33 }
 0x1c3   : > { %v1547_v43 = vadd.f32 %v1546_v8, %v1545_v35 }
 0x1cc   : > { %v1498_v31 = vpop.f32.mrf.mxu3 }
 0x1cd   : > { %v1566_v6 = vpack.c.bf16 %v1498_v31, %v1498_v31  ;;  %v1535_v37 = vmul.f32 %v1498_v31, %v1498_v31  ;;  %v1516_v10 = vsel %vm1504_vm10, %v1498_v31, 0.0 }
 0x1ce   : > { %v1517_v42 = vadd.f32 %v1516_v10, %v1515_v40 }
 0x1cf   : > { %1574 = vst.msk [vmem:[%s2297_s26 + $0x18] sm:$0xf] %vm237_vm0, %v1566_v6  ;;  %v1548_v41 = vsel %vm1504_vm10, %v1535_v37, 0.0 }
 0x1d0   : > { %v1549_v46 = vadd.f32 %v1548_v41, %v1547_v43 }
 0x1d4   : > { %v1500_v44 = vpop.f32.mrf.mxu3 }
 0x1d5   : > { %v1518_v39 = vsel %vm1504_vm10, %v1500_v44, 0.0  ;;  %v1536_v45 = vmul.f32 %v1500_v44, %v1500_v44  ;;  %v1567_v22 = vpack.c.bf16 %v1500_v44, %v1500_v44 }
 0x1d6   : > { %v1519_v47 = vadd.f32 %v1518_v39, %v1517_v42 }
 0x1d7   : > { %v1550_v48 = vsel %vm1504_vm10, %v1536_v45, 0.0  ;;  %1575 = vst.msk [vmem:[%s2297_s26 + $0x1c] sm:$0xf] %vm237_vm0, %v1567_v22 }
 0x1d8   : > { %v1520_v49 = vrot.slane %v1519_v47, 4  ;;  %v1551_v51 = vadd.f32 %v1550_v48, %v1549_v46 }
 0x1da   : > { %v1521_v2 = vadd.f32 %v1520_v49, %v1519_v47  ;;  %v1552_v53 = vrot.slane %v1551_v51, 4 }
 0x1dc   : > { %v1522_v54 = vrot.slane %v1521_v2, 2  ;;  %v1553_v55 = vadd.f32 %v1552_v53, %v1551_v51 }
 0x1de   : > { %v1523_v56 = vadd.f32 %v1522_v54, %v1521_v2  ;;  %v1554_v57 = vrot.slane %v1553_v55, 2 }
 0x1e0   : > { %v1524_v58 = vrot.slane %v1523_v56, 1  ;;  %v1555_v5 = vadd.f32 %v1554_v57, %v1553_v55 }
 0x1e2   : > { %v1525_v50 = vadd.f32 %v1524_v58, %v1523_v56  ;;  %v1556_v60 = vrot.slane %v1555_v5, 1 }
 0x1e4   : > { %v1526_v62 = vadd.f32 %v1525_v50, %v1503_v59  ;;  %v1557_v63 = vadd.f32 %v1556_v60, %v1555_v5 }
 0x1e6   : > { %1527 = vst.msk [vmem:[%s2307_s20] sm:$0x1] %vm239_vm1, %v1526_v62  ;;  %v1558_v3 = vadd.f32 %v1557_v63, %v1528_v61 }
 0x1e8   : > { %1559 = vst.msk [vmem:[%s2307_s20 + $0x1] sm:$0x1] %vm239_vm1, %v1558_v3 }
 0x1e9 PF: > { %s16_s18 = sadd.s32 1, %s1804_s18  }
 0x1ea   : > { %p13_p4 = scmp.ge.s32.totalorder %s16_s18, 4  }
 0x1ec   :  { %15 = sbr.rel (!%p13_p4) target bundleno = 1 (0x1), region = 81 }

</bundles_post_ra>
